<compile_context>
chip_gen: v7x
topology: tpu7x:2x2x1
jax: 0.10.0
libtpu: 0.0.40
codegen_flags: <defaults>
</compile_context>

<pallas_src>
from typing import Sequence

import jax
import jax.numpy as jnp
from jax.experimental import pallas as pl
from jax.experimental.pallas import tpu as pltpu


_MIB = 1024 * 1024
_TM_ALIGN = 16   # bf16 packs 2 rows/sublane; also a multiple of the f32 rule (8)


def _round_up(x: int, m: int) -> int:
    return ((x + m - 1) // m) * m


def _vmem_capacity_bytes() -> int:
    """Per-core VMEM capacity (generation-aware); conservative fallback = v7x."""
    try:
        return int(pltpu.get_tpu_info().vmem_capacity_bytes)
    except Exception:
        return 64 * _MIB


def _mgx_mlp_kernel(x_ref, w1_ref, b1_ref, w2_ref, b2_ref, o_ref):
    """Fused: ReLU(x @ W1 + b1) @ W2 + b2, f32 accumulation on the MXU.

    x is expected to already be in the compute (weight) dtype — the astype is a
    no-op then.  Biases arrive in f32 so the elementwise tail keeps full
    precision (no bf16 round-trip on the accumulator).
    """
    w1 = w1_ref[...]
    x = x_ref[...].astype(w1.dtype)
    h = jnp.dot(x, w1, preferred_element_type=jnp.float32)
    h = jnp.maximum(h + b1_ref[...], 0.0)          # b1 is f32

    w2 = w2_ref[...]
    y = jnp.dot(h.astype(w2.dtype), w2, preferred_element_type=jnp.float32)
    o_ref[...] = (y + b2_ref[...]).astype(o_ref.dtype)


class MGXModule:
    """JAX/Pallas analogue of torch_migraphx's MGXModule.

    Holds a "compiled program" (deterministic weights for a 2-layer MLP),
    named inputs/outputs, and optional bf16/"fp16" quantization.  forward()
    binds inputs by position, runs the fused Pallas kernel, and returns the
    single output tensor (matching the `len(outs) == 1` branch).
    """

    def __init__(self,
                 d_in: int = 256,
                 d_hid: int = 512,
                 d_out: int = 256,
                 input_names: Sequence[str] = ("x",),
                 output_names: Sequence[str] = ("main:#output_0",),
                 quantize_fp16: bool = False,
                 quantize_bf16: bool = False,
                 tile_m: int = 1024):
        self.input_names = list(input_names)
        self.output_names = list(output_names)
        self.quantize_fp16 = quantize_fp16
        self.quantize_bf16 = quantize_bf16
        self._tile_m = _round_up(max(_TM_ALIGN, tile_m), _TM_ALIGN)
        # Grid-invariant operands get pl.Buffered(1); flips to False (default
        # double buffering) if the running JAX rejects pipeline_mode.
        self._weights_single_buffered = True
        self.initialized = False
        self._init_program(d_in, d_hid, d_out)

    # -- stand-in for program.compile() + get_parameter_shapes() -------------
    def _init_program(self, d_in, d_hid, d_out):
        # Lane-dense feature dims keep MXU passes and output stores full-width
        # (prefer 256-multiples for the v6e/v7x 256x256 MXU; 128 is the floor).
        assert d_in % 128 == 0 and d_hid % 128 == 0 and d_out % 128 == 0, (
            "feature dims must be multiples of 128 for lane-dense layouts")

        key = jax.random.PRNGKey(0)
        k1, k2, k3, k4 = jax.random.split(key, 4)
        self.w1 = jax.random.normal(k1, (d_in, d_hid), jnp.float32) * 0.1
        self.b1 = jax.random.normal(k2, (1, d_hid), jnp.float32) * 0.1
        self.w2 = jax.random.normal(k3, (d_hid, d_out), jnp.float32) * 0.1
        self.b2 = jax.random.normal(k4, (1, d_out), jnp.float32) * 0.1

        if self.quantize_bf16 or self.quantize_fp16:
            # Quantized program: weights, activations and output all bf16; the
            # MXU still accumulates in f32.
            self.compute_dtype = jnp.bfloat16
            self.in_dtype = jnp.bfloat16
            self.out_dtype = jnp.bfloat16
        else:
            # TODO(synk): could run bf16-on-MXU with f32 accumulation here too
            # (2-3x MXU throughput) if MGX fp32 semantics tolerate it; kept
            # native f32 matmul for parity with the non-quantized program.
            self.compute_dtype = jnp.float32
            self.in_dtype = jnp.float32
            self.out_dtype = jnp.float32

        # Cache weights in the compute dtype once, at "compile" time; biases
        # stay f32 (added on the f32 accumulator).
        self.w1_c = self.w1.astype(self.compute_dtype)
        self.w2_c = self.w2.astype(self.compute_dtype)
        self.input_mgx_shapes = [((None, d_in), jnp.dtype(self.in_dtype).name)]
        self.initialized = True

    def _check_initialized(self):
        if not self.initialized:
            raise RuntimeError("MGXModule is not initialized.")

    # -- tile / VMEM planning -------------------------------------------------
    def _plan(self, B, d_in, d_hid, d_out, x_bytes):
        o_bytes = jnp.dtype(self.out_dtype).itemsize
        cd_bytes = jnp.dtype(self.compute_dtype).itemsize

        cap = _vmem_capacity_bytes()
        budget = int(cap * 0.70)              # headroom for compiler scratch

        # Per-batch-row streamed VMEM: double-buffered x and out tiles + f32 h.
        per_row = 2 * d_in * x_bytes + 2 * d_out * o_bytes + 4 * d_hid
        # Grid-invariant residents: weights (+ tiny biases).
        w_buffers = 1 if self._weights_single_buffered else 2
        fixed = ((d_in * d_hid + d_hid * d_out) * cd_bytes * w_buffers
                 + (d_hid + d_out) * 4 * 2)

        tm_vmem = ((budget - fixed) // per_row) // _TM_ALIGN * _TM_ALIGN
        assert tm_vmem >= _TM_ALIGN, (
            "resident weights leave no room for a batch tile in VMEM; "
            "implement the K-axis accumulator grid (see TODO at top of file)")

        tm = min(self._tile_m, tm_vmem)
        if B <= tm:
            # One block covers the whole batch (block == full array dim is
            # always legal -> no padding, no ragged handling needed).
            tm = B
        # Prefer >= 2 grid steps (keeps both v7x TensorCores busy under
        # dimension_semantics=("parallel",)) as long as tiles stay >= 256 rows
        # (>= 256-row tiles already sit near the HBM roofline).
        half = _round_up(pl.cdiv(B, 2), _TM_ALIGN)
        if half >= 256 and half < tm:
            tm = half

        need = fixed + per_row * _round_up(tm, _TM_ALIGN)
        assert need <= cap, (
            f"kernel VMEM requirement {need} B exceeds chip capacity {cap} B")
        vmem_limit = int(min(int(cap * 0.9), max(2 * need, 32 * _MIB)))
        return tm, vmem_limit

    # -- stand-in for program.run_async(...) ----------------------------------
    def _run_program(self, x):
        B, d_in = x.shape
        d_hid = self.w1_c.shape[1]
        d_out = self.w2_c.shape[1]
        assert d_in == self.w1_c.shape[0], "input feature dim mismatch"

        tm, vmem_limit = self._plan(B, d_in, d_hid, d_out,
                                    jnp.dtype(x.dtype).itemsize)
        grid = (pl.cdiv(B, tm),)   # ragged last block handled by clamped DMAs

        def call(single_buffer_weights):
            wb = ({"pipeline_mode": pl.Buffered(1)}
                  if single_buffer_weights else {})
            return pl.pallas_call(
                _mgx_mlp_kernel,
                out_shape=jax.ShapeDtypeStruct((B, d_out), self.out_dtype),
                grid_spec=pl.GridSpec(
                    grid=grid,
                    in_specs=[
                        # activations: tiled over the batch grid axis
                        pl.BlockSpec((tm, d_in), lambda i: (i, 0)),
                        # weights / biases: constant block index -> fetched
                        # once, VMEM-resident across all grid steps
                        pl.BlockSpec((d_in, d_hid), lambda i: (0, 0), **wb),
                        pl.BlockSpec((1, d_hid), lambda i: (0, 0), **wb),
                        pl.BlockSpec((d_hid, d_out), lambda i: (0, 0), **wb),
                        pl.BlockSpec((1, d_out), lambda i: (0, 0), **wb),
                    ],
                    out_specs=pl.BlockSpec((tm, d_out), lambda i: (i, 0)),
                ),
                compiler_params=pltpu.CompilerParams(
                    dimension_semantics=("parallel",),   # shards across v7x TCs
                    vmem_limit_bytes=vmem_limit),
            )(x, self.w1_c, self.b1, self.w2_c, self.b2)

        if self._weights_single_buffered:
            try:
                return call(True)
            except Exception:
                # pl.Buffered(1) only matters for halving resident-weight VMEM
                # at large dims; fall back cleanly if this JAX rejects it.
                self._weights_single_buffered = False
                return self._run_program(x)
        return call(False)

    def forward(self, *inputs):
        self._check_initialized()
        assert len(inputs) == len(self.input_names), (
            f"Wrong number of inputs, expected {len(self.input_names)}, "
            f"got {len(inputs)}.")
        outs = [self._run_program(inputs[0])]
        if len(outs) == 1:
            return outs[0]
        return tuple(outs)

    __call__ = forward


def _reference(x, mod: "MGXModule"):
    """Pure-JAX reference for correctness checking (same dtype recipe)."""
    xc = x.astype(mod.compute_dtype)
    h = jnp.dot(xc, mod.w1_c, preferred_element_type=jnp.float32)
    h = jnp.maximum(h + mod.b1, 0.0)
    y = jnp.dot(h.astype(mod.compute_dtype), mod.w2_c,
                preferred_element_type=jnp.float32)
    return (y + mod.b2).astype(mod.out_dtype)


if __name__ == "__main__":
    d_in, d_hid, d_out = 256, 512, 256   # 256-multiples fill the v6e/v7x MXU

    # --- f32 program, small batch (single full-batch block, grid=1) ----------
    mod = MGXModule(d_in=d_in, d_hid=d_hid, d_out=d_out, input_names=["x"])
    x = jax.random.normal(jax.random.PRNGKey(0), (256, d_in), jnp.float32)
    out = jax.block_until_ready(mod(x))
    ref = _reference(x, mod)
    assert out.shape == (256, d_out) and out.dtype == jnp.float32
    assert jnp.allclose(out, ref, atol=2e-3, rtol=2e-3), "f32 mismatch vs reference"

    # --- f32 program, larger batch -> 2-step 'parallel' grid, resident weights
    x_big = jax.random.normal(jax.random.PRNGKey(2), (1024, d_in), jnp.float32)
    out_big = jax.block_until_ready(mod(x_big))
    ref_big = _reference(x_big, mod)
    assert out_big.shape == (1024, d_out)
    assert jnp.allclose(out_big, ref_big, atol=2e-3, rtol=2e-3), "f32 tiled mismatch"

    # --- quantized (bf16) program: bf16 activations end-to-end, B=200 --------
    # Quantized-program contract: the producer supplies activations already in
    # the compute dtype (no standalone wrapper-side astype / HBM pass).
    mod_q = MGXModule(d_in=d_in, d_hid=d_hid, d_out=d_out, input_names=["x"],
                      quantize_bf16=True)
    xq = jax.random.normal(jax.random.PRNGKey(1), (200, d_in),
                           jnp.float32).astype(jnp.bfloat16)
    out_q = jax.block_until_ready(mod_q(xq))
    ref_q = _reference(xq, mod_q)
    assert out_q.shape == (200, d_out) and out_q.dtype == jnp.bfloat16
    assert jnp.allclose(out_q.astype(jnp.float32), ref_q.astype(jnp.float32),
                        atol=2e-2, rtol=2e-2), "bf16 mismatch vs reference"

    print("KERNEL_OK")
</pallas_src>

<mosaic_0001>
module attributes {stable_mosaic.version = 11 : i64} {
  func.func @_mgx_mlp_kernel(%arg0: i32, %arg1: memref<256x256xf32, #tpu.memory_space<vmem>>, %arg2: memref<256x512xf32, #tpu.memory_space<vmem>>, %arg3: memref<1x512xf32, #tpu.memory_space<vmem>>, %arg4: memref<512x256xf32, #tpu.memory_space<vmem>>, %arg5: memref<1x256xf32, #tpu.memory_space<vmem>>, %arg6: memref<256x256xf32, #tpu.memory_space<vmem>>) attributes {dimension_semantics = [#tpu.dimension_semantics<parallel>], iteration_bounds = array<i64: 1>, scalar_prefetch = 0 : i64, scratch_operands = 0 : i64, tpu.core_type = #tpu.core_type<tc>, window_params = [{transform_indices = @transform_0, window_bounds = array<i64: 256, 256>}, {pipeline_mode = #tpu.pipeline_mode<synchronous>, transform_indices = @transform_1, window_bounds = array<i64: 256, 512>}, {pipeline_mode = #tpu.pipeline_mode<synchronous>, transform_indices = @transform_2, window_bounds = array<i64: 1, 512>}, {pipeline_mode = #tpu.pipeline_mode<synchronous>, transform_indices = @transform_3, window_bounds = array<i64: 512, 256>}, {pipeline_mode = #tpu.pipeline_mode<synchronous>, transform_indices = @transform_4, window_bounds = array<i64: 1, 256>}, {transform_indices = @transform_5, window_bounds = array<i64: 256, 256>}]} {
    %c0 = arith.constant 0 : index
    %c0_0 = arith.constant 0 : index
    %0 = vector.load %arg2[%c0, %c0_0] : memref<256x512xf32, #tpu.memory_space<vmem>>, vector<256x512xf32>
    %c0_1 = arith.constant 0 : index
    %c0_2 = arith.constant 0 : index
    %1 = vector.load %arg1[%c0_1, %c0_2] : memref<256x256xf32, #tpu.memory_space<vmem>>, vector<256x256xf32>
    %cst = arith.constant dense<0.000000e+00> : vector<256x512xf32>
    %2 = tpu.matmul %1, %0, %cst {dimension_numbers = #tpu.dot_dimension_numbers<[1], [0], [0], [1], [0, 0, 1, 1], [], []>} : vector<256x256xf32>, vector<256x512xf32>, vector<256x512xf32> -> vector<256x512xf32>
    %c0_3 = arith.constant 0 : index
    %c0_4 = arith.constant 0 : index
    %3 = vector.load %arg3[%c0_3, %c0_4] : memref<1x512xf32, #tpu.memory_space<vmem>>, vector<1x512xf32>
    %4 = vector.broadcast %3 : vector<1x512xf32> to vector<256x512xf32>
    %5 = arith.addf %2, %4 : vector<256x512xf32>
    %cst_5 = arith.constant 0.000000e+00 : f32
    %6 = vector.broadcast %cst_5 : f32 to vector<256x512xf32>
    %7 = arith.maximumf %5, %6 : vector<256x512xf32>
    %c0_6 = arith.constant 0 : index
    %c0_7 = arith.constant 0 : index
    %8 = vector.load %arg4[%c0_6, %c0_7] : memref<512x256xf32, #tpu.memory_space<vmem>>, vector<512x256xf32>
    %cst_8 = arith.constant dense<0.000000e+00> : vector<256x256xf32>
    %9 = tpu.matmul %7, %8, %cst_8 {dimension_numbers = #tpu.dot_dimension_numbers<[1], [0], [0], [1], [0, 0, 1, 1], [], []>} : vector<256x512xf32>, vector<512x256xf32>, vector<256x256xf32> -> vector<256x256xf32>
    %c0_9 = arith.constant 0 : index
    %c0_10 = arith.constant 0 : index
    %10 = vector.load %arg5[%c0_9, %c0_10] : memref<1x256xf32, #tpu.memory_space<vmem>>, vector<1x256xf32>
    %11 = vector.broadcast %10 : vector<1x256xf32> to vector<256x256xf32>
    %12 = arith.addf %9, %11 : vector<256x256xf32>
    %c0_11 = arith.constant 0 : index
    %c0_12 = arith.constant 0 : index
    %13 = vector.load %arg6[%c0_11, %c0_12] : memref<256x256xf32, #tpu.memory_space<vmem>>, vector<256x256xf32>
    tpu.vector_store %arg6[%c0_11, %c0_12], %12 {strides = array<i32>} : memref<256x256xf32, #tpu.memory_space<vmem>>, vector<256x256xf32>,
    return
  }
  func.func @transform_0(%arg0: i32) -> (i32, i32) {
    %c0_i32 = arith.constant 0 : i32
    %c0_i32_0 = arith.constant 0 : i32
    return %arg0, %c0_i32 : i32, i32
  }
  func.func @transform_1(%arg0: i32) -> (i32, i32) {
    %c0_i32 = arith.constant 0 : i32
    %c0_i32_0 = arith.constant 0 : i32
    %c0_i32_1 = arith.constant 0 : i32
    return %c0_i32, %c0_i32_0 : i32, i32
  }
  func.func @transform_2(%arg0: i32) -> (i32, i32) {
    %c0_i32 = arith.constant 0 : i32
    %c0_i32_0 = arith.constant 0 : i32
    %c0_i32_1 = arith.constant 0 : i32
    return %c0_i32, %c0_i32_0 : i32, i32
  }
  func.func @transform_3(%arg0: i32) -> (i32, i32) {
    %c0_i32 = arith.constant 0 : i32
    %c0_i32_0 = arith.constant 0 : i32
    %c0_i32_1 = arith.constant 0 : i32
    return %c0_i32, %c0_i32_0 : i32, i32
  }
  func.func @transform_4(%arg0: i32) -> (i32, i32) {
    %c0_i32 = arith.constant 0 : i32
    %c0_i32_0 = arith.constant 0 : i32
    %c0_i32_1 = arith.constant 0 : i32
    return %c0_i32, %c0_i32_0 : i32, i32
  }
  func.func @transform_5(%arg0: i32) -> (i32, i32) {
    %c0_i32 = arith.constant 0 : i32
    %c0_i32_0 = arith.constant 0 : i32
    return %arg0, %c0_i32 : i32, i32
  }
}

module attributes {stable_mosaic.version = 11 : i64} {
  func.func @_mgx_mlp_kernel(%arg0: i32, %arg1: memref<256x256xf32, #tpu.memory_space<vmem>>, %arg2: memref<256x512xf32, #tpu.memory_space<vmem>>, %arg3: memref<1x512xf32, #tpu.memory_space<vmem>>, %arg4: memref<512x256xf32, #tpu.memory_space<vmem>>, %arg5: memref<1x256xf32, #tpu.memory_space<vmem>>, %arg6: memref<256x256xf32, #tpu.memory_space<vmem>>) attributes {dimension_semantics = [#tpu.dimension_semantics<parallel>], iteration_bounds = array<i64: 1>, scalar_prefetch = 0 : i64, scratch_operands = 0 : i64, tpu.core_type = #tpu.core_type<tc>, window_params = [{transform_indices = @transform_0, window_bounds = array<i64: 256, 256>}, {pipeline_mode = #tpu.pipeline_mode<synchronous>, transform_indices = @transform_1, window_bounds = array<i64: 256, 512>}, {pipeline_mode = #tpu.pipeline_mode<synchronous>, transform_indices = @transform_2, window_bounds = array<i64: 1, 512>}, {pipeline_mode = #tpu.pipeline_mode<synchronous>, transform_indices = @transform_3, window_bounds = array<i64: 512, 256>}, {pipeline_mode = #tpu.pipeline_mode<synchronous>, transform_indices = @transform_4, window_bounds = array<i64: 1, 256>}, {transform_indices = @transform_5, window_bounds = array<i64: 256, 256>}]} {
    %c0 = arith.constant 0 : index
    %c0_0 = arith.constant 0 : index
    %0 = vector.load %arg2[%c0, %c0_0] : memref<256x512xf32, #tpu.memory_space<vmem>>, vector<256x512xf32>
    %c0_1 = arith.constant 0 : index
    %c0_2 = arith.constant 0 : index
    %1 = vector.load %arg1[%c0_1, %c0_2] : memref<256x256xf32, #tpu.memory_space<vmem>>, vector<256x256xf32>
    %cst = arith.constant dense<0.000000e+00> : vector<256x512xf32>
    %2 = tpu.matmul %1, %0, %cst {dimension_numbers = #tpu.dot_dimension_numbers<[1], [0], [0], [1], [0, 0, 1, 1], [], []>} : vector<256x256xf32>, vector<256x512xf32>, vector<256x512xf32> -> vector<256x512xf32>
    %c0_3 = arith.constant 0 : index
    %c0_4 = arith.constant 0 : index
    %3 = vector.load %arg3[%c0_3, %c0_4] : memref<1x512xf32, #tpu.memory_space<vmem>>, vector<1x512xf32>
    %4 = vector.broadcast %3 : vector<1x512xf32> to vector<256x512xf32>
    %5 = arith.addf %2, %4 : vector<256x512xf32>
    %cst_5 = arith.constant 0.000000e+00 : f32
    %6 = vector.broadcast %cst_5 : f32 to vector<256x512xf32>
    %7 = arith.maximumf %5, %6 : vector<256x512xf32>
    %c0_6 = arith.constant 0 : index
    %c0_7 = arith.constant 0 : index
    %8 = vector.load %arg4[%c0_6, %c0_7] : memref<512x256xf32, #tpu.memory_space<vmem>>, vector<512x256xf32>
    %cst_8 = arith.constant dense<0.000000e+00> : vector<256x256xf32>
    %9 = tpu.matmul %7, %8, %cst_8 {dimension_numbers = #tpu.dot_dimension_numbers<[1], [0], [0], [1], [0, 0, 1, 1], [], []>} : vector<256x512xf32>, vector<512x256xf32>, vector<256x256xf32> -> vector<256x256xf32>
    %c0_9 = arith.constant 0 : index
    %c0_10 = arith.constant 0 : index
    %10 = vector.load %arg5[%c0_9, %c0_10] : memref<1x256xf32, #tpu.memory_space<vmem>>, vector<1x256xf32>
    %11 = vector.broadcast %10 : vector<1x256xf32> to vector<256x256xf32>
    %12 = arith.addf %9, %11 : vector<256x256xf32>
    %c0_11 = arith.constant 0 : index
    %c0_12 = arith.constant 0 : index
    %13 = vector.load %arg6[%c0_11, %c0_12] : memref<256x256xf32, #tpu.memory_space<vmem>>, vector<256x256xf32>
    tpu.vector_store %arg6[%c0_11, %c0_12], %12 {strides = array<i32>} : memref<256x256xf32, #tpu.memory_space<vmem>>, vector<256x256xf32>,
    return
  }
  func.func @transform_0(%arg0: i32) -> (i32, i32) {
    %c0_i32 = arith.constant 0 : i32
    %c0_i32_0 = arith.constant 0 : i32
    return %arg0, %c0_i32 : i32, i32
  }
  func.func @transform_1(%arg0: i32) -> (i32, i32) {
    %c0_i32 = arith.constant 0 : i32
    %c0_i32_0 = arith.constant 0 : i32
    %c0_i32_1 = arith.constant 0 : i32
    return %c0_i32, %c0_i32_0 : i32, i32
  }
  func.func @transform_2(%arg0: i32) -> (i32, i32) {
    %c0_i32 = arith.constant 0 : i32
    %c0_i32_0 = arith.constant 0 : i32
    %c0_i32_1 = arith.constant 0 : i32
    return %c0_i32, %c0_i32_0 : i32, i32
  }
  func.func @transform_3(%arg0: i32) -> (i32, i32) {
    %c0_i32 = arith.constant 0 : i32
    %c0_i32_0 = arith.constant 0 : i32
    %c0_i32_1 = arith.constant 0 : i32
    return %c0_i32, %c0_i32_0 : i32, i32
  }
  func.func @transform_4(%arg0: i32) -> (i32, i32) {
    %c0_i32 = arith.constant 0 : i32
    %c0_i32_0 = arith.constant 0 : i32
    %c0_i32_1 = arith.constant 0 : i32
    return %c0_i32, %c0_i32_0 : i32, i32
  }
  func.func @transform_5(%arg0: i32) -> (i32, i32) {
    %c0_i32 = arith.constant 0 : i32
    %c0_i32_0 = arith.constant 0 : i32
    return %arg0, %c0_i32 : i32, i32
  }
}

</mosaic_0001>

<bundles_post_ra>
// kernel: tpu_custom_call.1
= control target key start
LH: loop header
LB: loop body
LE: loop exit
PB: predicated region body
PF: predicated region fallthrough
CT: control target
= control target key end

     0   :  { %10 = vsyncpa [#allocation3], 0  ;;  %s2721_s0 = inlined_call_operand.hbm [shape: f32[256,256], index: 0, kind: input, shape index: {}]   ;;  %s2722_s1 = inlined_call_operand.hbm [shape: f32[256,512], index: 1, kind: input, shape index: {}]   ;;  %s2723_s2 = inlined_call_operand.vmem [shape: f32[1,512], index: 2, kind: input, shape index: {}]   ;;  %s2724_s3 = inlined_call_operand.hbm [shape: f32[512,256], index: 3, kind: input, shape index: {}]   ;;  %s2725_s4 = inlined_call_operand.vmem [shape: f32[1,256], index: 4, kind: input, shape index: {}]   ;;  %s2726_s5 = inlined_call_operand.hbm [shape: f32[256,256], index: 5, kind: output, shape index: {}]  }
   0x1   :  { %11 = vsyncpa [#allocation6], 0 }
   0x2   :  { %12 = vsyncpa [#allocation4], 0  ;;  %s2140_s18 = smov [#allocation5]   ;;  %s2046_s22 = scalar_lea.hbm %s2722_s1, 16384 }
   0x3   :  { %s30_s19 = sshll.u32 %s2140_s18, 4  ;;  %p2047_p0 = scmp.ne.s32.totalorder %s2722_s1, %s2046_s22  ;;  %s31_s19 = int_to_ptr.vmem [resolvable:$true] %s30_s19 }
   0x4   :  { %p2050_p1 = scmp.lt.u32.totalorder %s2046_s22, %s2722_s1 }
   0x6   :  { %p2052_p2 = pnand %p2050_p1, %p2047_p0 }
   0x8   :  { %2055 = shalt.err (!%p2052_p2)
}
   0x9   :  { %s2056_s27 = scalar_lea.vmem %s31_s19, 16384  ;;  %p2061_p4 = scmp.lt.s32.totalorder %s31_s19, %s31_s19 }
   0xa   :  { %p2057_p3 = scmp.ne.s32.totalorder %s31_s19, %s2056_s27  ;;  %p2062_p5 = scmp.lt.s32.totalorder %s2056_s27, %s2056_s27 }
   0xc   :  { %p2063_p6 = por %p2062_p5, %p2061_p4 }
   0xe   :  { %p2064_p7 = pnand %p2063_p6, %p2057_p3 }
  0x10   :  { %2067 = shalt.err (!%p2064_p7)
}
  0x11   :  { %s2141_s28 = smov 512   ;;  %s2142_s29 = smov 32  }
  0x12   :  { %36 = dma.hbm_to_vmem [thread:$0]  %s2722_s1, 16384, %s31_s19, [#allocation6], %s2141_s28, %s2141_s28, %s2142_s29  }
  0x13   :  { %s2143_s7 = smov [#allocation2]   ;;  %s2068_s11 = scalar_lea.hbm %s2721_s0, 8192 }
  0x14   :  { %s18_s8 = sshll.u32 %s2143_s7, 4  ;;  %p2069_p8 = scmp.ne.s32.totalorder %s2721_s0, %s2068_s11  ;;  %s19_s8 = int_to_ptr.vmem [resolvable:$true] %s18_s8 }
  0x15   :  { %p2072_p9 = scmp.lt.u32.totalorder %s2068_s11, %s2721_s0 }
  0x17   :  { %p2074_p10 = pnand %p2072_p9, %p2069_p8 }
  0x19   :  { %2077 = shalt.err (!%p2074_p10)
}
  0x1a   :  { %s2078_s16 = scalar_lea.vmem %s19_s8, 8192  ;;  %p2083_p12 = scmp.lt.s32.totalorder %s19_s8, %s19_s8 }
  0x1b   :  { %p2079_p11 = scmp.ne.s32.totalorder %s19_s8, %s2078_s16  ;;  %p2084_p13 = scmp.lt.s32.totalorder %s2078_s16, %s2078_s16 }
  0x1d   :  { %p2085_p0 = por %p2084_p13, %p2083_p12 }
  0x1f   :  { %p2086_p1 = pnand %p2085_p0, %p2079_p11 }
  0x21   :  { %2089 = shalt.err (!%p2086_p1)
}
  0x22   :  { %s2144_s1 = smov 256   ;;  %s2145_s17 = smov 16  }
  0x23   :  { %24 = dma.hbm_to_vmem [thread:$0]  %s2721_s0, 8192, %s19_s8, [#allocation3], %s2144_s1, %s2144_s1, %s2145_s17  }
  0x24   :  { %s2146_s20 = smov [#allocation7]   ;;  %s2090_s24 = scalar_lea.hbm %s2724_s3, 16384 }
  0x25   :  { %s44_s21 = sshll.u32 %s2146_s20, 4  ;;  %p2091_p2 = scmp.ne.s32.totalorder %s2724_s3, %s2090_s24  ;;  %s45_s21 = int_to_ptr.vmem [resolvable:$true] %s44_s21 }
  0x26   :  { %p2094_p3 = scmp.lt.u32.totalorder %s2090_s24, %s2724_s3 }
  0x28   :  { %p2096_p4 = pnand %p2094_p3, %p2091_p2 }
  0x2a   :  { %2099 = shalt.err (!%p2096_p4)
}
  0x2b   :  { %s2100_s29 = scalar_lea.vmem %s45_s21, 16384  ;;  %p2105_p6 = scmp.lt.s32.totalorder %s45_s21, %s45_s21 }
  0x2c   :  { %p2101_p5 = scmp.ne.s32.totalorder %s45_s21, %s2100_s29  ;;  %p2106_p7 = scmp.lt.s32.totalorder %s2100_s29, %s2100_s29 }
  0x2e   :  { %p2107_p8 = por %p2106_p7, %p2105_p6 }
  0x30   :  { %p2108_p9 = pnand %p2107_p8, %p2101_p5 }
  0x32   :  { %2111 = shalt.err (!%p2108_p9)
}
  0x33   :  { %50 = dma.hbm_to_vmem [thread:$0]  %s2724_s3, 16384, %s45_s21, [#allocation6], %s2144_s1, %s2144_s1, %s2145_s17  }
  0x34   :  { %2134 = dma.done.wait [#allocation3], 8192  }
  0x35   :  { %2135 = vsyncadd [#allocation3], 4294959104 }
  0x36   :  { %2136 = dma.done.wait [#allocation6], 32768  }
  0x37   :  { %2137 = vsyncadd [#allocation6], 4294934528  ;;  %v63_v0 = vld [vmem:[#allocation5 + $0x8] sm:$0xff]  ;;  %v62_v2 = vld [vmem:[#allocation5] sm:$0xff] }
  0x38   :  { %v67_v1 = vld [vmem:[#allocation5 + $0x28] sm:$0xff]  ;;  %v66_v4 = vld [vmem:[#allocation5 + $0x20] sm:$0xff] }
  0x39   :  { %v1654_v3 = vpack.c.bf16 %v67_v1, %v63_v0  ;;  %v71_v5 = vld [vmem:[#allocation5 + $0x48] sm:$0xff]  ;;  %v1656_v7 = vpack.c.bf16 %v66_v4, %v62_v2  ;;  %v70_v9 = vld [vmem:[#allocation5 + $0x40] sm:$0xff] }
  0x3a   :  { %v75_v6 = vld [vmem:[#allocation5 + $0x68] sm:$0xff]  ;;  %v74_v10 = vld [vmem:[#allocation5 + $0x60] sm:$0xff] }
  0x3b   :  { %v1658_v8 = vpack.c.bf16 %v75_v6, %v71_v5  ;;  %v79_v11 = vld [vmem:[#allocation5 + $0x88] sm:$0xff]  ;;  %1655 = vmatprep.subr.bf16.mxu1 %v1654_v3  ;;  %v1660_v13 = vpack.c.bf16 %v74_v10, %v70_v9  ;;  %v78_v15 = vld [vmem:[#allocation5 + $0x80] sm:$0xff] }
  0x3c   :  { %v83_v12 = vld [vmem:[#allocation5 + $0xa8] sm:$0xff]  ;;  %1657 = vmatpush1.bf16.msra.mxu1 %v1656_v7  ;;  %v82_v16 = vld [vmem:[#allocation5 + $0xa0] sm:$0xff] }
  0x3d   :  { %1659 = vmatprep.subr.bf16.mxu1 %v1658_v8  ;;  %v1662_v14 = vpack.c.bf16 %v83_v12, %v79_v11  ;;  %v87_v17 = vld [vmem:[#allocation5 + $0xc8] sm:$0xff]  ;;  %v1664_v19 = vpack.c.bf16 %v82_v16, %v78_v15  ;;  %v86_v21 = vld [vmem:[#allocation5 + $0xc0] sm:$0xff] }
  0x3e   :  { %v91_v18 = vld [vmem:[#allocation5 + $0xe8] sm:$0xff]  ;;  %v90_v22 = vld [vmem:[#allocation5 + $0xe0] sm:$0xff] }
  0x3f   :  { %v1666_v20 = vpack.c.bf16 %v91_v18, %v87_v17  ;;  %v95_v23 = vld [vmem:[#allocation5 + $0x108] sm:$0xff]  ;;  %v1668_v25 = vpack.c.bf16 %v90_v22, %v86_v21  ;;  %v94_v27 = vld [vmem:[#allocation5 + $0x100] sm:$0xff] }
  0x40   :  { %1661 = vmatpush1.bf16.msra.mxu1 %v1660_v13  ;;  %v99_v24 = vld [vmem:[#allocation5 + $0x128] sm:$0xff]  ;;  %v98_v28 = vld [vmem:[#allocation5 + $0x120] sm:$0xff] }
  0x41   :  { %1663 = vmatprep.subr.bf16.mxu1 %v1662_v14  ;;  %v1670_v26 = vpack.c.bf16 %v99_v24, %v95_v23  ;;  %v103_v29 = vld [vmem:[#allocation5 + $0x148] sm:$0xff]  ;;  %v1672_v31 = vpack.c.bf16 %v98_v28, %v94_v27  ;;  %v102_v33 = vld [vmem:[#allocation5 + $0x140] sm:$0xff] }
  0x42   :  { %v107_v30 = vld [vmem:[#allocation5 + $0x168] sm:$0xff]  ;;  %v106_v34 = vld [vmem:[#allocation5 + $0x160] sm:$0xff] }
  0x43   :  { %v1674_v32 = vpack.c.bf16 %v107_v30, %v103_v29  ;;  %v111_v35 = vld [vmem:[#allocation5 + $0x188] sm:$0xff]  ;;  %v1676_v37 = vpack.c.bf16 %v106_v34, %v102_v33  ;;  %v110_v39 = vld [vmem:[#allocation5 + $0x180] sm:$0xff]  ;;  %v69_v33 = vld [vmem:[#allocation5 + $0x38] sm:$0xff] }
  0x44   :  { %1665 = vmatpush1.bf16.msra.mxu1 %v1664_v19  ;;  %v115_v36 = vld [vmem:[#allocation5 + $0x1a8] sm:$0xff]  ;;  %v114_v40 = vld [vmem:[#allocation5 + $0x1a0] sm:$0xff] }
  0x45   :  { %1667 = vmatprep.subr.bf16.mxu1 %v1666_v20  ;;  %v1678_v38 = vpack.c.bf16 %v115_v36, %v111_v35  ;;  %v2220_v41 = vld [vmem:[#allocation2 + $0x8] sm:$0xff]  ;;  %v1680_v44 = vpack.c.bf16 %v114_v40, %v110_v39  ;;  %v118_v46 = vld [vmem:[#allocation5 + $0x1c0] sm:$0xff]  ;;  %v64_v36 = vld [vmem:[#allocation5 + $0x10] sm:$0xff] }
  0x46   :  { %v119_v42 = vld [vmem:[#allocation5 + $0x1c8] sm:$0xff]  ;;  %340 = vmatprep.mubr.f32.mxu1 %v2220_v41  ;;  %v122_v47 = vld [vmem:[#allocation5 + $0x1e0] sm:$0xff]  ;;  %v77_v39 = vld [vmem:[#allocation5 + $0x78] sm:$0xff] }
  0x47   :  { %v123_v43 = vld [vmem:[#allocation5 + $0x1e8] sm:$0xff]  ;;  %v1684_v50 = vpack.c.bf16 %v122_v47, %v118_v46  ;;  %v126_v52 = vld [vmem:[#allocation5 + $0x200] sm:$0xff]  ;;  %v76_v46 = vld [vmem:[#allocation5 + $0x70] sm:$0xff] }
  0x48   :  { %1669 = vmatpush1.bf16.msra.mxu1 %v1668_v25  ;;  %v1682_v45 = vpack.c.bf16 %v123_v43, %v119_v42  ;;  %v127_v48 = vld [vmem:[#allocation5 + $0x208] sm:$0xff]  ;;  %v130_v53 = vld [vmem:[#allocation5 + $0x220] sm:$0xff]  ;;  %v2225_v43 = vld [vmem:[#allocation2 + $0x18] sm:$0xff] }
  0x49   :  { %1671 = vmatprep.subr.bf16.mxu1 %v1670_v26  ;;  %v131_v49 = vld [vmem:[#allocation5 + $0x228] sm:$0xff]  ;;  %v1688_v56 = vpack.c.bf16 %v130_v53, %v126_v52  ;;  %v134_v58 = vld [vmem:[#allocation5 + $0x240] sm:$0xff]  ;;  %v81_v47 = vld [vmem:[#allocation5 + $0x98] sm:$0xff] }
  0x4a   :  { %v1686_v51 = vpack.c.bf16 %v131_v49, %v127_v48  ;;  %v135_v54 = vld [vmem:[#allocation5 + $0x248] sm:$0xff]  ;;  %v138_v59 = vld [vmem:[#allocation5 + $0x260] sm:$0xff]  ;;  %v85_v48 = vld [vmem:[#allocation5 + $0xb8] sm:$0xff] }
  0x4b   :  { %v139_v55 = vld [vmem:[#allocation5 + $0x268] sm:$0xff]  ;;  %v1692_v62 = vpack.c.bf16 %v138_v59, %v134_v58  ;;  %v142_v0 = vld [vmem:[#allocation5 + $0x280] sm:$0xff]  ;;  %v2229_v49 = vld [vmem:[#allocation2 + $0x10] sm:$0xff]  ;;  %v1726_v52 = vpack.c.bf16 %v85_v48, %v81_v47 }
  0x4c   :  { %1673 = vmatpush1.bf16.msra.mxu1 %v1672_v31  ;;  %v1690_v57 = vpack.c.bf16 %v139_v55, %v135_v54  ;;  %v143_v60 = vld [vmem:[#allocation5 + $0x288] sm:$0xff]  ;;  %v146_v1 = vld [vmem:[#allocation5 + $0x2a0] sm:$0xff]  ;;  %v80_v53 = vld [vmem:[#allocation5 + $0x90] sm:$0xff] }
  0x4d   :  { %1675 = vmatprep.subr.bf16.mxu1 %v1674_v32  ;;  %v147_v61 = vld [vmem:[#allocation5 + $0x2a8] sm:$0xff]  ;;  %v1696_v4 = vpack.c.bf16 %v146_v1, %v142_v0  ;;  %v150_v6 = vld [vmem:[#allocation5 + $0x2c0] sm:$0xff]  ;;  %v65_v32 = vld [vmem:[#allocation5 + $0x18] sm:$0xff] }
  0x4e   :  { %v1694_v63 = vpack.c.bf16 %v147_v61, %v143_v60  ;;  %v151_v2 = vld [vmem:[#allocation5 + $0x2c8] sm:$0xff]  ;;  %v154_v7 = vld [vmem:[#allocation5 + $0x2e0] sm:$0xff]  ;;  %v1718_v35 = vpack.c.bf16 %v69_v33, %v65_v32  ;;  %v84_v54 = vld [vmem:[#allocation5 + $0xb0] sm:$0xff] }
  0x4f   :  { %v155_v3 = vld [vmem:[#allocation5 + $0x2e8] sm:$0xff]  ;;  %v1700_v10 = vpack.c.bf16 %v154_v7, %v150_v6  ;;  %v158_v12 = vld [vmem:[#allocation5 + $0x300] sm:$0xff]  ;;  %v89_v55 = vld [vmem:[#allocation5 + $0xd8] sm:$0xff]  ;;  %v1728_v58 = vpack.c.bf16 %v84_v54, %v80_v53 }
  0x50   :  { %1677 = vmatpush1.bf16.msra.mxu1 %v1676_v37  ;;  %v1698_v5 = vpack.c.bf16 %v155_v3, %v151_v2  ;;  %v159_v8 = vld [vmem:[#allocation5 + $0x308] sm:$0xff]  ;;  %v162_v13 = vld [vmem:[#allocation5 + $0x320] sm:$0xff]  ;;  %v68_v37 = vld [vmem:[#allocation5 + $0x30] sm:$0xff] }
  0x51   :  { %1679 = vmatprep.subr.bf16.mxu1 %v1678_v38  ;;  %v163_v9 = vld [vmem:[#allocation5 + $0x328] sm:$0xff]  ;;  %v1704_v16 = vpack.c.bf16 %v162_v13, %v158_v12  ;;  %v166_v18 = vld [vmem:[#allocation5 + $0x340] sm:$0xff]  ;;  %v73_v38 = vld [vmem:[#allocation5 + $0x58] sm:$0xff]  ;;  %v1720_v42 = vpack.c.bf16 %v68_v37, %v64_v36 }
  0x52   :  { %v1702_v11 = vpack.c.bf16 %v163_v9, %v159_v8  ;;  %v167_v14 = vld [vmem:[#allocation5 + $0x348] sm:$0xff]  ;;  %v170_v19 = vld [vmem:[#allocation5 + $0x360] sm:$0xff]  ;;  %v2237_v59 = vld [vmem:[#allocation2 + $0x38] sm:$0xff] }
  0x53   :  { %v171_v15 = vld [vmem:[#allocation5 + $0x368] sm:$0xff]  ;;  %v1708_v22 = vpack.c.bf16 %v170_v19, %v166_v18  ;;  %v174_v24 = vld [vmem:[#allocation5 + $0x380] sm:$0xff]  ;;  %v88_v61 = vld [vmem:[#allocation5 + $0xd0] sm:$0xff] }
  0x54   :  { %1681 = vmatpush1.bf16.msra.mxu1 %v1680_v44  ;;  %v1706_v17 = vpack.c.bf16 %v171_v15, %v167_v14  ;;  %v175_v20 = vld [vmem:[#allocation5 + $0x388] sm:$0xff]  ;;  %v178_v25 = vld [vmem:[#allocation5 + $0x3a0] sm:$0xff]  ;;  %v1722_v44 = vpack.c.bf16 %v77_v39, %v73_v38  ;;  %v101_v0 = vld [vmem:[#allocation5 + $0x138] sm:$0xff] }
  0x55   :  { %1683 = vmatprep.subr.bf16.mxu1 %v1682_v45  ;;  %v179_v21 = vld [vmem:[#allocation5 + $0x3a8] sm:$0xff]  ;;  %v1712_v28 = vpack.c.bf16 %v178_v25, %v174_v24  ;;  %v182_v30 = vld [vmem:[#allocation5 + $0x3c0] sm:$0xff]  ;;  %v72_v45 = vld [vmem:[#allocation5 + $0x50] sm:$0xff] }
  0x56   :  { %v1710_v23 = vpack.c.bf16 %v179_v21, %v175_v20  ;;  %v183_v26 = vld [vmem:[#allocation5 + $0x3c8] sm:$0xff]  ;;  %v186_v31 = vld [vmem:[#allocation5 + $0x3e0] sm:$0xff]  ;;  %v2241_v1 = vld [vmem:[#allocation2 + $0x30] sm:$0xff] }
  0x57   :  { %v187_v27 = vld [vmem:[#allocation5 + $0x3e8] sm:$0xff]  ;;  %v1716_v34 = vpack.c.bf16 %v186_v31, %v182_v30  ;;  %v2223_v40 = vld [vmem:[#allocation2] sm:$0xff]  ;;  %v100_v6 = vld [vmem:[#allocation5 + $0x130] sm:$0xff] }
  0x58   :  { %1685 = vmatpush1.bf16.msra.mxu1 %v1684_v50  ;;  %v1714_v29 = vpack.c.bf16 %v187_v27, %v183_v26  ;;  %v1724_v50 = vpack.c.bf16 %v76_v46, %v72_v45  ;;  %v2243_v3 = vld [vmem:[#allocation2 + $0x48] sm:$0xff]  ;;  %v105_v7 = vld [vmem:[#allocation5 + $0x158] sm:$0xff]  ;;  %v2247_v9 = vld [vmem:[#allocation2 + $0x40] sm:$0xff] }
  0x59   :  { %1687 = vmatprep.subr.bf16.mxu1 %v1686_v51  ;;  %v2231_v51 = vld [vmem:[#allocation2 + $0x28] sm:$0xff]  ;;  %v109_v8 = vld [vmem:[#allocation5 + $0x178] sm:$0xff]  ;;  %v104_v13 = vld [vmem:[#allocation5 + $0x150] sm:$0xff] }
  0x5a   :  { %v1738_v12 = vpack.c.bf16 %v109_v8, %v105_v7  ;;  %v108_v14 = vld [vmem:[#allocation5 + $0x170] sm:$0xff]  ;;  %v113_v15 = vld [vmem:[#allocation5 + $0x198] sm:$0xff]  ;;  %v2255_v19 = vld [vmem:[#allocation2 + $0x68] sm:$0xff] }
  0x5b   :  { %v1740_v18 = vpack.c.bf16 %v108_v14, %v104_v13  ;;  %v112_v21 = vld [vmem:[#allocation5 + $0x190] sm:$0xff]  ;;  %v125_v24 = vld [vmem:[#allocation5 + $0x1f8] sm:$0xff]  ;;  %v2259_v25 = vld [vmem:[#allocation2 + $0x60] sm:$0xff] }
  0x5c   :  { %1689 = vmatpush1.bf16.msra.mxu1 %v1688_v56  ;;  %v93_v56 = vld [vmem:[#allocation5 + $0xf8] sm:$0xff]  ;;  %v124_v30 = vld [vmem:[#allocation5 + $0x1f0] sm:$0xff]  ;;  %v919_v33 = vld [vmem:[#allocation7 + $0x8] sm:$0xff] }
  0x5d   :  { %1691 = vmatprep.subr.bf16.mxu1 %v1690_v57  ;;  %v2235_v57 = vld [vmem:[#allocation2 + $0x20] sm:$0xff]  ;;  %v1730_v60 = vpack.c.bf16 %v93_v56, %v89_v55  ;;  %v2261_v26 = vld [vmem:[#allocation2 + $0x78] sm:$0xff]  ;;  %v920_v37 = vld [vmem:[#allocation7 + $0x10] sm:$0xff] }
  0x5e   :  { %v129_v31 = vld [vmem:[#allocation5 + $0x218] sm:$0xff]  ;;  %v918_v36 = vld [vmem:[#allocation7] sm:$0xff]  ;;  %v2265_v38 = vld [vmem:[#allocation2 + $0x70] sm:$0xff] }
  0x5f   :  { %v133_v32 = vld [vmem:[#allocation5 + $0x238] sm:$0xff]  ;;  %v2267_v39 = vld [vmem:[#allocation2 + $0x88] sm:$0xff]  ;;  %v128_v46 = vld [vmem:[#allocation5 + $0x210] sm:$0xff] }
  0x60   :  { %1693 = vmatpush1.bf16.msra.mxu1 %v1692_v62  ;;  %v92_v62 = vld [vmem:[#allocation5 + $0xf0] sm:$0xff]  ;;  %v1750_v45 = vpack.c.bf16 %v133_v32, %v129_v31  ;;  %v137_v48 = vld [vmem:[#allocation5 + $0x258] sm:$0xff]  ;;  %v922_v55 = vld [vmem:[#allocation7 + $0x20] sm:$0xff] }
  0x61   :  { %1695 = vmatprep.subr.bf16.mxu1 %v1694_v63  ;;  %v97_v63 = vld [vmem:[#allocation5 + $0x118] sm:$0xff]  ;;  %v1732_v2 = vpack.c.bf16 %v92_v62, %v88_v61  ;;  %v132_v47 = vld [vmem:[#allocation5 + $0x230] sm:$0xff]  ;;  %v2279_v14 = vld [vmem:[#allocation2 + $0xa8] sm:$0xff] }
  0x62   :  { %v925_v53 = vld [vmem:[#allocation7 + $0x38] sm:$0xff]  ;;  %v924_v56 = vld [vmem:[#allocation7 + $0x30] sm:$0xff]  ;;  %v1752_v61 = vpack.c.bf16 %v132_v47, %v128_v46  ;;  %v2283_v31 = vld [vmem:[#allocation2 + $0xa0] sm:$0xff] }
  0x63   :  { %v1788_v62 = vpack.c.bf16 %v924_v56, %v922_v55  ;;  %v929_v7 = vld [vmem:[#allocation7 + $0x58] sm:$0xff]  ;;  %v2277_v13 = vld [vmem:[#allocation2 + $0x90] sm:$0xff] }
  0x64   :  { %1697 = vmatpush1.bf16.msra.mxu1 %v1696_v4  ;;  %v1734_v4 = vpack.c.bf16 %v101_v0, %v97_v63  ;;  %v136_v0 = vld [vmem:[#allocation5 + $0x250] sm:$0xff]  ;;  %v2285_v32 = vld [vmem:[#allocation2 + $0xb8] sm:$0xff] }
  0x65   :  { %1699 = vmatprep.subr.bf16.mxu1 %v1698_v5  ;;  %v96_v5 = vld [vmem:[#allocation5 + $0x110] sm:$0xff]  ;;  %v937_v46 = vld [vmem:[#allocation7 + $0x98] sm:$0xff] }
  0x68   :  { %1701 = vmatpush1.bf16.msra.mxu1 %v1700_v10  ;;  %v1736_v10 = vpack.c.bf16 %v100_v6, %v96_v5  ;;  %v149_v5 = vld [vmem:[#allocation5 + $0x2b8] sm:$0xff]  ;;  %v927_v6 = vld [vmem:[#allocation7 + $0x48] sm:$0xff] }
  0x69   :  { %1703 = vmatprep.subr.bf16.mxu1 %v1702_v11  ;;  %v2249_v11 = vld [vmem:[#allocation2 + $0x58] sm:$0xff]  ;;  %v1790_v8 = vpack.c.bf16 %v929_v7, %v927_v6  ;;  %v938_v6 = vld [vmem:[#allocation7 + $0xa0] sm:$0xff]  ;;  %v940_v7 = vld [vmem:[#allocation7 + $0xb0] sm:$0xff] }
  0x6c   :  { %1705 = vmatpush1.bf16.msra.mxu1 %v1704_v16  ;;  %v117_v16 = vld [vmem:[#allocation5 + $0x1b8] sm:$0xff] }
  0x6d   :  { %1707 = vmatprep.subr.bf16.mxu1 %v1706_v17  ;;  %v2253_v17 = vld [vmem:[#allocation2 + $0x50] sm:$0xff]  ;;  %v1742_v20 = vpack.c.bf16 %v117_v16, %v113_v15 }
  0x70   :  { %1709 = vmatpush1.bf16.msra.mxu1 %v1708_v22  ;;  %v116_v22 = vld [vmem:[#allocation5 + $0x1b0] sm:$0xff] }
  0x71   :  { %1711 = vmatprep.subr.bf16.mxu1 %v1710_v23  ;;  %v121_v23 = vld [vmem:[#allocation5 + $0x1d8] sm:$0xff]  ;;  %v1744_v27 = vpack.c.bf16 %v116_v22, %v112_v21  ;;  %v148_v21 = vld [vmem:[#allocation5 + $0x2b0] sm:$0xff] }
  0x72   :  { %v153_v22 = vld [vmem:[#allocation5 + $0x2d8] sm:$0xff] }
  0x74   :  { %1713 = vmatpush1.bf16.msra.mxu1 %v1712_v28  ;;  %v1746_v28 = vpack.c.bf16 %v125_v24, %v121_v23  ;;  %v157_v23 = vld [vmem:[#allocation5 + $0x2f8] sm:$0xff]  ;;  %v931_v24 = vld [vmem:[#allocation7 + $0x68] sm:$0xff] }
  0x75   :  { %1715 = vmatprep.subr.bf16.mxu1 %v1714_v29  ;;  %v120_v29 = vld [vmem:[#allocation5 + $0x1d0] sm:$0xff] }
  0x78   :  { %1717 = vmatpush1.bf16.msra.mxu1 %v1716_v34  ;;  %v921_v34 = vld [vmem:[#allocation7 + $0x18] sm:$0xff] }
  0x79   :  { %1719 = vmatprep.subr.bf16.mxu1 %v1718_v35  ;;  %v1782_v35 = vpack.c.bf16 %v921_v34, %v919_v33 }
  0x7b   :  { %341 = vmatmul.mubr.f32.vlgmr.msra.gmra.mrb[0].mxu1 %v2223_v40  ;;  %1783 = vmatprep.subr.bf16.mxu0 %v1782_v35  ;;  %v1762_v35 = vpack.c.bf16 %v157_v23, %v153_v22  ;;  %v181_v22 = vld [vmem:[#allocation5 + $0x3b8] sm:$0xff]  ;;  %v943_v23 = vld [vmem:[#allocation7 + $0xc8] sm:$0xff] }
  0x7c   :  { %1721 = vmatpush1.bf16.msra.mxu1 %v1720_v42  ;;  %346 = vmatprep.mubr.f32.mxu1 %v2225_v43  ;;  %v1748_v42 = vpack.c.bf16 %v124_v30, %v120_v29  ;;  %v930_v29 = vld [vmem:[#allocation7 + $0x60] sm:$0xff]  ;;  %v932_v30 = vld [vmem:[#allocation7 + $0x70] sm:$0xff] }
  0x7d   :  { %1723 = vmatprep.subr.bf16.mxu1 %v1722_v44  ;;  %v1784_v44 = vpack.c.bf16 %v920_v37, %v918_v36  ;;  %v1796_v34 = vpack.c.bf16 %v932_v30, %v930_v29  ;;  %v152_v36 = vld [vmem:[#allocation5 + $0x2d0] sm:$0xff] }
  0x7e   :  { %v156_v37 = vld [vmem:[#allocation5 + $0x2f0] sm:$0xff] }
  0x7f   :  { %347 = vmatmul.mubr.f32.gmra.mrb[2].mxu1 %v2229_v49  ;;  %1785 = vmatpush1.bf16.msra.mxu0 %v1784_v44  ;;  %v165_v44 = vld [vmem:[#allocation5 + $0x338] sm:$0xff]  ;;  %v944_v29 = vld [vmem:[#allocation7 + $0xd0] sm:$0xff] }
  0x80   :  { %352 = vmatprep.mubr.f32.mxu1 %v2231_v51  ;;  %1725 = vmatpush1.bf16.msra.mxu1 %v1724_v50  ;;  %v141_v50 = vld [vmem:[#allocation5 + $0x278] sm:$0xff]  ;;  %v2301_v30 = vld [vmem:[#allocation2 + $0xd0] sm:$0xff] }
  0x81   :  { %1727 = vmatprep.subr.bf16.mxu1 %v1726_v52  ;;  %v923_v52 = vld [vmem:[#allocation7 + $0x28] sm:$0xff]  ;;  %v1754_v63 = vpack.c.bf16 %v141_v50, %v137_v48  ;;  %v934_v48 = vld [vmem:[#allocation7 + $0x80] sm:$0xff]  ;;  %v936_v50 = vld [vmem:[#allocation7 + $0x90] sm:$0xff] }
  0x82   :  { %v1786_v54 = vpack.c.bf16 %v925_v53, %v923_v52  ;;  %v2289_v52 = vld [vmem:[#allocation2 + $0xb0] sm:$0xff]  ;;  %v2291_v53 = vld [vmem:[#allocation2 + $0xc8] sm:$0xff]  ;;  %v1800_v55 = vpack.c.bf16 %v936_v50, %v934_v48  ;;  %v946_v50 = vld [vmem:[#allocation7 + $0xe0] sm:$0xff] }
  0x83   :  { %353 = vmatmul.mubr.f32.gmra.mrb[4].mxu1 %v2235_v57 }
  0x84   :  { %358 = vmatprep.mubr.f32.mxu1 %v2237_v59  ;;  %1729 = vmatpush1.bf16.msra.mxu1 %v1728_v58  ;;  %v2271_v58 = vld [vmem:[#allocation2 + $0x80] sm:$0xff] }
  0x85   :  { %1731 = vmatprep.subr.bf16.mxu1 %v1730_v60  ;;  %v2273_v60 = vld [vmem:[#allocation2 + $0x98] sm:$0xff]  ;;  %1787 = vmatprep.subr.bf16.mxu0 %v1786_v54  ;;  %v1764_v54 = vpack.c.bf16 %v156_v37, %v152_v36  ;;  %v176_v37 = vld [vmem:[#allocation5 + $0x390] sm:$0xff] }
  0x86   :  { %1789 = vmatpush1.bf16.msra.mxu0 %v1788_v62  ;;  %v164_v62 = vld [vmem:[#allocation5 + $0x330] sm:$0xff] }
  0x87   :  { %359 = vmatmul.mubr.f32.gmra.mrb[6].mxu1 %v2241_v1  ;;  %1791 = vmatprep.subr.bf16.mxu0 %v1790_v8  ;;  %v2295_v8 = vld [vmem:[#allocation2 + $0xc0] sm:$0xff] }
  0x88   :  { %364 = vmatprep.mubr.f32.mxu1 %v2243_v3  ;;  %1733 = vmatpush1.bf16.msra.mxu1 %v1732_v2  ;;  %v140_v2 = vld [vmem:[#allocation5 + $0x270] sm:$0xff] }
  0x89   :  { %1735 = vmatprep.subr.bf16.mxu1 %v1734_v4  ;;  %v145_v4 = vld [vmem:[#allocation5 + $0x298] sm:$0xff]  ;;  %v1756_v15 = vpack.c.bf16 %v140_v2, %v136_v0  ;;  %v939_v2 = vld [vmem:[#allocation7 + $0xa8] sm:$0xff] }
  0x8a   :  { %v173_v0 = vld [vmem:[#allocation5 + $0x378] sm:$0xff] }
  0x8b   :  { %365 = vmatmul.mubr.f32.gmra.mrb[8].mxu1 %v2247_v9 }
  0x8c   :  { %370 = vmatprep.mubr.f32.mxu1 %v2249_v11  ;;  %1737 = vmatpush1.bf16.msra.mxu1 %v1736_v10  ;;  %v926_v10 = vld [vmem:[#allocation7 + $0x40] sm:$0xff] }
  0x8d   :  { %1739 = vmatprep.subr.bf16.mxu1 %v1738_v12  ;;  %v928_v12 = vld [vmem:[#allocation7 + $0x50] sm:$0xff] }
  0x8e   :  { %v1792_v16 = vpack.c.bf16 %v928_v12, %v926_v10  ;;  %v2297_v10 = vld [vmem:[#allocation2 + $0xd8] sm:$0xff] }
  0x8f   :  { %371 = vmatmul.mubr.f32.gmra.mrb[10].mxu1 %v2253_v17 }
  0x90   :  { %376 = vmatprep.mubr.f32.mxu1 %v2255_v19  ;;  %1741 = vmatpush1.bf16.msra.mxu1 %v1740_v18  ;;  %v1758_v18 = vpack.c.bf16 %v149_v5, %v145_v4  ;;  %v941_v4 = vld [vmem:[#allocation7 + $0xb8] sm:$0xff] }
  0x91   :  { %1743 = vmatprep.subr.bf16.mxu1 %v1742_v20  ;;  %v144_v20 = vld [vmem:[#allocation5 + $0x290] sm:$0xff]  ;;  %1793 = vmatpush1.bf16.msra.mxu0 %v1792_v16  ;;  %v1802_v5 = vpack.c.bf16 %v941_v4, %v939_v2  ;;  %v951_v4 = vld [vmem:[#allocation7 + $0x108] sm:$0xff] }
  0x92   :  { %v1760_v33 = vpack.c.bf16 %v148_v21, %v144_v20  ;;  %v172_v20 = vld [vmem:[#allocation5 + $0x370] sm:$0xff]  ;;  %v177_v21 = vld [vmem:[#allocation5 + $0x398] sm:$0xff] }
  0x93   :  { %377 = vmatmul.mubr.f32.gmra.mrb[12].mxu1 %v2259_v25  ;;  %v1774_v36 = vpack.c.bf16 %v181_v22, %v177_v21  ;;  %v188_v2 = vld [vmem:[#allocation5 + $0x3f0] sm:$0xff]  ;;  %v955_v21 = vld [vmem:[#allocation7 + $0x128] sm:$0xff]  ;;  %v957_v22 = vld [vmem:[#allocation7 + $0x138] sm:$0xff] }
  0x94   :  { %382 = vmatprep.mubr.f32.mxu1 %v2261_v26  ;;  %1745 = vmatpush1.bf16.msra.mxu1 %v1744_v27  ;;  %v933_v27 = vld [vmem:[#allocation7 + $0x78] sm:$0xff] }
  0x95   :  { %1747 = vmatprep.subr.bf16.mxu1 %v1746_v28  ;;  %v1794_v28 = vpack.c.bf16 %v933_v27, %v931_v24  ;;  %v945_v24 = vld [vmem:[#allocation7 + $0xd8] sm:$0xff] }
  0x96   :  { %v1806_v27 = vpack.c.bf16 %v945_v24, %v943_v23  ;;  %v1818_v23 = vpack.c.bf16 %v957_v22, %v955_v21  ;;  %v954_v24 = vld [vmem:[#allocation7 + $0x120] sm:$0xff]  ;;  %v2339_v21 = vld [vmem:[#allocation2 + $0x148] sm:$0xff] }
  0x97   :  { %383 = vmatmul.mubr.f32.gmra.mrb[14].mxu1 %v2265_v38  ;;  %1795 = vmatprep.subr.bf16.mxu0 %v1794_v28  ;;  %v942_v28 = vld [vmem:[#allocation7 + $0xc0] sm:$0xff]  ;;  %v971_v22 = vld [vmem:[#allocation7 + $0x1a8] sm:$0xff] }
  0x98   :  { %388 = vmatprep.mubr.f32.mxu1 %v2267_v39  ;;  %1749 = vmatpush1.bf16.msra.mxu1 %v1748_v42  ;;  %v161_v42 = vld [vmem:[#allocation5 + $0x318] sm:$0xff] }
  0x99   :  { %1751 = vmatprep.subr.bf16.mxu1 %v1750_v45  ;;  %1797 = vmatpush1.bf16.msra.mxu0 %v1796_v34  ;;  %v935_v45 = vld [vmem:[#allocation7 + $0x88] sm:$0xff]  ;;  %v1766_v56 = vpack.c.bf16 %v165_v44, %v161_v42  ;;  %v180_v42 = vld [vmem:[#allocation5 + $0x3b0] sm:$0xff]  ;;  %v185_v44 = vld [vmem:[#allocation5 + $0x3d8] sm:$0xff] }
  0x9a   :  { %v1798_v47 = vpack.c.bf16 %v937_v46, %v935_v45  ;;  %v189_v45 = vld [vmem:[#allocation5 + $0x3f8] sm:$0xff]  ;;  %v947_v46 = vld [vmem:[#allocation7 + $0xe8] sm:$0xff] }
  0x9b   :  { %389 = vmatmul.mubr.f32.gmra.mrb[16].mxu1 %v2271_v58 }
  0x9c   :  { %394 = vmatprep.mubr.f32.mxu1 %v2273_v60  ;;  %1753 = vmatpush1.bf16.msra.mxu1 %v1752_v61  ;;  %v160_v61 = vld [vmem:[#allocation5 + $0x310] sm:$0xff] }
  0x9d   :  { %1755 = vmatprep.subr.bf16.mxu1 %v1754_v63  ;;  %v169_v63 = vld [vmem:[#allocation5 + $0x358] sm:$0xff]  ;;  %1799 = vmatprep.subr.bf16.mxu0 %v1798_v47  ;;  %v1768_v12 = vpack.c.bf16 %v164_v62, %v160_v61 }
  0x9e   :  { %1801 = vmatpush1.bf16.msra.mxu0 %v1800_v55  ;;  %v1770_v16 = vpack.c.bf16 %v173_v0, %v169_v63  ;;  %v949_v47 = vld [vmem:[#allocation7 + $0xf8] sm:$0xff]  ;;  %v2307_v55 = vld [vmem:[#allocation2 + $0xe0] sm:$0xff]  ;;  %v1778_v63 = vpack.c.bf16 %v189_v45, %v185_v44  ;;  %v184_v0 = vld [vmem:[#allocation5 + $0x3d0] sm:$0xff] }
  0x9f   :  { %395 = vmatmul.mubr.f32.gmra.mrb[18].mxu1 %v2277_v13  ;;  %1803 = vmatprep.subr.bf16.mxu0 %v1802_v5  ;;  %v1810_v48 = vpack.c.bf16 %v949_v47, %v947_v46  ;;  %v2309_v62 = vld [vmem:[#allocation2 + $0xf8] sm:$0xff]  ;;  %v960_v44 = vld [vmem:[#allocation7 + $0x150] sm:$0xff]  ;;  %v2327_v47 = vld [vmem:[#allocation2 + $0x128] sm:$0xff] }
  0xa0   :  { %400 = vmatprep.mubr.f32.mxu1 %v2279_v14  ;;  %1757 = vmatpush1.bf16.msra.mxu1 %v1756_v15  ;;  %v1804_v15 = vpack.c.bf16 %v940_v7, %v938_v6  ;;  %v953_v5 = vld [vmem:[#allocation7 + $0x118] sm:$0xff]  ;;  %v950_v7 = vld [vmem:[#allocation7 + $0x100] sm:$0xff]  ;;  %v2325_v45 = vld [vmem:[#allocation2 + $0x110] sm:$0xff] }
  0xa1   :  { %1759 = vmatprep.subr.bf16.mxu1 %v1758_v18  ;;  %v168_v18 = vld [vmem:[#allocation5 + $0x350] sm:$0xff]  ;;  %v1814_v6 = vpack.c.bf16 %v953_v5, %v951_v4  ;;  %v967_v4 = vld [vmem:[#allocation7 + $0x188] sm:$0xff]  ;;  %v969_v5 = vld [vmem:[#allocation7 + $0x198] sm:$0xff] }
  0xa2   :  { %1805 = vmatpush1.bf16.msra.mxu0 %v1804_v15  ;;  %v1772_v34 = vpack.c.bf16 %v172_v20, %v168_v18  ;;  %v2313_v15 = vld [vmem:[#allocation2 + $0xf0] sm:$0xff]  ;;  %v2315_v20 = vld [vmem:[#allocation2 + $0x108] sm:$0xff] }
  0xa3   :  { %401 = vmatmul.mubr.f32.gmra.mrb[20].mxu1 %v2283_v31  ;;  %1807 = vmatprep.subr.bf16.mxu0 %v1806_v27  ;;  %v956_v27 = vld [vmem:[#allocation7 + $0x130] sm:$0xff] }
  0xa4   :  { %406 = vmatprep.mubr.f32.mxu1 %v2285_v32  ;;  %1761 = vmatpush1.bf16.msra.mxu1 %v1760_v33  ;;  %v2303_v33 = vld [vmem:[#allocation2 + $0xe8] sm:$0xff] }
  0xa5   :  { %1763 = vmatprep.subr.bf16.mxu1 %v1762_v35  ;;  %v1808_v35 = vpack.c.bf16 %v944_v29, %v942_v28  ;;  %v2319_v28 = vld [vmem:[#allocation2 + $0x100] sm:$0xff]  ;;  %v1820_v29 = vpack.c.bf16 %v956_v27, %v954_v24 }
  0xa6   :  { %v970_v27 = vld [vmem:[#allocation7 + $0x1a0] sm:$0xff] }
  0xa7   :  { %407 = vmatmul.mubr.f32.gmra.mrb[22].mxu1 %v2289_v52  ;;  %1809 = vmatpush1.bf16.msra.mxu0 %v1808_v35  ;;  %v959_v35 = vld [vmem:[#allocation7 + $0x148] sm:$0xff] }
  0xa8   :  { %412 = vmatprep.mubr.f32.mxu1 %v2291_v53  ;;  %1765 = vmatpush1.bf16.msra.mxu1 %v1764_v54  ;;  %v948_v54 = vld [vmem:[#allocation7 + $0xf0] sm:$0xff] }
  0xa9   :  { %1767 = vmatprep.subr.bf16.mxu1 %v1766_v56  ;;  %v1776_v56 = vpack.c.bf16 %v180_v42, %v176_v37  ;;  %v1812_v61 = vpack.c.bf16 %v948_v54, %v946_v50  ;;  %1811 = vmatprep.subr.bf16.mxu0 %v1810_v48  ;;  %v958_v42 = vld [vmem:[#allocation7 + $0x140] sm:$0xff]  ;;  %v963_v48 = vld [vmem:[#allocation7 + $0x168] sm:$0xff]  ;;  %v965_v50 = vld [vmem:[#allocation7 + $0x178] sm:$0xff] }
  0xaa   :  { %v1824_v46 = vpack.c.bf16 %v960_v44, %v958_v42  ;;  %v1826_v54 = vpack.c.bf16 %v965_v50, %v963_v48  ;;  %v975_v42 = vld [vmem:[#allocation7 + $0x1c8] sm:$0xff]  ;;  %v977_v44 = vld [vmem:[#allocation7 + $0x1d8] sm:$0xff]  ;;  %v974_v48 = vld [vmem:[#allocation7 + $0x1c0] sm:$0xff] }
  0xab   :  { %413 = vmatmul.mubr.f32.gmra.mrb[24].mxu1 %v2295_v8  ;;  %1813 = vmatpush1.bf16.msra.mxu0 %v1812_v61  ;;  %v964_v61 = vld [vmem:[#allocation7 + $0x170] sm:$0xff] }
  0xac   :  { %418 = vmatprep.mubr.f32.mxu1 %v2297_v10  ;;  %1769 = vmatpush1.bf16.msra.mxu1 %v1768_v12  ;;  %v952_v12 = vld [vmem:[#allocation7 + $0x110] sm:$0xff] }
  0xad   :  { %1771 = vmatprep.subr.bf16.mxu1 %v1770_v16  ;;  %v1780_v16 = vpack.c.bf16 %v188_v2, %v184_v0  ;;  %v1816_v18 = vpack.c.bf16 %v952_v12, %v950_v7  ;;  %1815 = vmatprep.subr.bf16.mxu0 %v1814_v6  ;;  %v2333_v2 = vld [vmem:[#allocation2 + $0x138] sm:$0xff]  ;;  %v1830_v6 = vpack.c.bf16 %v969_v5, %v967_v4  ;;  %v966_v7 = vld [vmem:[#allocation7 + $0x180] sm:$0xff]  ;;  %v968_v12 = vld [vmem:[#allocation7 + $0x190] sm:$0xff] }
  0xae   :  { %v976_v50 = vld [vmem:[#allocation7 + $0x1d0] sm:$0xff]  ;;  %v981_v4 = vld [vmem:[#allocation7 + $0x1f8] sm:$0xff] }
  0xaf   :  { %419 = vmatmul.mubr.f32.gmra.mrb[26].mxu1 %v2301_v30  ;;  %1817 = vmatpush1.bf16.msra.mxu0 %v1816_v18  ;;  %v1832_v18 = vpack.c.bf16 %v968_v12, %v966_v7  ;;  %v980_v7 = vld [vmem:[#allocation7 + $0x1f0] sm:$0xff]  ;;  %v2355_v12 = vld [vmem:[#allocation2 + $0x160] sm:$0xff] }
  0xb0   :  { %424 = vmatprep.mubr.f32.mxu1 %v2303_v33  ;;  %1773 = vmatpush1.bf16.msra.mxu1 %v1772_v34  ;;  %v2321_v34 = vld [vmem:[#allocation2 + $0x118] sm:$0xff] }
  0xb1   :  { %1775 = vmatprep.subr.bf16.mxu1 %v1774_v36  ;;  %1819 = vmatprep.subr.bf16.mxu0 %v1818_v23  ;;  %v961_v36 = vld [vmem:[#allocation7 + $0x158] sm:$0xff] }
  0xb2   :  { %v1822_v37 = vpack.c.bf16 %v961_v36, %v959_v35  ;;  %v973_v23 = vld [vmem:[#allocation7 + $0x1b8] sm:$0xff]  ;;  %v2343_v35 = vld [vmem:[#allocation2 + $0x140] sm:$0xff] }
  0xb3   :  { %425 = vmatmul.mubr.f32.gmra.mrb[28].mxu1 %v2307_v55  ;;  %1821 = vmatpush1.bf16.msra.mxu0 %v1820_v29  ;;  %v1834_v24 = vpack.c.bf16 %v973_v23, %v971_v22  ;;  %v972_v29 = vld [vmem:[#allocation7 + $0x1b0] sm:$0xff]  ;;  %v2357_v22 = vld [vmem:[#allocation2 + $0x178] sm:$0xff] }
  0xb4   :  { %430 = vmatprep.mubr.f32.mxu1 %v2309_v62  ;;  %1777 = vmatpush1.bf16.msra.mxu1 %v1776_v56  ;;  %v962_v56 = vld [vmem:[#allocation7 + $0x160] sm:$0xff]  ;;  %v1836_v36 = vpack.c.bf16 %v972_v29, %v970_v27  ;;  %v2361_v23 = vld [vmem:[#allocation2 + $0x170] sm:$0xff]  ;;  %v983_v27 = vld [vmem:[#allocation7 + $0x208] sm:$0xff] }
  0xb5   :  { %1779 = vmatprep.subr.bf16.mxu1 %v1778_v63  ;;  %1823 = vmatprep.subr.bf16.mxu0 %v1822_v37  ;;  %v2331_v63 = vld [vmem:[#allocation2 + $0x120] sm:$0xff]  ;;  %v1828_v0 = vpack.c.bf16 %v964_v61, %v962_v56  ;;  %v2345_v37 = vld [vmem:[#allocation2 + $0x158] sm:$0xff]  ;;  %v1840_v56 = vpack.c.bf16 %v976_v50, %v974_v48  ;;  %v2351_v61 = vld [vmem:[#allocation2 + $0x168] sm:$0xff] }
  0xb6   :  { %v985_v29 = vld [vmem:[#allocation7 + $0x218] sm:$0xff]  ;;  %v2375_v48 = vld [vmem:[#allocation2 + $0x1a8] sm:$0xff]  ;;  %v2379_v50 = vld [vmem:[#allocation2 + $0x1a0] sm:$0xff] }
  0xb7   :  { %431 = vmatmul.mubr.f32.gmra.mrb[30].mxu1 %v2313_v15  ;;  %1825 = vmatpush1.bf16.msra.mxu0 %v1824_v46  ;;  %v1838_v46 = vpack.c.bf16 %v977_v44, %v975_v42  ;;  %v2367_v42 = vld [vmem:[#allocation2 + $0x180] sm:$0xff]  ;;  %v2369_v44 = vld [vmem:[#allocation2 + $0x198] sm:$0xff] }
  0xb8   :  { %436 = vmatprep.mubr.f32.mxu1 %v2315_v20  ;;  %1781 = vmatpush1.bf16.msra.mxu1 %v1780_v16  ;;  %v2337_v16 = vld [vmem:[#allocation2 + $0x130] sm:$0xff] }
  0xb9   :  { %1827 = vmatprep.subr.bf16.mxu0 %v1826_v54  ;;  %v2349_v54 = vld [vmem:[#allocation2 + $0x150] sm:$0xff] }
  0xbb   :  { %437 = vmatmul.mubr.f32.gmra.mrb[32].mxu1 %v2319_v28  ;;  %1829 = vmatpush1.bf16.msra.mxu0 %v1828_v0  ;;  %v979_v0 = vld [vmem:[#allocation7 + $0x1e8] sm:$0xff] }
  0xbc   :  { %442 = vmatprep.mubr.f32.mxu1 %v2321_v34  ;;  %1831 = vmatprep.subr.bf16.mxu0 %v1830_v6  ;;  %v1842_v5 = vpack.c.bf16 %v981_v4, %v979_v0  ;;  %v978_v6 = vld [vmem:[#allocation7 + $0x1e0] sm:$0xff]  ;;  %v2385_v0 = vld [vmem:[#allocation2 + $0x1b0] sm:$0xff]  ;;  %v2387_v4 = vld [vmem:[#allocation2 + $0x1c8] sm:$0xff] }
  0xbf   :  { %443 = vmatmul.mubr.f32.gmra.mrb[34].mxu1 %v2325_v45  ;;  %1833 = vmatpush1.bf16.msra.mxu0 %v1832_v18  ;;  %v1844_v18 = vpack.c.bf16 %v980_v7, %v978_v6  ;;  %v2393_v6 = vld [vmem:[#allocation2 + $0x1d8] sm:$0xff]  ;;  %v2397_v7 = vld [vmem:[#allocation2 + $0x1d0] sm:$0xff] }
  0xc0   :  { %448 = vmatprep.mubr.f32.mxu1 %v2327_v47  ;;  %1835 = vmatprep.subr.bf16.mxu0 %v1834_v24  ;;  %v2363_v24 = vld [vmem:[#allocation2 + $0x188] sm:$0xff] }
  0xc3   :  { %449 = vmatmul.mubr.f32.gmra.mrb[36].mxu1 %v2331_v63  ;;  %1837 = vmatpush1.bf16.msra.mxu0 %v1836_v36  ;;  %v1846_v36 = vpack.c.bf16 %v985_v29, %v983_v27  ;;  %v2403_v27 = vld [vmem:[#allocation2 + $0x1e0] sm:$0xff]  ;;  %v2405_v29 = vld [vmem:[#allocation2 + $0x1f8] sm:$0xff] }
  0xc4   :  { %454 = vmatprep.mubr.f32.mxu1 %v2333_v2  ;;  %1839 = vmatprep.subr.bf16.mxu0 %v1838_v46  ;;  %v2373_v46 = vld [vmem:[#allocation2 + $0x190] sm:$0xff] }
  0xc7   :  { %455 = vmatmul.mubr.f32.gmra.mrb[38].mxu1 %v2337_v16  ;;  %1841 = vmatpush1.bf16.msra.mxu0 %v1840_v56  ;;  %v2381_v56 = vld [vmem:[#allocation2 + $0x1b8] sm:$0xff] }
  0xc8   :  { %460 = vmatprep.mubr.f32.mxu1 %v2339_v21  ;;  %1843 = vmatprep.subr.bf16.mxu0 %v1842_v5  ;;  %v2391_v5 = vld [vmem:[#allocation2 + $0x1c0] sm:$0xff] }
  0xcb   :  { %461 = vmatmul.mubr.f32.gmra.mrb[40].mxu1 %v2343_v35  ;;  %1845 = vmatpush1.bf16.msra.mxu0 %v1844_v18  ;;  %v2399_v18 = vld [vmem:[#allocation2 + $0x1e8] sm:$0xff] }
  0xcc   :  { %466 = vmatprep.mubr.f32.mxu1 %v2345_v37  ;;  %1847 = vmatprep.subr.bf16.mxu0 %v1846_v36  ;;  %v2409_v36 = vld [vmem:[#allocation2 + $0x1f0] sm:$0xff] }
  0xcf   :  { %467 = vmatmul.mubr.f32.gmra.mrb[42].mxu1 %v2349_v54 }
  0xd0   :  { %472 = vmatprep.mubr.f32.mxu1 %v2351_v61 }
  0xd3   :  { %473 = vmatmul.mubr.f32.gmra.mrb[44].mxu1 %v2355_v12 }
  0xd4   :  { %478 = vmatprep.mubr.f32.mxu1 %v2357_v22 }
  0xd7   :  { %479 = vmatmul.mubr.f32.gmra.mrb[46].mxu1 %v2361_v23 }
  0xd8   :  { %484 = vmatprep.mubr.f32.mxu1 %v2363_v24 }
  0xdb   :  { %485 = vmatmul.mubr.f32.gmra.mrb[48].mxu1 %v2367_v42 }
  0xdc   :  { %490 = vmatprep.mubr.f32.mxu1 %v2369_v44 }
  0xdf   :  { %491 = vmatmul.mubr.f32.gmra.mrb[50].mxu1 %v2373_v46 }
  0xe0   :  { %496 = vmatprep.mubr.f32.mxu1 %v2375_v48 }
  0xe3   :  { %497 = vmatmul.mubr.f32.gmra.mrb[52].mxu1 %v2379_v50 }
  0xe4   :  { %502 = vmatprep.mubr.f32.mxu1 %v2381_v56 }
  0xe7   :  { %503 = vmatmul.mubr.f32.gmra.mrb[54].mxu1 %v2385_v0 }
  0xe8   :  { %508 = vmatprep.mubr.f32.mxu1 %v2387_v4 }
  0xeb   :  { %509 = vmatmul.mubr.f32.gmra.mrb[56].mxu1 %v2391_v5 }
  0xec   :  { %514 = vmatprep.mubr.f32.mxu1 %v2393_v6 }
  0xef   :  { %515 = vmatmul.mubr.f32.gmra.mrb[58].mxu1 %v2397_v7 }
  0xf0   :  { %520 = vmatprep.mubr.f32.mxu1 %v2399_v18 }
  0xf3   :  { %521 = vmatmul.mubr.f32.gmra.mrb[60].mxu1 %v2403_v27 }
  0xf4   :  { %526 = vmatprep.mubr.f32.mxu1 %v2405_v29 }
  0xf7   :  { %527 = vmatmul.mubr.f32.gmra.mrb[62].mxu1 %v2409_v36 }
  0xf8   :  { %597 = vmatprep.mubr.f32.mxu1 %v2220_v41  ;;  %v256_v41 = vlaneseq }
  0xfb   :  { %598 = vmatmul.mubr.f32.vlgmr.msra.gmra.mrb[64].mxu1 %v2223_v40  ;;  %v2450_v40 = vshrl.u32 %v256_v41, 7 }
  0xfc   :  { %603 = vmatprep.mubr.f32.mxu1 %v2225_v43 }
  0xfd   :  { %v258_v43 = vsub.s32 0, %v2450_v40 }
  0xff   :  { %604 = vmatmul.mubr.f32.gmra.mrb[66].mxu1 %v2229_v49  ;;  %v2459_v49 = vld [vmem:[%s2723_s2] sm:$0xf] }
 0x100   :  { %609 = vmatprep.mubr.f32.mxu1 %v2231_v51  ;;  %v262_v51 = vsub.s32 1, %v2450_v40 }
 0x103   :  { %610 = vmatmul.mubr.f32.gmra.mrb[68].mxu1 %v2235_v57  ;;  %v2466_v57 = vrot.slane %v2459_v49, %v258_v43 }
 0x104   :  { %615 = vmatprep.mubr.f32.mxu1 %v2237_v59  ;;  %v2472_v59 = vrot.slane %v2459_v49, %v262_v51 }
 0x107   :  { %616 = vmatmul.mubr.f32.gmra.mrb[70].mxu1 %v2241_v1 }
 0x108   :  { %621 = vmatprep.mubr.f32.mxu1 %v2243_v3 }
 0x10b   :  { %622 = vmatmul.mubr.f32.gmra.mrb[72].mxu1 %v2247_v9 }
 0x10c   :  { %627 = vmatprep.mubr.f32.mxu1 %v2249_v11  ;;  %v982_v11 = vld [vmem:[#allocation7 + $0x200] sm:$0xff] }
 0x10f   :  { %628 = vmatmul.mubr.f32.gmra.mrb[74].mxu1 %v2253_v17  ;;  %v984_v17 = vld [vmem:[#allocation7 + $0x210] sm:$0xff] }
 0x110   :  { %633 = vmatprep.mubr.f32.mxu1 %v2255_v19 }
 0x113   :  { %634 = vmatmul.mubr.f32.gmra.mrb[76].mxu1 %v2259_v25  ;;  %v987_v25 = vld [vmem:[#allocation7 + $0x228] sm:$0xff] }
 0x114   :  { %639 = vmatprep.mubr.f32.mxu1 %v2261_v26  ;;  %v989_v26 = vld [vmem:[#allocation7 + $0x238] sm:$0xff] }
 0x117   :  { %640 = vmatmul.mubr.f32.gmra.mrb[78].mxu1 %v2265_v38 }
 0x118   :  { %645 = vmatprep.mubr.f32.mxu1 %v2267_v39 }
 0x11b   :  { %646 = vmatmul.mubr.f32.gmra.mrb[80].mxu1 %v2271_v58  ;;  %v1848_v58 = vpack.c.bf16 %v984_v17, %v982_v11 }
 0x11c   :  { %651 = vmatprep.mubr.f32.mxu1 %v2273_v60 }
 0x11f   :  { %652 = vmatmul.mubr.f32.gmra.mrb[82].mxu1 %v2277_v13 }
 0x120   :  { %657 = vmatprep.mubr.f32.mxu1 %v2279_v14 }
 0x123   :  { %658 = vmatmul.mubr.f32.gmra.mrb[84].mxu1 %v2283_v31  ;;  %v1850_v31 = vpack.c.bf16 %v989_v26, %v987_v25  ;;  %v998_v26 = vld [vmem:[#allocation7 + $0x280] sm:$0xff] }
 0x124   :  { %663 = vmatprep.mubr.f32.mxu1 %v2285_v32  ;;  %v986_v32 = vld [vmem:[#allocation7 + $0x220] sm:$0xff] }
 0x127   :  { %664 = vmatmul.mubr.f32.gmra.mrb[86].mxu1 %v2289_v52  ;;  %v988_v52 = vld [vmem:[#allocation7 + $0x230] sm:$0xff] }
 0x128   :  { %669 = vmatprep.mubr.f32.mxu1 %v2291_v53 }
 0x12b   :  { %670 = vmatmul.mubr.f32.gmra.mrb[88].mxu1 %v2295_v8  ;;  %v991_v8 = vld [vmem:[#allocation7 + $0x248] sm:$0xff] }
 0x12c   :  { %675 = vmatprep.mubr.f32.mxu1 %v2297_v10  ;;  %v993_v10 = vld [vmem:[#allocation7 + $0x258] sm:$0xff] }
 0x12f   :  { %676 = vmatmul.mubr.f32.gmra.mrb[90].mxu1 %v2301_v30 }
 0x130   :  { %681 = vmatprep.mubr.f32.mxu1 %v2303_v33 }
 0x133   :  { %682 = vmatmul.mubr.f32.gmra.mrb[92].mxu1 %v2307_v55  ;;  %v1852_v55 = vpack.c.bf16 %v988_v52, %v986_v32 }
 0x134   :  { %687 = vmatprep.mubr.f32.mxu1 %v2309_v62 }
 0x137   :  { %688 = vmatmul.mubr.f32.gmra.mrb[94].mxu1 %v2313_v15 }
 0x138   :  { %693 = vmatprep.mubr.f32.mxu1 %v2315_v20 }
 0x13b   :  { %694 = vmatmul.mubr.f32.gmra.mrb[96].mxu1 %v2319_v28  ;;  %v1854_v28 = vpack.c.bf16 %v993_v10, %v991_v8  ;;  %v1004_v8 = vld [vmem:[#allocation7 + $0x2b0] sm:$0xff] }
 0x13c   :  { %699 = vmatprep.mubr.f32.mxu1 %v2321_v34  ;;  %v990_v34 = vld [vmem:[#allocation7 + $0x240] sm:$0xff] }
 0x13f   :  { %700 = vmatmul.mubr.f32.gmra.mrb[98].mxu1 %v2325_v45  ;;  %v992_v45 = vld [vmem:[#allocation7 + $0x250] sm:$0xff] }
 0x140   :  { %705 = vmatprep.mubr.f32.mxu1 %v2327_v47 }
 0x143   :  { %706 = vmatmul.mubr.f32.gmra.mrb[100].mxu1 %v2331_v63  ;;  %v995_v63 = vld [vmem:[#allocation7 + $0x268] sm:$0xff] }
 0x144   :  { %711 = vmatprep.mubr.f32.mxu1 %v2333_v2  ;;  %v997_v2 = vld [vmem:[#allocation7 + $0x278] sm:$0xff] }
 0x147   :  { %712 = vmatmul.mubr.f32.gmra.mrb[102].mxu1 %v2337_v16 }
 0x148   :  { %717 = vmatprep.mubr.f32.mxu1 %v2339_v21 }
 0x14b   :  { %718 = vmatmul.mubr.f32.gmra.mrb[104].mxu1 %v2343_v35  ;;  %v1856_v35 = vpack.c.bf16 %v992_v45, %v990_v34  ;;  %v1006_v34 = vld [vmem:[#allocation7 + $0x2c0] sm:$0xff]  ;;  %v1008_v45 = vld [vmem:[#allocation7 + $0x2d0] sm:$0xff] }
 0x14c   :  { %723 = vmatprep.mubr.f32.mxu1 %v2345_v37 }
 0x14e   :  { %v342_v1 = vpop.f32.mrb[0].mxu1 }
 0x14f   :  { %v343_v3 = vadd.f32 %v342_v1, %v2466_v57  ;;  %v344_v9 = vpop.f32.mrb[1].mxu1  ;;  %724 = vmatmul.mubr.f32.gmra.mrb[106].mxu1 %v2349_v54  ;;  %v1001_v1 = vld [vmem:[#allocation7 + $0x298] sm:$0xff] }
 0x150   :  { %729 = vmatprep.mubr.f32.mxu1 %v2351_v61  ;;  %v345_v19 = vadd.f32 %v344_v9, %v2472_v59 }
 0x151   :  { %v790_v60 = vmax.f32 %v343_v3, 0.0 }
 0x152   :  { %v348_v38 = vpop.f32.mrb[2].mxu1  ;;  %v791_v39 = vmax.f32 %v345_v19, 0.0 }
 0x153   :  { %v349_v13 = vadd.f32 %v348_v38, %v2466_v57  ;;  %v350_v14 = vpop.f32.mrb[3].mxu1  ;;  %730 = vmatmul.mubr.f32.gmra.mrb[108].mxu1 %v2355_v12  ;;  %v1858_v12 = vpack.c.bf16 %v997_v2, %v995_v63  ;;  %v1000_v38 = vld [vmem:[#allocation7 + $0x290] sm:$0xff]  ;;  %v1013_v63 = vld [vmem:[#allocation7 + $0x2f8] sm:$0xff] }
 0x154   :  { %v351_v53 = vadd.f32 %v350_v14, %v2472_v59  ;;  %1122 = vmatprep.mubr.f32.mxu0 %v791_v39  ;;  %735 = vmatprep.mubr.f32.mxu1 %v2357_v22  ;;  %v994_v22 = vld [vmem:[#allocation7 + $0x260] sm:$0xff]  ;;  %v1864_v14 = vpack.c.bf16 %v1000_v38, %v998_v26 }
 0x155   :  { %1123 = vmatmul.mubr.f32.vlgmr.msra.gmra.mrb[0].mxu0 %v790_v60  ;;  %v794_v62 = vmax.f32 %v349_v13, 0.0 }
 0x156   :  { %v795_v30 = vmax.f32 %v351_v53, 0.0  ;;  %v354_v33 = vpop.f32.mrb[4].mxu1  ;;  %1849 = vmatpush1.bf16.msra.mxu0 %v1848_v58  ;;  %v1005_v58 = vld [vmem:[#allocation7 + $0x2b8] sm:$0xff]  ;;  %v1002_v53 = vld [vmem:[#allocation7 + $0x2a0] sm:$0xff] }
 0x157   :  { %v355_v15 = vadd.f32 %v354_v33, %v2466_v57  ;;  %v356_v20 = vpop.f32.mrb[5].mxu1  ;;  %736 = vmatmul.mubr.f32.gmra.mrb[110].mxu1 %v2361_v23  ;;  %1851 = vmatprep.subr.bf16.mxu0 %v1850_v31  ;;  %v996_v23 = vld [vmem:[#allocation7 + $0x270] sm:$0xff] }
 0x158   :  { %v357_v47 = vadd.f32 %v356_v20, %v2472_v59  ;;  %1128 = vmatprep.mubr.f32.mxu0 %v795_v30  ;;  %741 = vmatprep.mubr.f32.mxu1 %v2363_v24  ;;  %v999_v24 = vld [vmem:[#allocation7 + $0x288] sm:$0xff]  ;;  %v1860_v11 = vpack.c.bf16 %v996_v23, %v994_v22  ;;  %v1009_v30 = vld [vmem:[#allocation7 + $0x2d8] sm:$0xff] }
 0x159   :  { %1129 = vmatmul.mubr.f32.gmra.mrb[2].mxu0 %v794_v62  ;;  %v798_v37 = vmax.f32 %v355_v15, 0.0  ;;  %v1862_v25 = vpack.c.bf16 %v1001_v1, %v999_v24  ;;  %v1868_v62 = vpack.c.bf16 %v1004_v8, %v1002_v53  ;;  %v1017_v23 = vld [vmem:[#allocation7 + $0x318] sm:$0xff] }
 0x15a   :  { %v799_v16 = vmax.f32 %v357_v47, 0.0  ;;  %v360_v21 = vpop.f32.mrb[6].mxu1  ;;  %1853 = vmatpush1.bf16.msra.mxu0 %v1852_v55 }
 0x15b   :  { %v361_v54 = vadd.f32 %v360_v21, %v2466_v57  ;;  %v362_v61 = vpop.f32.mrb[7].mxu1  ;;  %742 = vmatmul.mubr.f32.gmra.mrb[112].mxu1 %v2367_v42  ;;  %1855 = vmatprep.subr.bf16.mxu0 %v1854_v28  ;;  %v1872_v21 = vpack.c.bf16 %v1008_v45, %v1006_v34 }
 0x15c   :  { %v363_v41 = vadd.f32 %v362_v61, %v2472_v59  ;;  %1134 = vmatprep.mubr.f32.mxu0 %v799_v16  ;;  %747 = vmatprep.mubr.f32.mxu1 %v2369_v44  ;;  %v1003_v44 = vld [vmem:[#allocation7 + $0x2a8] sm:$0xff]  ;;  %v1010_v61 = vld [vmem:[#allocation7 + $0x2e0] sm:$0xff] }
 0x15d   :  { %1135 = vmatmul.mubr.f32.gmra.mrb[4].mxu0 %v798_v37  ;;  %v802_v17 = vmax.f32 %v361_v54, 0.0  ;;  %v1866_v52 = vpack.c.bf16 %v1005_v58, %v1003_v44 }
 0x15e   :  { %v803_v3 = vmax.f32 %v363_v41, 0.0  ;;  %v366_v9 = vpop.f32.mrb[8].mxu1  ;;  %1857 = vmatpush1.bf16.msra.mxu0 %v1856_v35 }
 0x15f   :  { %v367_v19 = vadd.f32 %v366_v9, %v2466_v57  ;;  %v368_v42 = vpop.f32.mrb[9].mxu1  ;;  %748 = vmatmul.mubr.f32.gmra.mrb[114].mxu1 %v2373_v46  ;;  %1859 = vmatprep.subr.bf16.mxu0 %v1858_v12  ;;  %v1012_v12 = vld [vmem:[#allocation7 + $0x2f0] sm:$0xff] }
 0x160   :  { %v369_v39 = vadd.f32 %v368_v42, %v2472_v59  ;;  %1140 = vmatprep.mubr.f32.mxu0 %v803_v3  ;;  %753 = vmatprep.mubr.f32.mxu1 %v2375_v48  ;;  %v1007_v48 = vld [vmem:[#allocation7 + $0x2c8] sm:$0xff]  ;;  %v1876_v1 = vpack.c.bf16 %v1012_v12, %v1010_v61 }
 0x161   :  { %1141 = vmatmul.mubr.f32.gmra.mrb[6].mxu0 %v802_v17  ;;  %v806_v31 = vmax.f32 %v367_v19, 0.0  ;;  %v1870_v28 = vpack.c.bf16 %v1009_v30, %v1007_v48  ;;  %v1014_v17 = vld [vmem:[#allocation7 + $0x300] sm:$0xff]  ;;  %v1016_v19 = vld [vmem:[#allocation7 + $0x310] sm:$0xff] }
 0x162   :  { %v807_v60 = vmax.f32 %v369_v39, 0.0  ;;  %v372_v13 = vpop.f32.mrb[10].mxu1  ;;  %1861 = vmatpush1.bf16.msra.mxu0 %v1860_v11  ;;  %v1880_v39 = vpack.c.bf16 %v1016_v19, %v1014_v17  ;;  %v1022_v30 = vld [vmem:[#allocation7 + $0x340] sm:$0xff] }
 0x163   :  { %v373_v32 = vadd.f32 %v372_v13, %v2466_v57  ;;  %v374_v46 = vpop.f32.mrb[11].mxu1  ;;  %754 = vmatmul.mubr.f32.gmra.mrb[116].mxu1 %v2379_v50  ;;  %1863 = vmatprep.subr.bf16.mxu0 %v1862_v25  ;;  %v1021_v25 = vld [vmem:[#allocation7 + $0x338] sm:$0xff]  ;;  %v1018_v13 = vld [vmem:[#allocation7 + $0x320] sm:$0xff] }
 0x164   :  { %v375_v10 = vadd.f32 %v374_v46, %v2472_v59  ;;  %1146 = vmatprep.mubr.f32.mxu0 %v807_v60  ;;  %759 = vmatprep.mubr.f32.mxu1 %v2381_v56  ;;  %v1011_v56 = vld [vmem:[#allocation7 + $0x2e8] sm:$0xff] }
 0x165   :  { %1147 = vmatmul.mubr.f32.gmra.mrb[8].mxu0 %v806_v31  ;;  %v810_v15 = vmax.f32 %v373_v32, 0.0  ;;  %v1874_v54 = vpack.c.bf16 %v1013_v63, %v1011_v56  ;;  %v1025_v32 = vld [vmem:[#allocation7 + $0x358] sm:$0xff]  ;;  %v1028_v56 = vld [vmem:[#allocation7 + $0x370] sm:$0xff] }
 0x166   :  { %v811_v33 = vmax.f32 %v375_v10, 0.0  ;;  %v378_v55 = vpop.f32.mrb[12].mxu1  ;;  %1865 = vmatpush1.bf16.msra.mxu0 %v1864_v14  ;;  %v1020_v14 = vld [vmem:[#allocation7 + $0x330] sm:$0xff] }
 0x167   :  { %v379_v20 = vadd.f32 %v378_v55, %v2466_v57  ;;  %v380_v50 = vpop.f32.mrb[13].mxu1  ;;  %760 = vmatmul.mubr.f32.gmra.mrb[118].mxu1 %v2385_v0  ;;  %1867 = vmatprep.subr.bf16.mxu0 %v1866_v52  ;;  %v1884_v53 = vpack.c.bf16 %v1020_v14, %v1018_v13 }
 0x168   :  { %v381_v47 = vadd.f32 %v380_v50, %v2472_v59  ;;  %1152 = vmatprep.mubr.f32.mxu0 %v811_v33  ;;  %765 = vmatprep.mubr.f32.mxu1 %v2387_v4  ;;  %v1015_v4 = vld [vmem:[#allocation7 + $0x308] sm:$0xff]  ;;  %v1024_v33 = vld [vmem:[#allocation7 + $0x350] sm:$0xff] }
 0x169   :  { %1153 = vmatmul.mubr.f32.gmra.mrb[10].mxu0 %v810_v15  ;;  %v814_v35 = vmax.f32 %v379_v20, 0.0  ;;  %v1878_v11 = vpack.c.bf16 %v1017_v23, %v1015_v4  ;;  %v1888_v50 = vpack.c.bf16 %v1024_v33, %v1022_v30  ;;  %v1032_v4 = vld [vmem:[#allocation7 + $0x390] sm:$0xff] }
 0x16a   :  { %v815_v2 = vmax.f32 %v381_v47, 0.0  ;;  %v384_v16 = vpop.f32.mrb[14].mxu1  ;;  %1869 = vmatpush1.bf16.msra.mxu0 %v1868_v62  ;;  %v1029_v62 = vld [vmem:[#allocation7 + $0x378] sm:$0xff]  ;;  %v1026_v47 = vld [vmem:[#allocation7 + $0x360] sm:$0xff] }
 0x16b   :  { %v385_v37 = vadd.f32 %v384_v16, %v2466_v57  ;;  %v386_v0 = vpop.f32.mrb[15].mxu1  ;;  %766 = vmatmul.mubr.f32.gmra.mrb[120].mxu1 %v2391_v5  ;;  %1871 = vmatprep.subr.bf16.mxu0 %v1870_v28  ;;  %v1033_v16 = vld [vmem:[#allocation7 + $0x398] sm:$0xff] }
 0x16c   :  { %v387_v22 = vadd.f32 %v386_v0, %v2472_v59  ;;  %1158 = vmatprep.mubr.f32.mxu0 %v815_v2  ;;  %771 = vmatprep.mubr.f32.mxu1 %v2393_v6  ;;  %v1019_v6 = vld [vmem:[#allocation7 + $0x328] sm:$0xff] }
 0x16d   :  { %1159 = vmatmul.mubr.f32.gmra.mrb[12].mxu0 %v814_v35  ;;  %v818_v3 = vmax.f32 %v385_v37, 0.0  ;;  %v1882_v60 = vpack.c.bf16 %v1021_v25, %v1019_v6  ;;  %v1031_v2 = vld [vmem:[#allocation7 + $0x388] sm:$0xff]  ;;  %v1892_v37 = vpack.c.bf16 %v1028_v56, %v1026_v47  ;;  %v1036_v6 = vld [vmem:[#allocation7 + $0x3b0] sm:$0xff] }
 0x16e   :  { %v819_v41 = vmax.f32 %v387_v22, 0.0  ;;  %v390_v24 = vpop.f32.mrb[16].mxu1  ;;  %1873 = vmatpush1.bf16.msra.mxu0 %v1872_v21  ;;  %v1894_v12 = vpack.c.bf16 %v1033_v16, %v1031_v2  ;;  %v1030_v22 = vld [vmem:[#allocation7 + $0x380] sm:$0xff] }
 0x16f   :  { %v391_v9 = vadd.f32 %v390_v24, %v2466_v57  ;;  %v392_v5 = vpop.f32.mrb[17].mxu1  ;;  %772 = vmatmul.mubr.f32.gmra.mrb[122].mxu1 %v2397_v7  ;;  %1875 = vmatprep.subr.bf16.mxu0 %v1874_v54  ;;  %v1037_v24 = vld [vmem:[#allocation7 + $0x3b8] sm:$0xff] }
 0x170   :  { %v393_v42 = vadd.f32 %v392_v5, %v2472_v59  ;;  %1164 = vmatprep.mubr.f32.mxu0 %v819_v41  ;;  %777 = vmatprep.mubr.f32.mxu1 %v2399_v18  ;;  %v1023_v18 = vld [vmem:[#allocation7 + $0x348] sm:$0xff] }
 0x171   :  { %1165 = vmatmul.mubr.f32.gmra.mrb[14].mxu0 %v818_v3  ;;  %v822_v44 = vmax.f32 %v391_v9, 0.0  ;;  %v1886_v48 = vpack.c.bf16 %v1025_v32, %v1023_v18  ;;  %v1035_v41 = vld [vmem:[#allocation7 + $0x3a8] sm:$0xff]  ;;  %v1896_v9 = vpack.c.bf16 %v1032_v4, %v1030_v22  ;;  %v1040_v18 = vld [vmem:[#allocation7 + $0x3d0] sm:$0xff] }
 0x172   :  { %v823_v26 = vmax.f32 %v393_v42, 0.0  ;;  %v396_v38 = vpop.f32.mrb[18].mxu1  ;;  %1877 = vmatpush1.bf16.msra.mxu0 %v1876_v1  ;;  %v1898_v19 = vpack.c.bf16 %v1037_v24, %v1035_v41  ;;  %v1034_v42 = vld [vmem:[#allocation7 + $0x3a0] sm:$0xff] }
 0x173   :  { %v397_v58 = vadd.f32 %v396_v38, %v2466_v57  ;;  %v398_v7 = vpop.f32.mrb[19].mxu1  ;;  %778 = vmatmul.mubr.f32.gmra.mrb[124].mxu1 %v2403_v27  ;;  %1879 = vmatprep.subr.bf16.mxu0 %v1878_v11  ;;  %v1041_v38 = vld [vmem:[#allocation7 + $0x3d8] sm:$0xff] }
 0x174   :  { %v399_v31 = vadd.f32 %v398_v7, %v2472_v59  ;;  %1170 = vmatprep.mubr.f32.mxu0 %v823_v26  ;;  %783 = vmatprep.mubr.f32.mxu1 %v2405_v29  ;;  %v1027_v29 = vld [vmem:[#allocation7 + $0x368] sm:$0xff] }
 0x175   :  { %1171 = vmatmul.mubr.f32.gmra.mrb[16].mxu0 %v822_v44  ;;  %v826_v8 = vmax.f32 %v397_v58, 0.0  ;;  %v1039_v26 = vld [vmem:[#allocation7 + $0x3c8] sm:$0xff]  ;;  %v1900_v58 = vpack.c.bf16 %v1036_v6, %v1034_v42 }
 0x176   :  { %v827_v46 = vmax.f32 %v399_v31, 0.0  ;;  %v402_v52 = vpop.f32.mrb[20].mxu1  ;;  %1881 = vmatpush1.bf16.msra.mxu0 %v1880_v39  ;;  %v1902_v14 = vpack.c.bf16 %v1041_v38, %v1039_v26  ;;  %v1038_v31 = vld [vmem:[#allocation7 + $0x3c0] sm:$0xff] }
 0x177   :  { %v403_v10 = vadd.f32 %v402_v52, %v2466_v57  ;;  %v404_v27 = vpop.f32.mrb[21].mxu1  ;;  %784 = vmatmul.mubr.f32.gmra.mrb[126].mxu1 %v2409_v36  ;;  %1883 = vmatprep.subr.bf16.mxu0 %v1882_v60  ;;  %v1890_v36 = vpack.c.bf16 %v1029_v62, %v1027_v29  ;;  %v1045_v52 = vld [vmem:[#allocation7 + $0x3f8] sm:$0xff]  ;;  %v1044_v29 = vld [vmem:[#allocation7 + $0x3f0] sm:$0xff] }
 0x178   :  { %v405_v55 = vadd.f32 %v404_v27, %v2472_v59  ;;  %1176 = vmatprep.mubr.f32.mxu0 %v827_v46  ;;  %v1043_v46 = vld [vmem:[#allocation7 + $0x3e8] sm:$0xff] }
 0x179   :  { %1177 = vmatmul.mubr.f32.gmra.mrb[18].mxu0 %v826_v8  ;;  %v830_v28 = vmax.f32 %v403_v10, 0.0  ;;  %v1904_v10 = vpack.c.bf16 %v1040_v18, %v1038_v31  ;;  %v1906_v33 = vpack.c.bf16 %v1045_v52, %v1043_v46 }
 0x17a   :  { %v831_v15 = vmax.f32 %v405_v55, 0.0  ;;  %v408_v20 = vpop.f32.mrb[22].mxu1  ;;  %1885 = vmatpush1.bf16.msra.mxu0 %v1884_v53  ;;  %v1042_v55 = vld [vmem:[#allocation7 + $0x3e0] sm:$0xff] }
 0x17b   :  { %v409_v34 = vadd.f32 %v408_v20, %v2466_v57  ;;  %v410_v45 = vpop.f32.mrb[23].mxu1  ;;  %1887 = vmatprep.subr.bf16.mxu0 %v1886_v48 }
 0x17c   :  { %v411_v63 = vadd.f32 %v410_v45, %v2472_v59  ;;  %1182 = vmatprep.mubr.f32.mxu0 %v831_v15 }
 0x17d   :  { %1183 = vmatmul.mubr.f32.gmra.mrb[20].mxu0 %v830_v28  ;;  %v834_v0 = vmax.f32 %v409_v34, 0.0 }
 0x17e   :  { %v835_v21 = vmax.f32 %v411_v63, 0.0  ;;  %v414_v35 = vpop.f32.mrb[24].mxu1  ;;  %1889 = vmatpush1.bf16.msra.mxu0 %v1888_v50  ;;  %v1908_v50 = vpack.c.bf16 %v1044_v29, %v1042_v55 }
 0x17f   :  { %v415_v54 = vadd.f32 %v414_v35, %v2466_v57  ;;  %v416_v61 = vpop.f32.mrb[25].mxu1  ;;  %1891 = vmatprep.subr.bf16.mxu0 %v1890_v36 }
 0x180   :  { %v417_v23 = vadd.f32 %v416_v61, %v2472_v59  ;;  %1188 = vmatprep.mubr.f32.mxu0 %v835_v21 }
 0x181   :  { %1189 = vmatmul.mubr.f32.gmra.mrb[22].mxu0 %v834_v0  ;;  %v838_v5 = vmax.f32 %v415_v54, 0.0 }
 0x182   :  { %v839_v1 = vmax.f32 %v417_v23, 0.0  ;;  %v420_v3 = vpop.f32.mrb[26].mxu1  ;;  %1893 = vmatpush1.bf16.msra.mxu0 %v1892_v37 }
 0x183   :  { %v421_v11 = vadd.f32 %v420_v3, %v2466_v57  ;;  %v422_v17 = vpop.f32.mrb[27].mxu1  ;;  %1895 = vmatprep.subr.bf16.mxu0 %v1894_v12 }
 0x184   :  { %v423_v25 = vadd.f32 %v422_v17, %v2472_v59  ;;  %1194 = vmatprep.mubr.f32.mxu0 %v839_v1 }
 0x185   :  { %1195 = vmatmul.mubr.f32.gmra.mrb[24].mxu0 %v838_v5  ;;  %v842_v7 = vmax.f32 %v421_v11, 0.0 }
 0x186   :  { %v843_v39 = vmax.f32 %v423_v25, 0.0  ;;  %v426_v44 = vpop.f32.mrb[28].mxu1  ;;  %1897 = vmatpush1.bf16.msra.mxu0 %v1896_v9 }
 0x187   :  { %v427_v60 = vadd.f32 %v426_v44, %v2466_v57  ;;  %v428_v13 = vpop.f32.mrb[29].mxu1  ;;  %1899 = vmatprep.subr.bf16.mxu0 %v1898_v19 }
 0x188   :  { %v429_v32 = vadd.f32 %v428_v13, %v2472_v59  ;;  %1200 = vmatprep.mubr.f32.mxu0 %v843_v39 }
 0x189   :  { %1201 = vmatmul.mubr.f32.gmra.mrb[26].mxu0 %v842_v7  ;;  %v846_v27 = vmax.f32 %v427_v60, 0.0 }
 0x18a   :  { %v847_v53 = vmax.f32 %v429_v32, 0.0  ;;  %v432_v8 = vpop.f32.mrb[30].mxu1  ;;  %1901 = vmatpush1.bf16.msra.mxu0 %v1900_v58 }
 0x18b   :  { %v433_v48 = vadd.f32 %v432_v8, %v2466_v57  ;;  %v434_v30 = vpop.f32.mrb[31].mxu1  ;;  %1903 = vmatprep.subr.bf16.mxu0 %v1902_v14 }
 0x18c   :  { %v435_v62 = vadd.f32 %v434_v30, %v2472_v59  ;;  %1206 = vmatprep.mubr.f32.mxu0 %v847_v53 }
 0x18d   :  { %1207 = vmatmul.mubr.f32.gmra.mrb[28].mxu0 %v846_v27  ;;  %v850_v28 = vmax.f32 %v433_v48, 0.0 }
 0x18e   :  { %v851_v15 = vmax.f32 %v435_v62, 0.0  ;;  %v438_v20 = vpop.f32.mrb[32].mxu1  ;;  %1905 = vmatpush1.bf16.msra.mxu0 %v1904_v10 }
 0x18f   :  { %v439_v34 = vadd.f32 %v438_v20, %v2466_v57  ;;  %v440_v45 = vpop.f32.mrb[33].mxu1  ;;  %1907 = vmatprep.subr.bf16.mxu0 %v1906_v33 }
 0x190   :  { %v441_v36 = vadd.f32 %v440_v45, %v2472_v59  ;;  %1212 = vmatprep.mubr.f32.mxu0 %v851_v15 }
 0x191   :  { %1213 = vmatmul.mubr.f32.gmra.mrb[30].mxu0 %v850_v28  ;;  %v854_v63 = vmax.f32 %v439_v34, 0.0 }
 0x192   :  { %v855_v47 = vmax.f32 %v441_v36, 0.0  ;;  %v444_v56 = vpop.f32.mrb[34].mxu1  ;;  %1909 = vmatpush1.bf16.msra.mxu0 %v1908_v50 }
 0x193   :  { %v445_v2 = vadd.f32 %v444_v56, %v2466_v57  ;;  %v446_v16 = vpop.f32.mrb[35].mxu1 }
 0x194   :  { %v447_v21 = vadd.f32 %v446_v16, %v2472_v59  ;;  %1218 = vmatprep.mubr.f32.mxu0 %v855_v47 }
 0x195   :  { %1219 = vmatmul.mubr.f32.gmra.mrb[32].mxu0 %v854_v63  ;;  %v858_v0 = vmax.f32 %v445_v2, 0.0 }
 0x196   :  { %v859_v35 = vmax.f32 %v447_v21, 0.0  ;;  %v450_v37 = vpop.f32.mrb[36].mxu1 }
 0x197   :  { %v451_v54 = vadd.f32 %v450_v37, %v2466_v57  ;;  %v452_v61 = vpop.f32.mrb[37].mxu1 }
 0x198   :  { %v453_v12 = vadd.f32 %v452_v61, %v2472_v59  ;;  %1224 = vmatprep.mubr.f32.mxu0 %v859_v35 }
 0x199   :  { %1225 = vmatmul.mubr.f32.gmra.mrb[34].mxu0 %v858_v0  ;;  %v862_v23 = vmax.f32 %v451_v54, 0.0 }
 0x19a   :  { %v863_v22 = vmax.f32 %v453_v12, 0.0  ;;  %v456_v4 = vpop.f32.mrb[38].mxu1 }
 0x19b   :  { %v457_v41 = vadd.f32 %v456_v4, %v2466_v57  ;;  %v458_v24 = vpop.f32.mrb[39].mxu1 }
 0x19c   :  { %v459_v1 = vadd.f32 %v458_v24, %v2472_v59  ;;  %1230 = vmatprep.mubr.f32.mxu0 %v863_v22 }
 0x19d   :  { %1231 = vmatmul.mubr.f32.gmra.mrb[36].mxu0 %v862_v23  ;;  %v866_v5 = vmax.f32 %v457_v41, 0.0 }
 0x19e   :  { %v867_v3 = vmax.f32 %v459_v1, 0.0  ;;  %v462_v9 = vpop.f32.mrb[40].mxu1 }
 0x19f   :  { %v463_v11 = vadd.f32 %v462_v9, %v2466_v57  ;;  %v464_v17 = vpop.f32.mrb[41].mxu1 }
 0x1a0   :  { %v465_v19 = vadd.f32 %v464_v17, %v2472_v59  ;;  %1236 = vmatprep.mubr.f32.mxu0 %v867_v3 }
 0x1a1   :  { %1237 = vmatmul.mubr.f32.gmra.mrb[38].mxu0 %v866_v5  ;;  %v870_v25 = vmax.f32 %v463_v11, 0.0 }
 0x1a2   :  { %v871_v42 = vmax.f32 %v465_v19, 0.0  ;;  %v468_v6 = vpop.f32.mrb[42].mxu1 }
 0x1a3   :  { %v469_v26 = vadd.f32 %v468_v6, %v2466_v57  ;;  %v470_v38 = vpop.f32.mrb[43].mxu1  ;;  %v266_v6 = vsub.s32 2, %v2450_v40 }
 0x1a4   :  { %v471_v39 = vadd.f32 %v470_v38, %v2472_v59  ;;  %1242 = vmatprep.mubr.f32.mxu0 %v871_v42 }
 0x1a5   :  { %1243 = vmatmul.mubr.f32.gmra.mrb[40].mxu0 %v870_v25  ;;  %v874_v7 = vmax.f32 %v469_v26, 0.0  ;;  %v270_v26 = vsub.s32 3, %v2450_v40 }
 0x1a6   :  { %v875_v44 = vmax.f32 %v471_v39, 0.0  ;;  %v474_v58 = vpop.f32.mrb[44].mxu1 }
 0x1a7   :  { %v475_v60 = vadd.f32 %v474_v58, %v2466_v57  ;;  %v476_v13 = vpop.f32.mrb[45].mxu1 }
 0x1a8   :  { %v477_v14 = vadd.f32 %v476_v13, %v2472_v59  ;;  %1248 = vmatprep.mubr.f32.mxu0 %v875_v44 }
 0x1a9   :  { %1249 = vmatmul.mubr.f32.gmra.mrb[42].mxu0 %v874_v7  ;;  %v878_v32 = vmax.f32 %v475_v60, 0.0  ;;  %v2561_v60 = vrot.slane %v2459_v49, %v266_v6 }
 0x1aa   :  { %v879_v31 = vmax.f32 %v477_v14, 0.0  ;;  %v480_v18 = vpop.f32.mrb[46].mxu1  ;;  %v2565_v14 = vrot.slane %v2459_v49, %v270_v26 }
 0x1ab   :  { %v481_v46 = vadd.f32 %v480_v18, %v2466_v57  ;;  %v482_v52 = vpop.f32.mrb[47].mxu1 }
 0x1ac   :  { %v483_v53 = vadd.f32 %v482_v52, %v2472_v59  ;;  %1254 = vmatprep.mubr.f32.mxu0 %v879_v31 }
 0x1ad   :  { %1255 = vmatmul.mubr.f32.gmra.mrb[44].mxu0 %v878_v32  ;;  %v882_v27 = vmax.f32 %v481_v46, 0.0 }
 0x1ae   :  { %v883_v8 = vmax.f32 %v483_v53, 0.0  ;;  %v486_v10 = vpop.f32.mrb[48].mxu1 }
 0x1af   :  { %v487_v48 = vadd.f32 %v486_v10, %v2466_v57  ;;  %v488_v30 = vpop.f32.mrb[49].mxu1 }
 0x1b0   :  { %v489_v33 = vadd.f32 %v488_v30, %v2472_v59  ;;  %1260 = vmatprep.mubr.f32.mxu0 %v883_v8 }
 0x1b1   :  { %1261 = vmatmul.mubr.f32.gmra.mrb[46].mxu0 %v882_v27  ;;  %v886_v62 = vmax.f32 %v487_v48, 0.0 }
 0x1b2   :  { %v887_v55 = vmax.f32 %v489_v33, 0.0  ;;  %v492_v29 = vpop.f32.mrb[50].mxu1 }
 0x1b3   :  { %v493_v15 = vadd.f32 %v492_v29, %v2466_v57  ;;  %v494_v20 = vpop.f32.mrb[51].mxu1 }
 0x1b4   :  { %v495_v50 = vadd.f32 %v494_v20, %v2472_v59  ;;  %1266 = vmatprep.mubr.f32.mxu0 %v887_v55 }
 0x1b5   :  { %1267 = vmatmul.mubr.f32.gmra.mrb[48].mxu0 %v886_v62  ;;  %v890_v45 = vmax.f32 %v493_v15, 0.0 }
 0x1b6   :  { %v891_v28 = vmax.f32 %v495_v50, 0.0  ;;  %v498_v34 = vpop.f32.mrb[52].mxu1 }
 0x1b7   :  { %v499_v36 = vadd.f32 %v498_v34, %v2466_v57  ;;  %v500_v47 = vpop.f32.mrb[53].mxu1 }
 0x1b8   :  { %v501_v56 = vadd.f32 %v500_v47, %v2472_v59  ;;  %1272 = vmatprep.mubr.f32.mxu0 %v891_v28 }
 0x1b9   :  { %1273 = vmatmul.mubr.f32.gmra.mrb[50].mxu0 %v890_v45  ;;  %v894_v16 = vmax.f32 %v499_v36, 0.0 }
 0x1ba   :  { %v895_v63 = vmax.f32 %v501_v56, 0.0  ;;  %v504_v2 = vpop.f32.mrb[54].mxu1 }
 0x1bb   :  { %v505_v21 = vadd.f32 %v504_v2, %v2466_v57  ;;  %v506_v35 = vpop.f32.mrb[55].mxu1 }
 0x1bc   :  { %v507_v37 = vadd.f32 %v506_v35, %v2472_v59  ;;  %1278 = vmatprep.mubr.f32.mxu0 %v895_v63 }
 0x1bd   :  { %1279 = vmatmul.mubr.f32.gmra.mrb[52].mxu0 %v894_v16  ;;  %v898_v61 = vmax.f32 %v505_v21, 0.0 }
 0x1be   :  { %v899_v0 = vmax.f32 %v507_v37, 0.0  ;;  %v510_v54 = vpop.f32.mrb[56].mxu1 }
 0x1bf   :  { %v511_v12 = vadd.f32 %v510_v54, %v2466_v57  ;;  %v512_v22 = vpop.f32.mrb[57].mxu1 }
 0x1c0   :  { %v513_v4 = vadd.f32 %v512_v22, %v2472_v59  ;;  %1284 = vmatprep.mubr.f32.mxu0 %v899_v0 }
 0x1c1   :  { %1285 = vmatmul.mubr.f32.gmra.mrb[54].mxu0 %v898_v61  ;;  %v902_v24 = vmax.f32 %v511_v12, 0.0 }
 0x1c2   :  { %v903_v23 = vmax.f32 %v513_v4, 0.0  ;;  %v516_v41 = vpop.f32.mrb[58].mxu1 }
 0x1c3   :  { %v517_v1 = vadd.f32 %v516_v41, %v2466_v57  ;;  %v518_v3 = vpop.f32.mrb[59].mxu1 }
 0x1c4   :  { %v519_v9 = vadd.f32 %v518_v3, %v2472_v59  ;;  %1290 = vmatprep.mubr.f32.mxu0 %v903_v23 }
 0x1c5   :  { %1291 = vmatmul.mubr.f32.gmra.mrb[56].mxu0 %v902_v24  ;;  %v906_v17 = vmax.f32 %v517_v1, 0.0 }
 0x1c6   :  { %v907_v5 = vmax.f32 %v519_v9, 0.0  ;;  %v522_v11 = vpop.f32.mrb[60].mxu1 }
 0x1c7   :  { %v523_v19 = vadd.f32 %v522_v11, %v2466_v57  ;;  %v524_v42 = vpop.f32.mrb[61].mxu1 }
 0x1c8   :  { %v525_v25 = vadd.f32 %v524_v42, %v2472_v59  ;;  %1296 = vmatprep.mubr.f32.mxu0 %v907_v5 }
 0x1c9   :  { %1297 = vmatmul.mubr.f32.gmra.mrb[58].mxu0 %v906_v17  ;;  %v910_v44 = vmax.f32 %v523_v19, 0.0 }
 0x1ca   :  { %v911_v38 = vmax.f32 %v525_v25, 0.0  ;;  %v528_v39 = vpop.f32.mrb[62].mxu1 }
 0x1cb   :  { %v529_v58 = vadd.f32 %v528_v39, %v2466_v57  ;;  %v530_v7 = vpop.f32.mrb[63].mxu1 }
 0x1cc   :  { %v531_v13 = vadd.f32 %v530_v7, %v2472_v59  ;;  %1302 = vmatprep.mubr.f32.mxu0 %v911_v38 }
 0x1cd   :  { %1303 = vmatmul.mubr.f32.gmra.mrb[60].mxu0 %v910_v44  ;;  %v914_v32 = vmax.f32 %v529_v58, 0.0 }
 0x1ce   :  { %v915_v31 = vmax.f32 %v531_v13, 0.0  ;;  %v599_v18 = vpop.f32.mrb[64].mxu1 }
 0x1cf   :  { %v600_v46 = vadd.f32 %v599_v18, %v2561_v60  ;;  %v601_v52 = vpop.f32.mrb[65].mxu1 }
 0x1d0   :  { %v602_v53 = vadd.f32 %v601_v52, %v2565_v14  ;;  %1308 = vmatprep.mubr.f32.mxu0 %v915_v31 }
 0x1d1   :  { %1309 = vmatmul.mubr.f32.gmra.mrb[62].mxu0 %v914_v32  ;;  %v792_v10 = vmax.f32 %v600_v46, 0.0 }
 0x1d2   :  { %v793_v57 = vmax.f32 %v602_v53, 0.0  ;;  %v605_v8 = vpop.f32.mrb[66].mxu1 }
 0x1d3   :  { %v606_v59 = vadd.f32 %v605_v8, %v2561_v60  ;;  %v607_v27 = vpop.f32.mrb[67].mxu1 }
 0x1d4   :  { %v608_v49 = vadd.f32 %v607_v27, %v2565_v14  ;;  %1379 = vmatprep.mubr.f32.mxu0 %v793_v57 }
 0x1d5   :  { %1380 = vmatmul.mubr.f32.vlgmr.msra.gmra.mrb[0].mxu0 %v792_v10  ;;  %v796_v33 = vmax.f32 %v606_v59, 0.0 }
 0x1d6   :  { %v797_v48 = vmax.f32 %v608_v49, 0.0  ;;  %v611_v30 = vpop.f32.mrb[68].mxu1 }
 0x1d7   :  { %v612_v55 = vadd.f32 %v611_v30, %v2561_v60  ;;  %v613_v29 = vpop.f32.mrb[69].mxu1 }
 0x1d8   :  { %v614_v62 = vadd.f32 %v613_v29, %v2565_v14  ;;  %1385 = vmatprep.mubr.f32.mxu0 %v797_v48 }
 0x1d9   :  { %1386 = vmatmul.mubr.f32.gmra.mrb[2].mxu0 %v796_v33  ;;  %v800_v50 = vmax.f32 %v612_v55, 0.0 }
 0x1da   :  { %v801_v15 = vmax.f32 %v614_v62, 0.0  ;;  %v617_v20 = vpop.f32.mrb[70].mxu1 }
 0x1db   :  { %v618_v28 = vadd.f32 %v617_v20, %v2561_v60  ;;  %v619_v34 = vpop.f32.mrb[71].mxu1 }
 0x1dc   :  { %v620_v45 = vadd.f32 %v619_v34, %v2565_v14  ;;  %1391 = vmatprep.mubr.f32.mxu0 %v801_v15 }
 0x1dd   :  { %1392 = vmatmul.mubr.f32.gmra.mrb[4].mxu0 %v800_v50  ;;  %v804_v56 = vmax.f32 %v618_v28, 0.0 }
 0x1de   :  { %v805_v36 = vmax.f32 %v620_v45, 0.0  ;;  %v623_v47 = vpop.f32.mrb[72].mxu1 }
 0x1df   :  { %v624_v63 = vadd.f32 %v623_v47, %v2561_v60  ;;  %v625_v2 = vpop.f32.mrb[73].mxu1 }
 0x1e0   :  { %v626_v16 = vadd.f32 %v625_v2, %v2565_v14  ;;  %1397 = vmatprep.mubr.f32.mxu0 %v805_v36 }
 0x1e1   :  { %1398 = vmatmul.mubr.f32.gmra.mrb[6].mxu0 %v804_v56  ;;  %v808_v37 = vmax.f32 %v624_v63, 0.0 }
 0x1e2   :  { %v809_v21 = vmax.f32 %v626_v16, 0.0  ;;  %v629_v35 = vpop.f32.mrb[74].mxu1 }
 0x1e3   :  { %v630_v0 = vadd.f32 %v629_v35, %v2561_v60  ;;  %v631_v54 = vpop.f32.mrb[75].mxu1 }
 0x1e4   :  { %v632_v61 = vadd.f32 %v631_v54, %v2565_v14  ;;  %1403 = vmatprep.mubr.f32.mxu0 %v809_v21 }
 0x1e5   :  { %1404 = vmatmul.mubr.f32.gmra.mrb[8].mxu0 %v808_v37  ;;  %v812_v4 = vmax.f32 %v630_v0, 0.0 }
 0x1e6   :  { %v813_v12 = vmax.f32 %v632_v61, 0.0  ;;  %v635_v22 = vpop.f32.mrb[76].mxu1 }
 0x1e7   :  { %v636_v23 = vadd.f32 %v635_v22, %v2561_v60  ;;  %v637_v41 = vpop.f32.mrb[77].mxu1 }
 0x1e8   :  { %v638_v24 = vadd.f32 %v637_v41, %v2565_v14  ;;  %1409 = vmatprep.mubr.f32.mxu0 %v813_v12 }
 0x1e9   :  { %1410 = vmatmul.mubr.f32.gmra.mrb[10].mxu0 %v812_v4  ;;  %v816_v9 = vmax.f32 %v636_v23, 0.0 }
 0x1ea   :  { %v817_v1 = vmax.f32 %v638_v24, 0.0  ;;  %v641_v3 = vpop.f32.mrb[78].mxu1 }
 0x1eb   :  { %v642_v5 = vadd.f32 %v641_v3, %v2561_v60  ;;  %v643_v11 = vpop.f32.mrb[79].mxu1 }
 0x1ec   :  { %v644_v17 = vadd.f32 %v643_v11, %v2565_v14  ;;  %1415 = vmatprep.mubr.f32.mxu0 %v817_v1 }
 0x1ed   :  { %1416 = vmatmul.mubr.f32.gmra.mrb[12].mxu0 %v816_v9  ;;  %v820_v6 = vmax.f32 %v642_v5, 0.0 }
 0x1ee   :  { %v821_v19 = vmax.f32 %v644_v17, 0.0  ;;  %v647_v42 = vpop.f32.mrb[80].mxu1 }
 0x1ef   :  { %v648_v25 = vadd.f32 %v647_v42, %v2561_v60  ;;  %v649_v26 = vpop.f32.mrb[81].mxu1 }
 0x1f0   :  { %v650_v38 = vadd.f32 %v649_v26, %v2565_v14  ;;  %1421 = vmatprep.mubr.f32.mxu0 %v821_v19 }
 0x1f1   :  { %1422 = vmatmul.mubr.f32.gmra.mrb[14].mxu0 %v820_v6  ;;  %v824_v58 = vmax.f32 %v648_v25, 0.0 }
 0x1f2   :  { %v825_v39 = vmax.f32 %v650_v38, 0.0  ;;  %v653_v44 = vpop.f32.mrb[82].mxu1 }
 0x1f3   :  { %v654_v7 = vadd.f32 %v653_v44, %v2561_v60  ;;  %v655_v13 = vpop.f32.mrb[83].mxu1 }
 0x1f4   :  { %v656_v31 = vadd.f32 %v655_v13, %v2565_v14  ;;  %1427 = vmatprep.mubr.f32.mxu0 %v825_v39 }
 0x1f5   :  { %1428 = vmatmul.mubr.f32.gmra.mrb[16].mxu0 %v824_v58  ;;  %v828_v46 = vmax.f32 %v654_v7, 0.0 }
 0x1f6   :  { %v829_v18 = vmax.f32 %v656_v31, 0.0  ;;  %v659_v32 = vpop.f32.mrb[84].mxu1 }
 0x1f7   :  { %v660_v52 = vadd.f32 %v659_v32, %v2561_v60  ;;  %v661_v53 = vpop.f32.mrb[85].mxu1 }
 0x1f8   :  { %v662_v57 = vadd.f32 %v661_v53, %v2565_v14  ;;  %1433 = vmatprep.mubr.f32.mxu0 %v829_v18 }
 0x1f9   :  { %1434 = vmatmul.mubr.f32.gmra.mrb[18].mxu0 %v828_v46  ;;  %v832_v59 = vmax.f32 %v660_v52, 0.0 }
 0x1fa   :  { %v833_v8 = vmax.f32 %v662_v57, 0.0  ;;  %v665_v10 = vpop.f32.mrb[86].mxu1 }
 0x1fb   :  { %v666_v27 = vadd.f32 %v665_v10, %v2561_v60  ;;  %v667_v49 = vpop.f32.mrb[87].mxu1 }
 0x1fc   :  { %v668_v48 = vadd.f32 %v667_v49, %v2565_v14  ;;  %1439 = vmatprep.mubr.f32.mxu0 %v833_v8 }
 0x1fd   :  { %1440 = vmatmul.mubr.f32.gmra.mrb[20].mxu0 %v832_v59  ;;  %v836_v55 = vmax.f32 %v666_v27, 0.0 }
 0x1fe   :  { %v837_v30 = vmax.f32 %v668_v48, 0.0  ;;  %v671_v33 = vpop.f32.mrb[88].mxu1 }
 0x1ff   :  { %v672_v29 = vadd.f32 %v671_v33, %v2561_v60  ;;  %v673_v62 = vpop.f32.mrb[89].mxu1 }
 0x200   :  { %v674_v15 = vadd.f32 %v673_v62, %v2565_v14  ;;  %1445 = vmatprep.mubr.f32.mxu0 %v837_v30 }
 0x201   :  { %1446 = vmatmul.mubr.f32.gmra.mrb[22].mxu0 %v836_v55  ;;  %v840_v28 = vmax.f32 %v672_v29, 0.0 }
 0x202   :  { %v841_v20 = vmax.f32 %v674_v15, 0.0  ;;  %v677_v50 = vpop.f32.mrb[90].mxu1 }
 0x203   :  { %v678_v34 = vadd.f32 %v677_v50, %v2561_v60  ;;  %v679_v45 = vpop.f32.mrb[91].mxu1 }
 0x204   :  { %v680_v36 = vadd.f32 %v679_v45, %v2565_v14  ;;  %1451 = vmatprep.mubr.f32.mxu0 %v841_v20 }
 0x205   :  { %1452 = vmatmul.mubr.f32.gmra.mrb[24].mxu0 %v840_v28  ;;  %v844_v63 = vmax.f32 %v678_v34, 0.0 }
 0x206   :  { %v845_v47 = vmax.f32 %v680_v36, 0.0  ;;  %v683_v56 = vpop.f32.mrb[92].mxu1 }
 0x207   :  { %v684_v2 = vadd.f32 %v683_v56, %v2561_v60  ;;  %v685_v16 = vpop.f32.mrb[93].mxu1 }
 0x208   :  { %v686_v21 = vadd.f32 %v685_v16, %v2565_v14  ;;  %1457 = vmatprep.mubr.f32.mxu0 %v845_v47 }
 0x209   :  { %1458 = vmatmul.mubr.f32.gmra.mrb[26].mxu0 %v844_v63  ;;  %v848_v0 = vmax.f32 %v684_v2, 0.0 }
 0x20a   :  { %v849_v35 = vmax.f32 %v686_v21, 0.0  ;;  %v689_v37 = vpop.f32.mrb[94].mxu1 }
 0x20b   :  { %v690_v54 = vadd.f32 %v689_v37, %v2561_v60  ;;  %v691_v61 = vpop.f32.mrb[95].mxu1 }
 0x20c   :  { %v692_v12 = vadd.f32 %v691_v61, %v2565_v14  ;;  %1463 = vmatprep.mubr.f32.mxu0 %v849_v35 }
 0x20d   :  { %1464 = vmatmul.mubr.f32.gmra.mrb[28].mxu0 %v848_v0  ;;  %v852_v23 = vmax.f32 %v690_v54, 0.0 }
 0x20e   :  { %v853_v22 = vmax.f32 %v692_v12, 0.0  ;;  %v695_v4 = vpop.f32.mrb[96].mxu1 }
 0x20f   :  { %v696_v41 = vadd.f32 %v695_v4, %v2561_v60  ;;  %v697_v24 = vpop.f32.mrb[97].mxu1 }
 0x210   :  { %v698_v1 = vadd.f32 %v697_v24, %v2565_v14  ;;  %1469 = vmatprep.mubr.f32.mxu0 %v853_v22 }
 0x211   :  { %1470 = vmatmul.mubr.f32.gmra.mrb[30].mxu0 %v852_v23  ;;  %v856_v5 = vmax.f32 %v696_v41, 0.0 }
 0x212   :  { %v857_v3 = vmax.f32 %v698_v1, 0.0  ;;  %v701_v9 = vpop.f32.mrb[98].mxu1 }
 0x213   :  { %v702_v11 = vadd.f32 %v701_v9, %v2561_v60  ;;  %v703_v17 = vpop.f32.mrb[99].mxu1 }
 0x214   :  { %v704_v19 = vadd.f32 %v703_v17, %v2565_v14  ;;  %1475 = vmatprep.mubr.f32.mxu0 %v857_v3 }
 0x215   :  { %1476 = vmatmul.mubr.f32.gmra.mrb[32].mxu0 %v856_v5  ;;  %v860_v25 = vmax.f32 %v702_v11, 0.0 }
 0x216   :  { %v861_v42 = vmax.f32 %v704_v19, 0.0  ;;  %v707_v6 = vpop.f32.mrb[100].mxu1 }
 0x217   :  { %v708_v26 = vadd.f32 %v707_v6, %v2561_v60  ;;  %v709_v38 = vpop.f32.mrb[101].mxu1 }
 0x218   :  { %v710_v39 = vadd.f32 %v709_v38, %v2565_v14  ;;  %1481 = vmatprep.mubr.f32.mxu0 %v861_v42 }
 0x219   :  { %1482 = vmatmul.mubr.f32.gmra.mrb[34].mxu0 %v860_v25  ;;  %v864_v7 = vmax.f32 %v708_v26, 0.0 }
 0x21a   :  { %v865_v44 = vmax.f32 %v710_v39, 0.0  ;;  %v713_v58 = vpop.f32.mrb[102].mxu1 }
 0x21b   :  { %v714_v13 = vadd.f32 %v713_v58, %v2561_v60  ;;  %v715_v31 = vpop.f32.mrb[103].mxu1 }
 0x21c   :  { %v716_v18 = vadd.f32 %v715_v31, %v2565_v14  ;;  %1487 = vmatprep.mubr.f32.mxu0 %v865_v44 }
 0x21d   :  { %1488 = vmatmul.mubr.f32.gmra.mrb[36].mxu0 %v864_v7  ;;  %v868_v52 = vmax.f32 %v714_v13, 0.0 }
 0x21e   :  { %v869_v32 = vmax.f32 %v716_v18, 0.0  ;;  %v719_v46 = vpop.f32.mrb[104].mxu1 }
 0x21f   :  { %v720_v53 = vadd.f32 %v719_v46, %v2561_v60  ;;  %v721_v57 = vpop.f32.mrb[105].mxu1 }
 0x220   :  { %v722_v8 = vadd.f32 %v721_v57, %v2565_v14  ;;  %1493 = vmatprep.mubr.f32.mxu0 %v869_v32 }
 0x221   :  { %1494 = vmatmul.mubr.f32.gmra.mrb[38].mxu0 %v868_v52  ;;  %v872_v27 = vmax.f32 %v720_v53, 0.0 }
 0x222   :  { %v873_v10 = vmax.f32 %v722_v8, 0.0  ;;  %v725_v59 = vpop.f32.mrb[106].mxu1 }
 0x223   :  { %v726_v49 = vadd.f32 %v725_v59, %v2561_v60  ;;  %v727_v48 = vpop.f32.mrb[107].mxu1 }
 0x224   :  { %v728_v30 = vadd.f32 %v727_v48, %v2565_v14  ;;  %1499 = vmatprep.mubr.f32.mxu0 %v873_v10 }
 0x225   :  { %1500 = vmatmul.mubr.f32.gmra.mrb[40].mxu0 %v872_v27  ;;  %v876_v29 = vmax.f32 %v726_v49, 0.0 }
 0x226   :  { %v877_v33 = vmax.f32 %v728_v30, 0.0  ;;  %v731_v55 = vpop.f32.mrb[108].mxu1 }
 0x227   :  { %v732_v62 = vadd.f32 %v731_v55, %v2561_v60  ;;  %v733_v15 = vpop.f32.mrb[109].mxu1 }
 0x228   :  { %v734_v20 = vadd.f32 %v733_v15, %v2565_v14  ;;  %1505 = vmatprep.mubr.f32.mxu0 %v877_v33 }
 0x229   :  { %1506 = vmatmul.mubr.f32.gmra.mrb[42].mxu0 %v876_v29  ;;  %v880_v34 = vmax.f32 %v732_v62, 0.0  ;;  %v1046_v62 = vld [vmem:[%s2725_s4] sm:$0x3]  ;;  %s2147_s4 = smov [#allocation8]  }
 0x22a   :  { %v881_v50 = vmax.f32 %v734_v20, 0.0  ;;  %v737_v28 = vpop.f32.mrb[110].mxu1  ;;  %v2636_v15 = vrot.slane %v1046_v62, %v258_v43  ;;  %s1641_s8 = sshll.u32 %s2147_s4, 4  ;;  %s1642_s8 = int_to_ptr.vmem [resolvable:$true] %s1641_s8 }
 0x22b   :  { %v738_v45 = vadd.f32 %v737_v28, %v2561_v60  ;;  %v739_v36 = vpop.f32.mrb[111].mxu1  ;;  %s2112_s9 = scalar_lea.vmem %s1642_s8, 8192  ;;  %p2117_p11 = scmp.lt.s32.totalorder %s1642_s8, %s1642_s8 }
 0x22c   :  { %v740_v47 = vadd.f32 %v739_v36, %v2565_v14  ;;  %1511 = vmatprep.mubr.f32.mxu0 %v881_v50  ;;  %p2113_p10 = scmp.ne.s32.totalorder %s1642_s8, %s2112_s9  ;;  %p2118_p12 = scmp.lt.s32.totalorder %s2112_s9, %s2112_s9 }
 0x22d   :  { %1512 = vmatmul.mubr.f32.gmra.mrb[44].mxu0 %v880_v34  ;;  %v884_v2 = vmax.f32 %v738_v45, 0.0 }
 0x22e   :  { %v885_v56 = vmax.f32 %v740_v47, 0.0  ;;  %v743_v63 = vpop.f32.mrb[112].mxu1  ;;  %p2119_p13 = por %p2118_p12, %p2117_p11 }
 0x22f   :  { %v744_v16 = vadd.f32 %v743_v63, %v2561_v60  ;;  %v745_v21 = vpop.f32.mrb[113].mxu1 }
 0x230   :  { %v746_v35 = vadd.f32 %v745_v21, %v2565_v14  ;;  %1517 = vmatprep.mubr.f32.mxu0 %v885_v56  ;;  %p2120_p0 = pnand %p2119_p13, %p2113_p10 }
 0x231   :  { %1518 = vmatmul.mubr.f32.gmra.mrb[46].mxu0 %v884_v2  ;;  %v888_v54 = vmax.f32 %v744_v16, 0.0 }
 0x232   :  { %v889_v37 = vmax.f32 %v746_v35, 0.0  ;;  %v749_v0 = vpop.f32.mrb[114].mxu1 }
 0x233   :  { %v750_v61 = vadd.f32 %v749_v0, %v2561_v60  ;;  %v751_v12 = vpop.f32.mrb[115].mxu1 }
 0x234   :  { %v752_v22 = vadd.f32 %v751_v12, %v2565_v14  ;;  %1523 = vmatprep.mubr.f32.mxu0 %v889_v37 }
 0x235   :  { %1524 = vmatmul.mubr.f32.gmra.mrb[48].mxu0 %v888_v54  ;;  %v892_v41 = vmax.f32 %v750_v61, 0.0 }
 0x236   :  { %v893_v4 = vmax.f32 %v752_v22, 0.0  ;;  %v755_v23 = vpop.f32.mrb[116].mxu1 }
 0x237   :  { %v756_v24 = vadd.f32 %v755_v23, %v2561_v60  ;;  %v757_v1 = vpop.f32.mrb[117].mxu1 }
 0x238   :  { %v758_v3 = vadd.f32 %v757_v1, %v2565_v14  ;;  %1529 = vmatprep.mubr.f32.mxu0 %v893_v4 }
 0x239   :  { %1530 = vmatmul.mubr.f32.gmra.mrb[50].mxu0 %v892_v41  ;;  %v896_v11 = vmax.f32 %v756_v24, 0.0 }
 0x23a   :  { %v897_v9 = vmax.f32 %v758_v3, 0.0  ;;  %v761_v5 = vpop.f32.mrb[118].mxu1 }
 0x23b   :  { %v762_v17 = vadd.f32 %v761_v5, %v2561_v60  ;;  %v763_v19 = vpop.f32.mrb[119].mxu1 }
 0x23c   :  { %v764_v42 = vadd.f32 %v763_v19, %v2565_v14  ;;  %1535 = vmatprep.mubr.f32.mxu0 %v897_v9 }
 0x23d   :  { %1536 = vmatmul.mubr.f32.gmra.mrb[52].mxu0 %v896_v11  ;;  %v900_v26 = vmax.f32 %v762_v17, 0.0 }
 0x23e   :  { %v901_v6 = vmax.f32 %v764_v42, 0.0  ;;  %v767_v25 = vpop.f32.mrb[120].mxu1 }
 0x23f   :  { %v768_v38 = vadd.f32 %v767_v25, %v2561_v60  ;;  %v769_v39 = vpop.f32.mrb[121].mxu1 }
 0x240   :  { %v770_v44 = vadd.f32 %v769_v39, %v2565_v14  ;;  %1541 = vmatprep.mubr.f32.mxu0 %v901_v6 }
 0x241   :  { %1542 = vmatmul.mubr.f32.gmra.mrb[54].mxu0 %v900_v26  ;;  %v904_v13 = vmax.f32 %v768_v38, 0.0 }
 0x242   :  { %v905_v58 = vmax.f32 %v770_v44, 0.0  ;;  %v773_v7 = vpop.f32.mrb[122].mxu1 }
 0x243   :  { %v774_v31 = vadd.f32 %v773_v7, %v2561_v60  ;;  %v775_v18 = vpop.f32.mrb[123].mxu1 }
 0x244   :  { %v776_v32 = vadd.f32 %v775_v18, %v2565_v14  ;;  %1547 = vmatprep.mubr.f32.mxu0 %v905_v58 }
 0x245   :  { %1548 = vmatmul.mubr.f32.gmra.mrb[56].mxu0 %v904_v13  ;;  %v908_v53 = vmax.f32 %v774_v31, 0.0 }
 0x246   :  { %v909_v46 = vmax.f32 %v776_v32, 0.0  ;;  %v779_v52 = vpop.f32.mrb[124].mxu1 }
 0x247   :  { %v780_v57 = vadd.f32 %v779_v52, %v2561_v60  ;;  %v781_v8 = vpop.f32.mrb[125].mxu1 }
 0x248   :  { %v782_v10 = vadd.f32 %v781_v8, %v2565_v14  ;;  %1553 = vmatprep.mubr.f32.mxu0 %v909_v46 }
 0x249   :  { %1554 = vmatmul.mubr.f32.gmra.mrb[58].mxu0 %v908_v53  ;;  %v912_v49 = vmax.f32 %v780_v57, 0.0 }
 0x24a   :  { %v913_v59 = vmax.f32 %v782_v10, 0.0  ;;  %v785_v27 = vpop.f32.mrb[126].mxu1 }
 0x24b   :  { %v786_v48 = vadd.f32 %v785_v27, %v2561_v60  ;;  %v787_v30 = vpop.f32.mrb[127].mxu1  ;;  %v2640_v60 = vrot.slane %v1046_v62, %v262_v51 }
 0x24c   :  { %v788_v33 = vadd.f32 %v787_v30, %v2565_v14  ;;  %1559 = vmatprep.mubr.f32.mxu0 %v913_v59 }
 0x24d   :  { %1560 = vmatmul.mubr.f32.gmra.mrb[60].mxu0 %v912_v49  ;;  %v916_v29 = vmax.f32 %v786_v48, 0.0 }
 0x24e   :  { %v917_v55 = vmax.f32 %v788_v33, 0.0 }
 0x250   :  { %1565 = vmatprep.mubr.f32.mxu0 %v917_v55 }
 0x251   :  { %1566 = vmatmul.mubr.f32.gmra.mrb[62].mxu0 %v916_v29 }
 0x2a8   :  { %v1381_v20 = vpop.f32.mrb[0].mxu0 }
 0x2a9   :  { %v1910_v14 = vadd.f32 %v1381_v20, %v2636_v15  ;;  %v1383_v50 = vpop.f32.mrb[1].mxu0 }
 0x2aa   :  { %v1911_v28 = vadd.f32 %v1383_v50, %v2640_v60 }
 0x2ab   :  { %1572 = vst [vmem:[#allocation8] sm:$0xff] %v1910_v14 }
 0x2ac   :  { %1573 = vst [vmem:[#allocation8 + $0x8] sm:$0xff] %v1911_v28  ;;  %v1387_v34 = vpop.f32.mrb[2].mxu0 }
 0x2ad   :  { %v1912_v45 = vadd.f32 %v1387_v34, %v2636_v15  ;;  %v1389_v36 = vpop.f32.mrb[3].mxu0 }
 0x2ae   :  { %v1913_v47 = vadd.f32 %v1389_v36, %v2640_v60 }
 0x2af   :  { %1574 = vst [vmem:[#allocation8 + $0x10] sm:$0xff] %v1912_v45 }
 0x2b0   :  { %1575 = vst [vmem:[#allocation8 + $0x18] sm:$0xff] %v1913_v47  ;;  %v1393_v43 = vpop.f32.mrb[4].mxu0 }
 0x2b1   :  { %v1914_v40 = vadd.f32 %v1393_v43, %v2636_v15  ;;  %v1395_v51 = vpop.f32.mrb[5].mxu0 }
 0x2b2   :  { %v1915_v56 = vadd.f32 %v1395_v51, %v2640_v60 }
 0x2b3   :  { %1576 = vst [vmem:[#allocation8 + $0x20] sm:$0xff] %v1914_v40 }
 0x2b4   :  { %1577 = vst [vmem:[#allocation8 + $0x28] sm:$0xff] %v1915_v56  ;;  %v1399_v63 = vpop.f32.mrb[6].mxu0 }
 0x2b5   :  { %v1916_v2 = vadd.f32 %v1399_v63, %v2636_v15  ;;  %v1401_v16 = vpop.f32.mrb[7].mxu0 }
 0x2b6   :  { %v1917_v21 = vadd.f32 %v1401_v16, %v2640_v60 }
 0x2b7   :  { %1578 = vst [vmem:[#allocation8 + $0x30] sm:$0xff] %v1916_v2 }
 0x2b8   :  { %1579 = vst [vmem:[#allocation8 + $0x38] sm:$0xff] %v1917_v21  ;;  %v1405_v35 = vpop.f32.mrb[8].mxu0 }
 0x2b9   :  { %v1918_v37 = vadd.f32 %v1405_v35, %v2636_v15  ;;  %v1407_v0 = vpop.f32.mrb[9].mxu0 }
 0x2ba   :  { %v1919_v54 = vadd.f32 %v1407_v0, %v2640_v60 }
 0x2bb   :  { %1580 = vst [vmem:[#allocation8 + $0x40] sm:$0xff] %v1918_v37 }
 0x2bc   :  { %1581 = vst [vmem:[#allocation8 + $0x48] sm:$0xff] %v1919_v54  ;;  %v1411_v61 = vpop.f32.mrb[10].mxu0 }
 0x2bd   :  { %v1920_v12 = vadd.f32 %v1411_v61, %v2636_v15  ;;  %v1413_v22 = vpop.f32.mrb[11].mxu0 }
 0x2be   :  { %v1921_v4 = vadd.f32 %v1413_v22, %v2640_v60 }
 0x2bf   :  { %1582 = vst [vmem:[#allocation8 + $0x50] sm:$0xff] %v1920_v12 }
 0x2c0   :  { %1583 = vst [vmem:[#allocation8 + $0x58] sm:$0xff] %v1921_v4  ;;  %v1417_v23 = vpop.f32.mrb[12].mxu0 }
 0x2c1   :  { %v1922_v41 = vadd.f32 %v1417_v23, %v2636_v15  ;;  %v1419_v24 = vpop.f32.mrb[13].mxu0 }
 0x2c2   :  { %v1923_v1 = vadd.f32 %v1419_v24, %v2640_v60 }
 0x2c3   :  { %1584 = vst [vmem:[#allocation8 + $0x60] sm:$0xff] %v1922_v41 }
 0x2c4   :  { %1585 = vst [vmem:[#allocation8 + $0x68] sm:$0xff] %v1923_v1  ;;  %v1423_v3 = vpop.f32.mrb[14].mxu0 }
 0x2c5   :  { %v1924_v9 = vadd.f32 %v1423_v3, %v2636_v15  ;;  %v1425_v5 = vpop.f32.mrb[15].mxu0 }
 0x2c6   :  { %v1925_v11 = vadd.f32 %v1425_v5, %v2640_v60 }
 0x2c7   :  { %1586 = vst [vmem:[#allocation8 + $0x70] sm:$0xff] %v1924_v9 }
 0x2c8   :  { %1587 = vst [vmem:[#allocation8 + $0x78] sm:$0xff] %v1925_v11  ;;  %v1429_v17 = vpop.f32.mrb[16].mxu0 }
 0x2c9   :  { %v1926_v19 = vadd.f32 %v1429_v17, %v2636_v15  ;;  %v1431_v42 = vpop.f32.mrb[17].mxu0 }
 0x2ca   :  { %v1927_v6 = vadd.f32 %v1431_v42, %v2640_v60 }
 0x2cb   :  { %1588 = vst [vmem:[#allocation8 + $0x80] sm:$0xff] %v1926_v19 }
 0x2cc   :  { %1589 = vst [vmem:[#allocation8 + $0x88] sm:$0xff] %v1927_v6  ;;  %v1435_v25 = vpop.f32.mrb[18].mxu0 }
 0x2cd   :  { %v1928_v26 = vadd.f32 %v1435_v25, %v2636_v15  ;;  %v1437_v38 = vpop.f32.mrb[19].mxu0 }
 0x2ce   :  { %v1929_v39 = vadd.f32 %v1437_v38, %v2640_v60 }
 0x2cf   :  { %1590 = vst [vmem:[#allocation8 + $0x90] sm:$0xff] %v1928_v26 }
 0x2d0   :  { %1591 = vst [vmem:[#allocation8 + $0x98] sm:$0xff] %v1929_v39  ;;  %v1441_v44 = vpop.f32.mrb[20].mxu0 }
 0x2d1   :  { %v1930_v58 = vadd.f32 %v1441_v44, %v2636_v15  ;;  %v1443_v7 = vpop.f32.mrb[21].mxu0 }
 0x2d2   :  { %v1931_v13 = vadd.f32 %v1443_v7, %v2640_v60 }
 0x2d3   :  { %1592 = vst [vmem:[#allocation8 + $0xa0] sm:$0xff] %v1930_v58 }
 0x2d4   :  { %1593 = vst [vmem:[#allocation8 + $0xa8] sm:$0xff] %v1931_v13  ;;  %v1447_v31 = vpop.f32.mrb[22].mxu0 }
 0x2d5   :  { %v1932_v18 = vadd.f32 %v1447_v31, %v2636_v15  ;;  %v1449_v32 = vpop.f32.mrb[23].mxu0 }
 0x2d6   :  { %v1933_v46 = vadd.f32 %v1449_v32, %v2640_v60 }
 0x2d7   :  { %1594 = vst [vmem:[#allocation8 + $0xb0] sm:$0xff] %v1932_v18 }
 0x2d8   :  { %1595 = vst [vmem:[#allocation8 + $0xb8] sm:$0xff] %v1933_v46  ;;  %v1453_v52 = vpop.f32.mrb[24].mxu0 }
 0x2d9   :  { %v1934_v53 = vadd.f32 %v1453_v52, %v2636_v15  ;;  %v1455_v57 = vpop.f32.mrb[25].mxu0 }
 0x2da   :  { %v1935_v8 = vadd.f32 %v1455_v57, %v2640_v60 }
 0x2db   :  { %1596 = vst [vmem:[#allocation8 + $0xc0] sm:$0xff] %v1934_v53 }
 0x2dc   :  { %1597 = vst [vmem:[#allocation8 + $0xc8] sm:$0xff] %v1935_v8  ;;  %v1459_v10 = vpop.f32.mrb[26].mxu0 }
 0x2dd   :  { %v1936_v59 = vadd.f32 %v1459_v10, %v2636_v15  ;;  %v1461_v27 = vpop.f32.mrb[27].mxu0 }
 0x2de   :  { %v1937_v49 = vadd.f32 %v1461_v27, %v2640_v60 }
 0x2df   :  { %1598 = vst [vmem:[#allocation8 + $0xd0] sm:$0xff] %v1936_v59 }
 0x2e0   :  { %1599 = vst [vmem:[#allocation8 + $0xd8] sm:$0xff] %v1937_v49  ;;  %v1465_v48 = vpop.f32.mrb[28].mxu0 }
 0x2e1   :  { %v1938_v30 = vadd.f32 %v1465_v48, %v2636_v15  ;;  %v1467_v33 = vpop.f32.mrb[29].mxu0 }
 0x2e2   :  { %v1939_v55 = vadd.f32 %v1467_v33, %v2640_v60 }
 0x2e3   :  { %1600 = vst [vmem:[#allocation8 + $0xe0] sm:$0xff] %v1938_v30 }
 0x2e4   :  { %1601 = vst [vmem:[#allocation8 + $0xe8] sm:$0xff] %v1939_v55  ;;  %v1471_v29 = vpop.f32.mrb[30].mxu0 }
 0x2e5   :  { %v1940_v62 = vadd.f32 %v1471_v29, %v2636_v15  ;;  %v1473_v20 = vpop.f32.mrb[31].mxu0 }
 0x2e6   :  { %v1941_v14 = vadd.f32 %v1473_v20, %v2640_v60 }
 0x2e7   :  { %1602 = vst [vmem:[#allocation8 + $0xf0] sm:$0xff] %v1940_v62 }
 0x2e8   :  { %1603 = vst [vmem:[#allocation8 + $0xf8] sm:$0xff] %v1941_v14  ;;  %v1477_v50 = vpop.f32.mrb[32].mxu0 }
 0x2e9   :  { %v1942_v28 = vadd.f32 %v1477_v50, %v2636_v15  ;;  %v1479_v34 = vpop.f32.mrb[33].mxu0 }
 0x2ea   :  { %v1943_v45 = vadd.f32 %v1479_v34, %v2640_v60 }
 0x2eb   :  { %1604 = vst [vmem:[#allocation8 + $0x100] sm:$0xff] %v1942_v28 }
 0x2ec   :  { %1605 = vst [vmem:[#allocation8 + $0x108] sm:$0xff] %v1943_v45  ;;  %v1483_v36 = vpop.f32.mrb[34].mxu0 }
 0x2ed   :  { %v1944_v47 = vadd.f32 %v1483_v36, %v2636_v15  ;;  %v1485_v43 = vpop.f32.mrb[35].mxu0 }
 0x2ee   :  { %v1945_v40 = vadd.f32 %v1485_v43, %v2640_v60 }
 0x2ef   :  { %1606 = vst [vmem:[#allocation8 + $0x110] sm:$0xff] %v1944_v47 }
 0x2f0   :  { %1607 = vst [vmem:[#allocation8 + $0x118] sm:$0xff] %v1945_v40  ;;  %v1489_v51 = vpop.f32.mrb[36].mxu0 }
 0x2f1   :  { %v1946_v56 = vadd.f32 %v1489_v51, %v2636_v15  ;;  %v1491_v63 = vpop.f32.mrb[37].mxu0 }
 0x2f2   :  { %v1947_v2 = vadd.f32 %v1491_v63, %v2640_v60 }
 0x2f3   :  { %1608 = vst [vmem:[#allocation8 + $0x120] sm:$0xff] %v1946_v56 }
 0x2f4   :  { %1609 = vst [vmem:[#allocation8 + $0x128] sm:$0xff] %v1947_v2  ;;  %v1495_v16 = vpop.f32.mrb[38].mxu0 }
 0x2f5   :  { %v1948_v21 = vadd.f32 %v1495_v16, %v2636_v15  ;;  %v1497_v35 = vpop.f32.mrb[39].mxu0 }
 0x2f6   :  { %v1949_v37 = vadd.f32 %v1497_v35, %v2640_v60 }
 0x2f7   :  { %1610 = vst [vmem:[#allocation8 + $0x130] sm:$0xff] %v1948_v21 }
 0x2f8   :  { %1611 = vst [vmem:[#allocation8 + $0x138] sm:$0xff] %v1949_v37  ;;  %v1501_v0 = vpop.f32.mrb[40].mxu0 }
 0x2f9   :  { %v1950_v54 = vadd.f32 %v1501_v0, %v2636_v15  ;;  %v1503_v61 = vpop.f32.mrb[41].mxu0 }
 0x2fa   :  { %v1951_v12 = vadd.f32 %v1503_v61, %v2640_v60 }
 0x2fb   :  { %1612 = vst [vmem:[#allocation8 + $0x140] sm:$0xff] %v1950_v54 }
 0x2fc   :  { %1613 = vst [vmem:[#allocation8 + $0x148] sm:$0xff] %v1951_v12  ;;  %v1507_v22 = vpop.f32.mrb[42].mxu0 }
 0x2fd   :  { %v1952_v4 = vadd.f32 %v1507_v22, %v2636_v15  ;;  %v1509_v23 = vpop.f32.mrb[43].mxu0 }
 0x2fe   :  { %v1953_v41 = vadd.f32 %v1509_v23, %v2640_v60 }
 0x2ff   :  { %1614 = vst [vmem:[#allocation8 + $0x150] sm:$0xff] %v1952_v4 }
 0x300   :  { %1615 = vst [vmem:[#allocation8 + $0x158] sm:$0xff] %v1953_v41  ;;  %v1513_v24 = vpop.f32.mrb[44].mxu0 }
 0x301   :  { %v1954_v1 = vadd.f32 %v1513_v24, %v2636_v15  ;;  %v1515_v3 = vpop.f32.mrb[45].mxu0 }
 0x302   :  { %v1955_v9 = vadd.f32 %v1515_v3, %v2640_v60 }
 0x303   :  { %1616 = vst [vmem:[#allocation8 + $0x160] sm:$0xff] %v1954_v1 }
 0x304   :  { %1617 = vst [vmem:[#allocation8 + $0x168] sm:$0xff] %v1955_v9  ;;  %v1519_v5 = vpop.f32.mrb[46].mxu0 }
 0x305   :  { %v1956_v11 = vadd.f32 %v1519_v5, %v2636_v15  ;;  %v1521_v17 = vpop.f32.mrb[47].mxu0 }
 0x306   :  { %v1957_v19 = vadd.f32 %v1521_v17, %v2640_v60 }
 0x307   :  { %1618 = vst [vmem:[#allocation8 + $0x170] sm:$0xff] %v1956_v11 }
 0x308   :  { %1619 = vst [vmem:[#allocation8 + $0x178] sm:$0xff] %v1957_v19  ;;  %v1525_v42 = vpop.f32.mrb[48].mxu0 }
 0x309   :  { %v1958_v6 = vadd.f32 %v1525_v42, %v2636_v15  ;;  %v1527_v25 = vpop.f32.mrb[49].mxu0 }
 0x30a   :  { %v1959_v26 = vadd.f32 %v1527_v25, %v2640_v60 }
 0x30b   :  { %1620 = vst [vmem:[#allocation8 + $0x180] sm:$0xff] %v1958_v6 }
 0x30c   :  { %1621 = vst [vmem:[#allocation8 + $0x188] sm:$0xff] %v1959_v26  ;;  %v1531_v38 = vpop.f32.mrb[50].mxu0 }
 0x30d   :  { %v1960_v39 = vadd.f32 %v1531_v38, %v2636_v15  ;;  %v1533_v44 = vpop.f32.mrb[51].mxu0 }
 0x30e   :  { %v1961_v58 = vadd.f32 %v1533_v44, %v2640_v60 }
 0x30f   :  { %1622 = vst [vmem:[#allocation8 + $0x190] sm:$0xff] %v1960_v39 }
 0x310   :  { %1623 = vst [vmem:[#allocation8 + $0x198] sm:$0xff] %v1961_v58  ;;  %v1537_v7 = vpop.f32.mrb[52].mxu0 }
 0x311   :  { %v1962_v13 = vadd.f32 %v1537_v7, %v2636_v15  ;;  %v1539_v31 = vpop.f32.mrb[53].mxu0 }
 0x312   :  { %v1963_v18 = vadd.f32 %v1539_v31, %v2640_v60 }
 0x313   :  { %1624 = vst [vmem:[#allocation8 + $0x1a0] sm:$0xff] %v1962_v13 }
 0x314   :  { %1625 = vst [vmem:[#allocation8 + $0x1a8] sm:$0xff] %v1963_v18  ;;  %v1543_v32 = vpop.f32.mrb[54].mxu0 }
 0x315   :  { %v1964_v46 = vadd.f32 %v1543_v32, %v2636_v15  ;;  %v1545_v52 = vpop.f32.mrb[55].mxu0 }
 0x316   :  { %v1965_v53 = vadd.f32 %v1545_v52, %v2640_v60 }
 0x317   :  { %1626 = vst [vmem:[#allocation8 + $0x1b0] sm:$0xff] %v1964_v46 }
 0x318   :  { %1627 = vst [vmem:[#allocation8 + $0x1b8] sm:$0xff] %v1965_v53  ;;  %v1549_v57 = vpop.f32.mrb[56].mxu0 }
 0x319   :  { %v1966_v8 = vadd.f32 %v1549_v57, %v2636_v15  ;;  %v1551_v10 = vpop.f32.mrb[57].mxu0 }
 0x31a   :  { %v1967_v59 = vadd.f32 %v1551_v10, %v2640_v60 }
 0x31b   :  { %1628 = vst [vmem:[#allocation8 + $0x1c0] sm:$0xff] %v1966_v8 }
 0x31c   :  { %1629 = vst [vmem:[#allocation8 + $0x1c8] sm:$0xff] %v1967_v59  ;;  %v1555_v27 = vpop.f32.mrb[58].mxu0 }
 0x31d   :  { %v1968_v49 = vadd.f32 %v1555_v27, %v2636_v15  ;;  %v1557_v48 = vpop.f32.mrb[59].mxu0 }
 0x31e   :  { %v1969_v30 = vadd.f32 %v1557_v48, %v2640_v60 }
 0x31f   :  { %1630 = vst [vmem:[#allocation8 + $0x1d0] sm:$0xff] %v1968_v49 }
 0x320   :  { %1631 = vst [vmem:[#allocation8 + $0x1d8] sm:$0xff] %v1969_v30  ;;  %v1561_v33 = vpop.f32.mrb[60].mxu0 }
 0x321   :  { %v1970_v55 = vadd.f32 %v1561_v33, %v2636_v15  ;;  %v1563_v29 = vpop.f32.mrb[61].mxu0 }
 0x322   :  { %v1971_v62 = vadd.f32 %v1563_v29, %v2640_v60 }
 0x323   :  { %1632 = vst [vmem:[#allocation8 + $0x1e0] sm:$0xff] %v1970_v55 }
 0x324   :  { %1633 = vst [vmem:[#allocation8 + $0x1e8] sm:$0xff] %v1971_v62  ;;  %v1567_v20 = vpop.f32.mrb[62].mxu0 }
 0x325   :  { %v1972_v14 = vadd.f32 %v1567_v20, %v2636_v15  ;;  %v1569_v50 = vpop.f32.mrb[63].mxu0 }
 0x326   :  { %v1973_v28 = vadd.f32 %v1569_v50, %v2640_v60 }
 0x327   :  { %1634 = vst [vmem:[#allocation8 + $0x1f0] sm:$0xff] %v1972_v14 }
 0x328   :  { %1635 = vst [vmem:[#allocation8 + $0x1f8] sm:$0xff] %v1973_v28 }
 0x329   :  { %2123 = shalt.err (!%p2120_p0)
}
 0x32a   :  { %s2124_s12 = scalar_lea.hbm %s2726_s5, 8192 }
 0x32b   :  { %p2125_p1 = scmp.ne.s32.totalorder %s2726_s5, %s2124_s12  ;;  %p2128_p2 = scmp.lt.u32.totalorder %s2124_s12, %s2726_s5 }
 0x32d   :  { %p2130_p3 = pnand %p2128_p2, %p2125_p1 }
 0x32f   :  { %2133 = shalt.err (!%p2130_p3)
}
 0x330   :  { %1647 = dma.vmem_to_hbm [thread:$0]  %s1642_s8, 8192, %s2726_s5, [#allocation4], %s2144_s1, %s2144_s1, %s2145_s17  }
 0x331   :  { %2138 = dma.done.wait [#allocation4], 8192  }
 0x332   :  { %2139 = vsyncadd [#allocation4], 4294959104 }
 0x333   :  { %1651 = vsyncpa [#allocation3], 1 }
 0x334   :  { %1652 = vsyncpa [#allocation6], 1 }
 0x335   :  { %1653 = vsyncpa [#allocation4], 1 }

// kernel: tpu_custom_call.1
= control target key start
LH: loop header
LB: loop body
LE: loop exit
PB: predicated region body
PF: predicated region fallthrough
CT: control target
= control target key end

     0   :  { %10 = vsyncpa [#allocation3], 0  ;;  %s2721_s0 = inlined_call_operand.hbm [shape: f32[256,256], index: 0, kind: input, shape index: {}]   ;;  %s2722_s1 = inlined_call_operand.hbm [shape: f32[256,512], index: 1, kind: input, shape index: {}]   ;;  %s2723_s2 = inlined_call_operand.vmem [shape: f32[1,512], index: 2, kind: input, shape index: {}]   ;;  %s2724_s3 = inlined_call_operand.hbm [shape: f32[512,256], index: 3, kind: input, shape index: {}]   ;;  %s2725_s4 = inlined_call_operand.vmem [shape: f32[1,256], index: 4, kind: input, shape index: {}]   ;;  %s2726_s5 = inlined_call_operand.hbm [shape: f32[256,256], index: 5, kind: output, shape index: {}]  }
   0x1   :  { %11 = vsyncpa [#allocation6], 0 }
   0x2   :  { %12 = vsyncpa [#allocation4], 0  ;;  %s2140_s18 = smov [#allocation5]   ;;  %s2046_s22 = scalar_lea.hbm %s2722_s1, 16384 }
   0x3   :  { %s30_s19 = sshll.u32 %s2140_s18, 4  ;;  %p2047_p0 = scmp.ne.s32.totalorder %s2722_s1, %s2046_s22  ;;  %s31_s19 = int_to_ptr.vmem [resolvable:$true] %s30_s19 }
   0x4   :  { %p2050_p1 = scmp.lt.u32.totalorder %s2046_s22, %s2722_s1 }
   0x6   :  { %p2052_p2 = pnand %p2050_p1, %p2047_p0 }
   0x8   :  { %2055 = shalt.err (!%p2052_p2)
}
   0x9   :  { %s2056_s27 = scalar_lea.vmem %s31_s19, 16384  ;;  %p2061_p4 = scmp.lt.s32.totalorder %s31_s19, %s31_s19 }
   0xa   :  { %p2057_p3 = scmp.ne.s32.totalorder %s31_s19, %s2056_s27  ;;  %p2062_p5 = scmp.lt.s32.totalorder %s2056_s27, %s2056_s27 }
   0xc   :  { %p2063_p6 = por %p2062_p5, %p2061_p4 }
   0xe   :  { %p2064_p7 = pnand %p2063_p6, %p2057_p3 }
  0x10   :  { %2067 = shalt.err (!%p2064_p7)
}
  0x11   :  { %s2141_s28 = smov 512   ;;  %s2142_s29 = smov 32  }
  0x12   :  { %36 = dma.hbm_to_vmem [thread:$0]  %s2722_s1, 16384, %s31_s19, [#allocation6], %s2141_s28, %s2141_s28, %s2142_s29  }
  0x13   :  { %s2143_s7 = smov [#allocation2]   ;;  %s2068_s11 = scalar_lea.hbm %s2721_s0, 8192 }
  0x14   :  { %s18_s8 = sshll.u32 %s2143_s7, 4  ;;  %p2069_p8 = scmp.ne.s32.totalorder %s2721_s0, %s2068_s11  ;;  %s19_s8 = int_to_ptr.vmem [resolvable:$true] %s18_s8 }
  0x15   :  { %p2072_p9 = scmp.lt.u32.totalorder %s2068_s11, %s2721_s0 }
  0x17   :  { %p2074_p10 = pnand %p2072_p9, %p2069_p8 }
  0x19   :  { %2077 = shalt.err (!%p2074_p10)
}
  0x1a   :  { %s2078_s16 = scalar_lea.vmem %s19_s8, 8192  ;;  %p2083_p12 = scmp.lt.s32.totalorder %s19_s8, %s19_s8 }
  0x1b   :  { %p2079_p11 = scmp.ne.s32.totalorder %s19_s8, %s2078_s16  ;;  %p2084_p13 = scmp.lt.s32.totalorder %s2078_s16, %s2078_s16 }
  0x1d   :  { %p2085_p0 = por %p2084_p13, %p2083_p12 }
  0x1f   :  { %p2086_p1 = pnand %p2085_p0, %p2079_p11 }
  0x21   :  { %2089 = shalt.err (!%p2086_p1)
}
  0x22   :  { %s2144_s1 = smov 256   ;;  %s2145_s17 = smov 16  }
  0x23   :  { %24 = dma.hbm_to_vmem [thread:$0]  %s2721_s0, 8192, %s19_s8, [#allocation3], %s2144_s1, %s2144_s1, %s2145_s17  }
  0x24   :  { %s2146_s20 = smov [#allocation7]   ;;  %s2090_s24 = scalar_lea.hbm %s2724_s3, 16384 }
  0x25   :  { %s44_s21 = sshll.u32 %s2146_s20, 4  ;;  %p2091_p2 = scmp.ne.s32.totalorder %s2724_s3, %s2090_s24  ;;  %s45_s21 = int_to_ptr.vmem [resolvable:$true] %s44_s21 }
  0x26   :  { %p2094_p3 = scmp.lt.u32.totalorder %s2090_s24, %s2724_s3 }
  0x28   :  { %p2096_p4 = pnand %p2094_p3, %p2091_p2 }
  0x2a   :  { %2099 = shalt.err (!%p2096_p4)
}
  0x2b   :  { %s2100_s29 = scalar_lea.vmem %s45_s21, 16384  ;;  %p2105_p6 = scmp.lt.s32.totalorder %s45_s21, %s45_s21 }
  0x2c   :  { %p2101_p5 = scmp.ne.s32.totalorder %s45_s21, %s2100_s29  ;;  %p2106_p7 = scmp.lt.s32.totalorder %s2100_s29, %s2100_s29 }
  0x2e   :  { %p2107_p8 = por %p2106_p7, %p2105_p6 }
  0x30   :  { %p2108_p9 = pnand %p2107_p8, %p2101_p5 }
  0x32   :  { %2111 = shalt.err (!%p2108_p9)
}
  0x33   :  { %50 = dma.hbm_to_vmem [thread:$0]  %s2724_s3, 16384, %s45_s21, [#allocation6], %s2144_s1, %s2144_s1, %s2145_s17  }
  0x34   :  { %2134 = dma.done.wait [#allocation3], 8192  }
  0x35   :  { %2135 = vsyncadd [#allocation3], 4294959104 }
  0x36   :  { %2136 = dma.done.wait [#allocation6], 32768  }
  0x37   :  { %2137 = vsyncadd [#allocation6], 4294934528  ;;  %v63_v0 = vld [vmem:[#allocation5 + $0x8] sm:$0xff]  ;;  %v62_v2 = vld [vmem:[#allocation5] sm:$0xff] }
  0x38   :  { %v67_v1 = vld [vmem:[#allocation5 + $0x28] sm:$0xff]  ;;  %v66_v4 = vld [vmem:[#allocation5 + $0x20] sm:$0xff] }
  0x39   :  { %v1654_v3 = vpack.c.bf16 %v67_v1, %v63_v0  ;;  %v71_v5 = vld [vmem:[#allocation5 + $0x48] sm:$0xff]  ;;  %v1656_v7 = vpack.c.bf16 %v66_v4, %v62_v2  ;;  %v70_v9 = vld [vmem:[#allocation5 + $0x40] sm:$0xff] }
  0x3a   :  { %v75_v6 = vld [vmem:[#allocation5 + $0x68] sm:$0xff]  ;;  %v74_v10 = vld [vmem:[#allocation5 + $0x60] sm:$0xff] }
  0x3b   :  { %v1658_v8 = vpack.c.bf16 %v75_v6, %v71_v5  ;;  %v79_v11 = vld [vmem:[#allocation5 + $0x88] sm:$0xff]  ;;  %1655 = vmatprep.subr.bf16.mxu1 %v1654_v3  ;;  %v1660_v13 = vpack.c.bf16 %v74_v10, %v70_v9  ;;  %v78_v15 = vld [vmem:[#allocation5 + $0x80] sm:$0xff] }
  0x3c   :  { %v83_v12 = vld [vmem:[#allocation5 + $0xa8] sm:$0xff]  ;;  %1657 = vmatpush1.bf16.msra.mxu1 %v1656_v7  ;;  %v82_v16 = vld [vmem:[#allocation5 + $0xa0] sm:$0xff] }
  0x3d   :  { %1659 = vmatprep.subr.bf16.mxu1 %v1658_v8  ;;  %v1662_v14 = vpack.c.bf16 %v83_v12, %v79_v11  ;;  %v87_v17 = vld [vmem:[#allocation5 + $0xc8] sm:$0xff]  ;;  %v1664_v19 = vpack.c.bf16 %v82_v16, %v78_v15  ;;  %v86_v21 = vld [vmem:[#allocation5 + $0xc0] sm:$0xff] }
  0x3e   :  { %v91_v18 = vld [vmem:[#allocation5 + $0xe8] sm:$0xff]  ;;  %v90_v22 = vld [vmem:[#allocation5 + $0xe0] sm:$0xff] }
  0x3f   :  { %v1666_v20 = vpack.c.bf16 %v91_v18, %v87_v17  ;;  %v95_v23 = vld [vmem:[#allocation5 + $0x108] sm:$0xff]  ;;  %v1668_v25 = vpack.c.bf16 %v90_v22, %v86_v21  ;;  %v94_v27 = vld [vmem:[#allocation5 + $0x100] sm:$0xff] }
  0x40   :  { %1661 = vmatpush1.bf16.msra.mxu1 %v1660_v13  ;;  %v99_v24 = vld [vmem:[#allocation5 + $0x128] sm:$0xff]  ;;  %v98_v28 = vld [vmem:[#allocation5 + $0x120] sm:$0xff] }
  0x41   :  { %1663 = vmatprep.subr.bf16.mxu1 %v1662_v14  ;;  %v1670_v26 = vpack.c.bf16 %v99_v24, %v95_v23  ;;  %v103_v29 = vld [vmem:[#allocation5 + $0x148] sm:$0xff]  ;;  %v1672_v31 = vpack.c.bf16 %v98_v28, %v94_v27  ;;  %v102_v33 = vld [vmem:[#allocation5 + $0x140] sm:$0xff] }
  0x42   :  { %v107_v30 = vld [vmem:[#allocation5 + $0x168] sm:$0xff]  ;;  %v106_v34 = vld [vmem:[#allocation5 + $0x160] sm:$0xff] }
  0x43   :  { %v1674_v32 = vpack.c.bf16 %v107_v30, %v103_v29  ;;  %v111_v35 = vld [vmem:[#allocation5 + $0x188] sm:$0xff]  ;;  %v1676_v37 = vpack.c.bf16 %v106_v34, %v102_v33  ;;  %v110_v39 = vld [vmem:[#allocation5 + $0x180] sm:$0xff]  ;;  %v69_v33 = vld [vmem:[#allocation5 + $0x38] sm:$0xff] }
  0x44   :  { %1665 = vmatpush1.bf16.msra.mxu1 %v1664_v19  ;;  %v115_v36 = vld [vmem:[#allocation5 + $0x1a8] sm:$0xff]  ;;  %v114_v40 = vld [vmem:[#allocation5 + $0x1a0] sm:$0xff] }
  0x45   :  { %1667 = vmatprep.subr.bf16.mxu1 %v1666_v20  ;;  %v1678_v38 = vpack.c.bf16 %v115_v36, %v111_v35  ;;  %v2220_v41 = vld [vmem:[#allocation2 + $0x8] sm:$0xff]  ;;  %v1680_v44 = vpack.c.bf16 %v114_v40, %v110_v39  ;;  %v118_v46 = vld [vmem:[#allocation5 + $0x1c0] sm:$0xff]  ;;  %v64_v36 = vld [vmem:[#allocation5 + $0x10] sm:$0xff] }
  0x46   :  { %v119_v42 = vld [vmem:[#allocation5 + $0x1c8] sm:$0xff]  ;;  %340 = vmatprep.mubr.f32.mxu1 %v2220_v41  ;;  %v122_v47 = vld [vmem:[#allocation5 + $0x1e0] sm:$0xff]  ;;  %v77_v39 = vld [vmem:[#allocation5 + $0x78] sm:$0xff] }
  0x47   :  { %v123_v43 = vld [vmem:[#allocation5 + $0x1e8] sm:$0xff]  ;;  %v1684_v50 = vpack.c.bf16 %v122_v47, %v118_v46  ;;  %v126_v52 = vld [vmem:[#allocation5 + $0x200] sm:$0xff]  ;;  %v76_v46 = vld [vmem:[#allocation5 + $0x70] sm:$0xff] }
  0x48   :  { %1669 = vmatpush1.bf16.msra.mxu1 %v1668_v25  ;;  %v1682_v45 = vpack.c.bf16 %v123_v43, %v119_v42  ;;  %v127_v48 = vld [vmem:[#allocation5 + $0x208] sm:$0xff]  ;;  %v130_v53 = vld [vmem:[#allocation5 + $0x220] sm:$0xff]  ;;  %v2225_v43 = vld [vmem:[#allocation2 + $0x18] sm:$0xff] }
  0x49   :  { %1671 = vmatprep.subr.bf16.mxu1 %v1670_v26  ;;  %v131_v49 = vld [vmem:[#allocation5 + $0x228] sm:$0xff]  ;;  %v1688_v56 = vpack.c.bf16 %v130_v53, %v126_v52  ;;  %v134_v58 = vld [vmem:[#allocation5 + $0x240] sm:$0xff]  ;;  %v81_v47 = vld [vmem:[#allocation5 + $0x98] sm:$0xff] }
  0x4a   :  { %v1686_v51 = vpack.c.bf16 %v131_v49, %v127_v48  ;;  %v135_v54 = vld [vmem:[#allocation5 + $0x248] sm:$0xff]  ;;  %v138_v59 = vld [vmem:[#allocation5 + $0x260] sm:$0xff]  ;;  %v85_v48 = vld [vmem:[#allocation5 + $0xb8] sm:$0xff] }
  0x4b   :  { %v139_v55 = vld [vmem:[#allocation5 + $0x268] sm:$0xff]  ;;  %v1692_v62 = vpack.c.bf16 %v138_v59, %v134_v58  ;;  %v142_v0 = vld [vmem:[#allocation5 + $0x280] sm:$0xff]  ;;  %v2229_v49 = vld [vmem:[#allocation2 + $0x10] sm:$0xff]  ;;  %v1726_v52 = vpack.c.bf16 %v85_v48, %v81_v47 }
  0x4c   :  { %1673 = vmatpush1.bf16.msra.mxu1 %v1672_v31  ;;  %v1690_v57 = vpack.c.bf16 %v139_v55, %v135_v54  ;;  %v143_v60 = vld [vmem:[#allocation5 + $0x288] sm:$0xff]  ;;  %v146_v1 = vld [vmem:[#allocation5 + $0x2a0] sm:$0xff]  ;;  %v80_v53 = vld [vmem:[#allocation5 + $0x90] sm:$0xff] }
  0x4d   :  { %1675 = vmatprep.subr.bf16.mxu1 %v1674_v32  ;;  %v147_v61 = vld [vmem:[#allocation5 + $0x2a8] sm:$0xff]  ;;  %v1696_v4 = vpack.c.bf16 %v146_v1, %v142_v0  ;;  %v150_v6 = vld [vmem:[#allocation5 + $0x2c0] sm:$0xff]  ;;  %v65_v32 = vld [vmem:[#allocation5 + $0x18] sm:$0xff] }
  0x4e   :  { %v1694_v63 = vpack.c.bf16 %v147_v61, %v143_v60  ;;  %v151_v2 = vld [vmem:[#allocation5 + $0x2c8] sm:$0xff]  ;;  %v154_v7 = vld [vmem:[#allocation5 + $0x2e0] sm:$0xff]  ;;  %v1718_v35 = vpack.c.bf16 %v69_v33, %v65_v32  ;;  %v84_v54 = vld [vmem:[#allocation5 + $0xb0] sm:$0xff] }
  0x4f   :  { %v155_v3 = vld [vmem:[#allocation5 + $0x2e8] sm:$0xff]  ;;  %v1700_v10 = vpack.c.bf16 %v154_v7, %v150_v6  ;;  %v158_v12 = vld [vmem:[#allocation5 + $0x300] sm:$0xff]  ;;  %v89_v55 = vld [vmem:[#allocation5 + $0xd8] sm:$0xff]  ;;  %v1728_v58 = vpack.c.bf16 %v84_v54, %v80_v53 }
  0x50   :  { %1677 = vmatpush1.bf16.msra.mxu1 %v1676_v37  ;;  %v1698_v5 = vpack.c.bf16 %v155_v3, %v151_v2  ;;  %v159_v8 = vld [vmem:[#allocation5 + $0x308] sm:$0xff]  ;;  %v162_v13 = vld [vmem:[#allocation5 + $0x320] sm:$0xff]  ;;  %v68_v37 = vld [vmem:[#allocation5 + $0x30] sm:$0xff] }
  0x51   :  { %1679 = vmatprep.subr.bf16.mxu1 %v1678_v38  ;;  %v163_v9 = vld [vmem:[#allocation5 + $0x328] sm:$0xff]  ;;  %v1704_v16 = vpack.c.bf16 %v162_v13, %v158_v12  ;;  %v166_v18 = vld [vmem:[#allocation5 + $0x340] sm:$0xff]  ;;  %v73_v38 = vld [vmem:[#allocation5 + $0x58] sm:$0xff]  ;;  %v1720_v42 = vpack.c.bf16 %v68_v37, %v64_v36 }
  0x52   :  { %v1702_v11 = vpack.c.bf16 %v163_v9, %v159_v8  ;;  %v167_v14 = vld [vmem:[#allocation5 + $0x348] sm:$0xff]  ;;  %v170_v19 = vld [vmem:[#allocation5 + $0x360] sm:$0xff]  ;;  %v2237_v59 = vld [vmem:[#allocation2 + $0x38] sm:$0xff] }
  0x53   :  { %v171_v15 = vld [vmem:[#allocation5 + $0x368] sm:$0xff]  ;;  %v1708_v22 = vpack.c.bf16 %v170_v19, %v166_v18  ;;  %v174_v24 = vld [vmem:[#allocation5 + $0x380] sm:$0xff]  ;;  %v88_v61 = vld [vmem:[#allocation5 + $0xd0] sm:$0xff] }
  0x54   :  { %1681 = vmatpush1.bf16.msra.mxu1 %v1680_v44  ;;  %v1706_v17 = vpack.c.bf16 %v171_v15, %v167_v14  ;;  %v175_v20 = vld [vmem:[#allocation5 + $0x388] sm:$0xff]  ;;  %v178_v25 = vld [vmem:[#allocation5 + $0x3a0] sm:$0xff]  ;;  %v1722_v44 = vpack.c.bf16 %v77_v39, %v73_v38  ;;  %v101_v0 = vld [vmem:[#allocation5 + $0x138] sm:$0xff] }
  0x55   :  { %1683 = vmatprep.subr.bf16.mxu1 %v1682_v45  ;;  %v179_v21 = vld [vmem:[#allocation5 + $0x3a8] sm:$0xff]  ;;  %v1712_v28 = vpack.c.bf16 %v178_v25, %v174_v24  ;;  %v182_v30 = vld [vmem:[#allocation5 + $0x3c0] sm:$0xff]  ;;  %v72_v45 = vld [vmem:[#allocation5 + $0x50] sm:$0xff] }
  0x56   :  { %v1710_v23 = vpack.c.bf16 %v179_v21, %v175_v20  ;;  %v183_v26 = vld [vmem:[#allocation5 + $0x3c8] sm:$0xff]  ;;  %v186_v31 = vld [vmem:[#allocation5 + $0x3e0] sm:$0xff]  ;;  %v2241_v1 = vld [vmem:[#allocation2 + $0x30] sm:$0xff] }
  0x57   :  { %v187_v27 = vld [vmem:[#allocation5 + $0x3e8] sm:$0xff]  ;;  %v1716_v34 = vpack.c.bf16 %v186_v31, %v182_v30  ;;  %v2223_v40 = vld [vmem:[#allocation2] sm:$0xff]  ;;  %v100_v6 = vld [vmem:[#allocation5 + $0x130] sm:$0xff] }
  0x58   :  { %1685 = vmatpush1.bf16.msra.mxu1 %v1684_v50  ;;  %v1714_v29 = vpack.c.bf16 %v187_v27, %v183_v26  ;;  %v1724_v50 = vpack.c.bf16 %v76_v46, %v72_v45  ;;  %v2243_v3 = vld [vmem:[#allocation2 + $0x48] sm:$0xff]  ;;  %v105_v7 = vld [vmem:[#allocation5 + $0x158] sm:$0xff]  ;;  %v2247_v9 = vld [vmem:[#allocation2 + $0x40] sm:$0xff] }
  0x59   :  { %1687 = vmatprep.subr.bf16.mxu1 %v1686_v51  ;;  %v2231_v51 = vld [vmem:[#allocation2 + $0x28] sm:$0xff]  ;;  %v109_v8 = vld [vmem:[#allocation5 + $0x178] sm:$0xff]  ;;  %v104_v13 = vld [vmem:[#allocation5 + $0x150] sm:$0xff] }
  0x5a   :  { %v1738_v12 = vpack.c.bf16 %v109_v8, %v105_v7  ;;  %v108_v14 = vld [vmem:[#allocation5 + $0x170] sm:$0xff]  ;;  %v113_v15 = vld [vmem:[#allocation5 + $0x198] sm:$0xff]  ;;  %v2255_v19 = vld [vmem:[#allocation2 + $0x68] sm:$0xff] }
  0x5b   :  { %v1740_v18 = vpack.c.bf16 %v108_v14, %v104_v13  ;;  %v112_v21 = vld [vmem:[#allocation5 + $0x190] sm:$0xff]  ;;  %v125_v24 = vld [vmem:[#allocation5 + $0x1f8] sm:$0xff]  ;;  %v2259_v25 = vld [vmem:[#allocation2 + $0x60] sm:$0xff] }
  0x5c   :  { %1689 = vmatpush1.bf16.msra.mxu1 %v1688_v56  ;;  %v93_v56 = vld [vmem:[#allocation5 + $0xf8] sm:$0xff]  ;;  %v124_v30 = vld [vmem:[#allocation5 + $0x1f0] sm:$0xff]  ;;  %v919_v33 = vld [vmem:[#allocation7 + $0x8] sm:$0xff] }
  0x5d   :  { %1691 = vmatprep.subr.bf16.mxu1 %v1690_v57  ;;  %v2235_v57 = vld [vmem:[#allocation2 + $0x20] sm:$0xff]  ;;  %v1730_v60 = vpack.c.bf16 %v93_v56, %v89_v55  ;;  %v2261_v26 = vld [vmem:[#allocation2 + $0x78] sm:$0xff]  ;;  %v920_v37 = vld [vmem:[#allocation7 + $0x10] sm:$0xff] }
  0x5e   :  { %v129_v31 = vld [vmem:[#allocation5 + $0x218] sm:$0xff]  ;;  %v918_v36 = vld [vmem:[#allocation7] sm:$0xff]  ;;  %v2265_v38 = vld [vmem:[#allocation2 + $0x70] sm:$0xff] }
  0x5f   :  { %v133_v32 = vld [vmem:[#allocation5 + $0x238] sm:$0xff]  ;;  %v2267_v39 = vld [vmem:[#allocation2 + $0x88] sm:$0xff]  ;;  %v128_v46 = vld [vmem:[#allocation5 + $0x210] sm:$0xff] }
  0x60   :  { %1693 = vmatpush1.bf16.msra.mxu1 %v1692_v62  ;;  %v92_v62 = vld [vmem:[#allocation5 + $0xf0] sm:$0xff]  ;;  %v1750_v45 = vpack.c.bf16 %v133_v32, %v129_v31  ;;  %v137_v48 = vld [vmem:[#allocation5 + $0x258] sm:$0xff]  ;;  %v922_v55 = vld [vmem:[#allocation7 + $0x20] sm:$0xff] }
  0x61   :  { %1695 = vmatprep.subr.bf16.mxu1 %v1694_v63  ;;  %v97_v63 = vld [vmem:[#allocation5 + $0x118] sm:$0xff]  ;;  %v1732_v2 = vpack.c.bf16 %v92_v62, %v88_v61  ;;  %v132_v47 = vld [vmem:[#allocation5 + $0x230] sm:$0xff]  ;;  %v2279_v14 = vld [vmem:[#allocation2 + $0xa8] sm:$0xff] }
  0x62   :  { %v925_v53 = vld [vmem:[#allocation7 + $0x38] sm:$0xff]  ;;  %v924_v56 = vld [vmem:[#allocation7 + $0x30] sm:$0xff]  ;;  %v1752_v61 = vpack.c.bf16 %v132_v47, %v128_v46  ;;  %v2283_v31 = vld [vmem:[#allocation2 + $0xa0] sm:$0xff] }
  0x63   :  { %v1788_v62 = vpack.c.bf16 %v924_v56, %v922_v55  ;;  %v929_v7 = vld [vmem:[#allocation7 + $0x58] sm:$0xff]  ;;  %v2277_v13 = vld [vmem:[#allocation2 + $0x90] sm:$0xff] }
  0x64   :  { %1697 = vmatpush1.bf16.msra.mxu1 %v1696_v4  ;;  %v1734_v4 = vpack.c.bf16 %v101_v0, %v97_v63  ;;  %v136_v0 = vld [vmem:[#allocation5 + $0x250] sm:$0xff]  ;;  %v2285_v32 = vld [vmem:[#allocation2 + $0xb8] sm:$0xff] }
  0x65   :  { %1699 = vmatprep.subr.bf16.mxu1 %v1698_v5  ;;  %v96_v5 = vld [vmem:[#allocation5 + $0x110] sm:$0xff]  ;;  %v937_v46 = vld [vmem:[#allocation7 + $0x98] sm:$0xff] }
  0x68   :  { %1701 = vmatpush1.bf16.msra.mxu1 %v1700_v10  ;;  %v1736_v10 = vpack.c.bf16 %v100_v6, %v96_v5  ;;  %v149_v5 = vld [vmem:[#allocation5 + $0x2b8] sm:$0xff]  ;;  %v927_v6 = vld [vmem:[#allocation7 + $0x48] sm:$0xff] }
  0x69   :  { %1703 = vmatprep.subr.bf16.mxu1 %v1702_v11  ;;  %v2249_v11 = vld [vmem:[#allocation2 + $0x58] sm:$0xff]  ;;  %v1790_v8 = vpack.c.bf16 %v929_v7, %v927_v6  ;;  %v938_v6 = vld [vmem:[#allocation7 + $0xa0] sm:$0xff]  ;;  %v940_v7 = vld [vmem:[#allocation7 + $0xb0] sm:$0xff] }
  0x6c   :  { %1705 = vmatpush1.bf16.msra.mxu1 %v1704_v16  ;;  %v117_v16 = vld [vmem:[#allocation5 + $0x1b8] sm:$0xff] }
  0x6d   :  { %1707 = vmatprep.subr.bf16.mxu1 %v1706_v17  ;;  %v2253_v17 = vld [vmem:[#allocation2 + $0x50] sm:$0xff]  ;;  %v1742_v20 = vpack.c.bf16 %v117_v16, %v113_v15 }
  0x70   :  { %1709 = vmatpush1.bf16.msra.mxu1 %v1708_v22  ;;  %v116_v22 = vld [vmem:[#allocation5 + $0x1b0] sm:$0xff] }
  0x71   :  { %1711 = vmatprep.subr.bf16.mxu1 %v1710_v23  ;;  %v121_v23 = vld [vmem:[#allocation5 + $0x1d8] sm:$0xff]  ;;  %v1744_v27 = vpack.c.bf16 %v116_v22, %v112_v21  ;;  %v148_v21 = vld [vmem:[#allocation5 + $0x2b0] sm:$0xff] }
  0x72   :  { %v153_v22 = vld [vmem:[#allocation5 + $0x2d8] sm:$0xff] }
  0x74   :  { %1713 = vmatpush1.bf16.msra.mxu1 %v1712_v28  ;;  %v1746_v28 = vpack.c.bf16 %v125_v24, %v121_v23  ;;  %v157_v23 = vld [vmem:[#allocation5 + $0x2f8] sm:$0xff]  ;;  %v931_v24 = vld [vmem:[#allocation7 + $0x68] sm:$0xff] }
  0x75   :  { %1715 = vmatprep.subr.bf16.mxu1 %v1714_v29  ;;  %v120_v29 = vld [vmem:[#allocation5 + $0x1d0] sm:$0xff] }
  0x78   :  { %1717 = vmatpush1.bf16.msra.mxu1 %v1716_v34  ;;  %v921_v34 = vld [vmem:[#allocation7 + $0x18] sm:$0xff] }
  0x79   :  { %1719 = vmatprep.subr.bf16.mxu1 %v1718_v35  ;;  %v1782_v35 = vpack.c.bf16 %v921_v34, %v919_v33 }
  0x7b   :  { %341 = vmatmul.mubr.f32.vlgmr.msra.gmra.mrb[0].mxu1 %v2223_v40  ;;  %1783 = vmatprep.subr.bf16.mxu0 %v1782_v35  ;;  %v1762_v35 = vpack.c.bf16 %v157_v23, %v153_v22  ;;  %v181_v22 = vld [vmem:[#allocation5 + $0x3b8] sm:$0xff]  ;;  %v943_v23 = vld [vmem:[#allocation7 + $0xc8] sm:$0xff] }
  0x7c   :  { %1721 = vmatpush1.bf16.msra.mxu1 %v1720_v42  ;;  %346 = vmatprep.mubr.f32.mxu1 %v2225_v43  ;;  %v1748_v42 = vpack.c.bf16 %v124_v30, %v120_v29  ;;  %v930_v29 = vld [vmem:[#allocation7 + $0x60] sm:$0xff]  ;;  %v932_v30 = vld [vmem:[#allocation7 + $0x70] sm:$0xff] }
  0x7d   :  { %1723 = vmatprep.subr.bf16.mxu1 %v1722_v44  ;;  %v1784_v44 = vpack.c.bf16 %v920_v37, %v918_v36  ;;  %v1796_v34 = vpack.c.bf16 %v932_v30, %v930_v29  ;;  %v152_v36 = vld [vmem:[#allocation5 + $0x2d0] sm:$0xff] }
  0x7e   :  { %v156_v37 = vld [vmem:[#allocation5 + $0x2f0] sm:$0xff] }
  0x7f   :  { %347 = vmatmul.mubr.f32.gmra.mrb[2].mxu1 %v2229_v49  ;;  %1785 = vmatpush1.bf16.msra.mxu0 %v1784_v44  ;;  %v165_v44 = vld [vmem:[#allocation5 + $0x338] sm:$0xff]  ;;  %v944_v29 = vld [vmem:[#allocation7 + $0xd0] sm:$0xff] }
  0x80   :  { %352 = vmatprep.mubr.f32.mxu1 %v2231_v51  ;;  %1725 = vmatpush1.bf16.msra.mxu1 %v1724_v50  ;;  %v141_v50 = vld [vmem:[#allocation5 + $0x278] sm:$0xff]  ;;  %v2301_v30 = vld [vmem:[#allocation2 + $0xd0] sm:$0xff] }
  0x81   :  { %1727 = vmatprep.subr.bf16.mxu1 %v1726_v52  ;;  %v923_v52 = vld [vmem:[#allocation7 + $0x28] sm:$0xff]  ;;  %v1754_v63 = vpack.c.bf16 %v141_v50, %v137_v48  ;;  %v934_v48 = vld [vmem:[#allocation7 + $0x80] sm:$0xff]  ;;  %v936_v50 = vld [vmem:[#allocation7 + $0x90] sm:$0xff] }
  0x82   :  { %v1786_v54 = vpack.c.bf16 %v925_v53, %v923_v52  ;;  %v2289_v52 = vld [vmem:[#allocation2 + $0xb0] sm:$0xff]  ;;  %v2291_v53 = vld [vmem:[#allocation2 + $0xc8] sm:$0xff]  ;;  %v1800_v55 = vpack.c.bf16 %v936_v50, %v934_v48  ;;  %v946_v50 = vld [vmem:[#allocation7 + $0xe0] sm:$0xff] }
  0x83   :  { %353 = vmatmul.mubr.f32.gmra.mrb[4].mxu1 %v2235_v57 }
  0x84   :  { %358 = vmatprep.mubr.f32.mxu1 %v2237_v59  ;;  %1729 = vmatpush1.bf16.msra.mxu1 %v1728_v58  ;;  %v2271_v58 = vld [vmem:[#allocation2 + $0x80] sm:$0xff] }
  0x85   :  { %1731 = vmatprep.subr.bf16.mxu1 %v1730_v60  ;;  %v2273_v60 = vld [vmem:[#allocation2 + $0x98] sm:$0xff]  ;;  %1787 = vmatprep.subr.bf16.mxu0 %v1786_v54  ;;  %v1764_v54 = vpack.c.bf16 %v156_v37, %v152_v36  ;;  %v176_v37 = vld [vmem:[#allocation5 + $0x390] sm:$0xff] }
  0x86   :  { %1789 = vmatpush1.bf16.msra.mxu0 %v1788_v62  ;;  %v164_v62 = vld [vmem:[#allocation5 + $0x330] sm:$0xff] }
  0x87   :  { %359 = vmatmul.mubr.f32.gmra.mrb[6].mxu1 %v2241_v1  ;;  %1791 = vmatprep.subr.bf16.mxu0 %v1790_v8  ;;  %v2295_v8 = vld [vmem:[#allocation2 + $0xc0] sm:$0xff] }
  0x88   :  { %364 = vmatprep.mubr.f32.mxu1 %v2243_v3  ;;  %1733 = vmatpush1.bf16.msra.mxu1 %v1732_v2  ;;  %v140_v2 = vld [vmem:[#allocation5 + $0x270] sm:$0xff] }
  0x89   :  { %1735 = vmatprep.subr.bf16.mxu1 %v1734_v4  ;;  %v145_v4 = vld [vmem:[#allocation5 + $0x298] sm:$0xff]  ;;  %v1756_v15 = vpack.c.bf16 %v140_v2, %v136_v0  ;;  %v939_v2 = vld [vmem:[#allocation7 + $0xa8] sm:$0xff] }
  0x8a   :  { %v173_v0 = vld [vmem:[#allocation5 + $0x378] sm:$0xff] }
  0x8b   :  { %365 = vmatmul.mubr.f32.gmra.mrb[8].mxu1 %v2247_v9 }
  0x8c   :  { %370 = vmatprep.mubr.f32.mxu1 %v2249_v11  ;;  %1737 = vmatpush1.bf16.msra.mxu1 %v1736_v10  ;;  %v926_v10 = vld [vmem:[#allocation7 + $0x40] sm:$0xff] }
  0x8d   :  { %1739 = vmatprep.subr.bf16.mxu1 %v1738_v12  ;;  %v928_v12 = vld [vmem:[#allocation7 + $0x50] sm:$0xff] }
  0x8e   :  { %v1792_v16 = vpack.c.bf16 %v928_v12, %v926_v10  ;;  %v2297_v10 = vld [vmem:[#allocation2 + $0xd8] sm:$0xff] }
  0x8f   :  { %371 = vmatmul.mubr.f32.gmra.mrb[10].mxu1 %v2253_v17 }
  0x90   :  { %376 = vmatprep.mubr.f32.mxu1 %v2255_v19  ;;  %1741 = vmatpush1.bf16.msra.mxu1 %v1740_v18  ;;  %v1758_v18 = vpack.c.bf16 %v149_v5, %v145_v4  ;;  %v941_v4 = vld [vmem:[#allocation7 + $0xb8] sm:$0xff] }
  0x91   :  { %1743 = vmatprep.subr.bf16.mxu1 %v1742_v20  ;;  %v144_v20 = vld [vmem:[#allocation5 + $0x290] sm:$0xff]  ;;  %1793 = vmatpush1.bf16.msra.mxu0 %v1792_v16  ;;  %v1802_v5 = vpack.c.bf16 %v941_v4, %v939_v2  ;;  %v951_v4 = vld [vmem:[#allocation7 + $0x108] sm:$0xff] }
  0x92   :  { %v1760_v33 = vpack.c.bf16 %v148_v21, %v144_v20  ;;  %v172_v20 = vld [vmem:[#allocation5 + $0x370] sm:$0xff]  ;;  %v177_v21 = vld [vmem:[#allocation5 + $0x398] sm:$0xff] }
  0x93   :  { %377 = vmatmul.mubr.f32.gmra.mrb[12].mxu1 %v2259_v25  ;;  %v1774_v36 = vpack.c.bf16 %v181_v22, %v177_v21  ;;  %v188_v2 = vld [vmem:[#allocation5 + $0x3f0] sm:$0xff]  ;;  %v955_v21 = vld [vmem:[#allocation7 + $0x128] sm:$0xff]  ;;  %v957_v22 = vld [vmem:[#allocation7 + $0x138] sm:$0xff] }
  0x94   :  { %382 = vmatprep.mubr.f32.mxu1 %v2261_v26  ;;  %1745 = vmatpush1.bf16.msra.mxu1 %v1744_v27  ;;  %v933_v27 = vld [vmem:[#allocation7 + $0x78] sm:$0xff] }
  0x95   :  { %1747 = vmatprep.subr.bf16.mxu1 %v1746_v28  ;;  %v1794_v28 = vpack.c.bf16 %v933_v27, %v931_v24  ;;  %v945_v24 = vld [vmem:[#allocation7 + $0xd8] sm:$0xff] }
  0x96   :  { %v1806_v27 = vpack.c.bf16 %v945_v24, %v943_v23  ;;  %v1818_v23 = vpack.c.bf16 %v957_v22, %v955_v21  ;;  %v954_v24 = vld [vmem:[#allocation7 + $0x120] sm:$0xff]  ;;  %v2339_v21 = vld [vmem:[#allocation2 + $0x148] sm:$0xff] }
  0x97   :  { %383 = vmatmul.mubr.f32.gmra.mrb[14].mxu1 %v2265_v38  ;;  %1795 = vmatprep.subr.bf16.mxu0 %v1794_v28  ;;  %v942_v28 = vld [vmem:[#allocation7 + $0xc0] sm:$0xff]  ;;  %v971_v22 = vld [vmem:[#allocation7 + $0x1a8] sm:$0xff] }
  0x98   :  { %388 = vmatprep.mubr.f32.mxu1 %v2267_v39  ;;  %1749 = vmatpush1.bf16.msra.mxu1 %v1748_v42  ;;  %v161_v42 = vld [vmem:[#allocation5 + $0x318] sm:$0xff] }
  0x99   :  { %1751 = vmatprep.subr.bf16.mxu1 %v1750_v45  ;;  %1797 = vmatpush1.bf16.msra.mxu0 %v1796_v34  ;;  %v935_v45 = vld [vmem:[#allocation7 + $0x88] sm:$0xff]  ;;  %v1766_v56 = vpack.c.bf16 %v165_v44, %v161_v42  ;;  %v180_v42 = vld [vmem:[#allocation5 + $0x3b0] sm:$0xff]  ;;  %v185_v44 = vld [vmem:[#allocation5 + $0x3d8] sm:$0xff] }
  0x9a   :  { %v1798_v47 = vpack.c.bf16 %v937_v46, %v935_v45  ;;  %v189_v45 = vld [vmem:[#allocation5 + $0x3f8] sm:$0xff]  ;;  %v947_v46 = vld [vmem:[#allocation7 + $0xe8] sm:$0xff] }
  0x9b   :  { %389 = vmatmul.mubr.f32.gmra.mrb[16].mxu1 %v2271_v58 }
  0x9c   :  { %394 = vmatprep.mubr.f32.mxu1 %v2273_v60  ;;  %1753 = vmatpush1.bf16.msra.mxu1 %v1752_v61  ;;  %v160_v61 = vld [vmem:[#allocation5 + $0x310] sm:$0xff] }
  0x9d   :  { %1755 = vmatprep.subr.bf16.mxu1 %v1754_v63  ;;  %v169_v63 = vld [vmem:[#allocation5 + $0x358] sm:$0xff]  ;;  %1799 = vmatprep.subr.bf16.mxu0 %v1798_v47  ;;  %v1768_v12 = vpack.c.bf16 %v164_v62, %v160_v61 }
  0x9e   :  { %1801 = vmatpush1.bf16.msra.mxu0 %v1800_v55  ;;  %v1770_v16 = vpack.c.bf16 %v173_v0, %v169_v63  ;;  %v949_v47 = vld [vmem:[#allocation7 + $0xf8] sm:$0xff]  ;;  %v2307_v55 = vld [vmem:[#allocation2 + $0xe0] sm:$0xff]  ;;  %v1778_v63 = vpack.c.bf16 %v189_v45, %v185_v44  ;;  %v184_v0 = vld [vmem:[#allocation5 + $0x3d0] sm:$0xff] }
  0x9f   :  { %395 = vmatmul.mubr.f32.gmra.mrb[18].mxu1 %v2277_v13  ;;  %1803 = vmatprep.subr.bf16.mxu0 %v1802_v5  ;;  %v1810_v48 = vpack.c.bf16 %v949_v47, %v947_v46  ;;  %v2309_v62 = vld [vmem:[#allocation2 + $0xf8] sm:$0xff]  ;;  %v960_v44 = vld [vmem:[#allocation7 + $0x150] sm:$0xff]  ;;  %v2327_v47 = vld [vmem:[#allocation2 + $0x128] sm:$0xff] }
  0xa0   :  { %400 = vmatprep.mubr.f32.mxu1 %v2279_v14  ;;  %1757 = vmatpush1.bf16.msra.mxu1 %v1756_v15  ;;  %v1804_v15 = vpack.c.bf16 %v940_v7, %v938_v6  ;;  %v953_v5 = vld [vmem:[#allocation7 + $0x118] sm:$0xff]  ;;  %v950_v7 = vld [vmem:[#allocation7 + $0x100] sm:$0xff]  ;;  %v2325_v45 = vld [vmem:[#allocation2 + $0x110] sm:$0xff] }
  0xa1   :  { %1759 = vmatprep.subr.bf16.mxu1 %v1758_v18  ;;  %v168_v18 = vld [vmem:[#allocation5 + $0x350] sm:$0xff]  ;;  %v1814_v6 = vpack.c.bf16 %v953_v5, %v951_v4  ;;  %v967_v4 = vld [vmem:[#allocation7 + $0x188] sm:$0xff]  ;;  %v969_v5 = vld [vmem:[#allocation7 + $0x198] sm:$0xff] }
  0xa2   :  { %1805 = vmatpush1.bf16.msra.mxu0 %v1804_v15  ;;  %v1772_v34 = vpack.c.bf16 %v172_v20, %v168_v18  ;;  %v2313_v15 = vld [vmem:[#allocation2 + $0xf0] sm:$0xff]  ;;  %v2315_v20 = vld [vmem:[#allocation2 + $0x108] sm:$0xff] }
  0xa3   :  { %401 = vmatmul.mubr.f32.gmra.mrb[20].mxu1 %v2283_v31  ;;  %1807 = vmatprep.subr.bf16.mxu0 %v1806_v27  ;;  %v956_v27 = vld [vmem:[#allocation7 + $0x130] sm:$0xff] }
  0xa4   :  { %406 = vmatprep.mubr.f32.mxu1 %v2285_v32  ;;  %1761 = vmatpush1.bf16.msra.mxu1 %v1760_v33  ;;  %v2303_v33 = vld [vmem:[#allocation2 + $0xe8] sm:$0xff] }
  0xa5   :  { %1763 = vmatprep.subr.bf16.mxu1 %v1762_v35  ;;  %v1808_v35 = vpack.c.bf16 %v944_v29, %v942_v28  ;;  %v2319_v28 = vld [vmem:[#allocation2 + $0x100] sm:$0xff]  ;;  %v1820_v29 = vpack.c.bf16 %v956_v27, %v954_v24 }
  0xa6   :  { %v970_v27 = vld [vmem:[#allocation7 + $0x1a0] sm:$0xff] }
  0xa7   :  { %407 = vmatmul.mubr.f32.gmra.mrb[22].mxu1 %v2289_v52  ;;  %1809 = vmatpush1.bf16.msra.mxu0 %v1808_v35  ;;  %v959_v35 = vld [vmem:[#allocation7 + $0x148] sm:$0xff] }
  0xa8   :  { %412 = vmatprep.mubr.f32.mxu1 %v2291_v53  ;;  %1765 = vmatpush1.bf16.msra.mxu1 %v1764_v54  ;;  %v948_v54 = vld [vmem:[#allocation7 + $0xf0] sm:$0xff] }
  0xa9   :  { %1767 = vmatprep.subr.bf16.mxu1 %v1766_v56  ;;  %v1776_v56 = vpack.c.bf16 %v180_v42, %v176_v37  ;;  %v1812_v61 = vpack.c.bf16 %v948_v54, %v946_v50  ;;  %1811 = vmatprep.subr.bf16.mxu0 %v1810_v48  ;;  %v958_v42 = vld [vmem:[#allocation7 + $0x140] sm:$0xff]  ;;  %v963_v48 = vld [vmem:[#allocation7 + $0x168] sm:$0xff]  ;;  %v965_v50 = vld [vmem:[#allocation7 + $0x178] sm:$0xff] }
  0xaa   :  { %v1824_v46 = vpack.c.bf16 %v960_v44, %v958_v42  ;;  %v1826_v54 = vpack.c.bf16 %v965_v50, %v963_v48  ;;  %v975_v42 = vld [vmem:[#allocation7 + $0x1c8] sm:$0xff]  ;;  %v977_v44 = vld [vmem:[#allocation7 + $0x1d8] sm:$0xff]  ;;  %v974_v48 = vld [vmem:[#allocation7 + $0x1c0] sm:$0xff] }
  0xab   :  { %413 = vmatmul.mubr.f32.gmra.mrb[24].mxu1 %v2295_v8  ;;  %1813 = vmatpush1.bf16.msra.mxu0 %v1812_v61  ;;  %v964_v61 = vld [vmem:[#allocation7 + $0x170] sm:$0xff] }
  0xac   :  { %418 = vmatprep.mubr.f32.mxu1 %v2297_v10  ;;  %1769 = vmatpush1.bf16.msra.mxu1 %v1768_v12  ;;  %v952_v12 = vld [vmem:[#allocation7 + $0x110] sm:$0xff] }
  0xad   :  { %1771 = vmatprep.subr.bf16.mxu1 %v1770_v16  ;;  %v1780_v16 = vpack.c.bf16 %v188_v2, %v184_v0  ;;  %v1816_v18 = vpack.c.bf16 %v952_v12, %v950_v7  ;;  %1815 = vmatprep.subr.bf16.mxu0 %v1814_v6  ;;  %v2333_v2 = vld [vmem:[#allocation2 + $0x138] sm:$0xff]  ;;  %v1830_v6 = vpack.c.bf16 %v969_v5, %v967_v4  ;;  %v966_v7 = vld [vmem:[#allocation7 + $0x180] sm:$0xff]  ;;  %v968_v12 = vld [vmem:[#allocation7 + $0x190] sm:$0xff] }
  0xae   :  { %v976_v50 = vld [vmem:[#allocation7 + $0x1d0] sm:$0xff]  ;;  %v981_v4 = vld [vmem:[#allocation7 + $0x1f8] sm:$0xff] }
  0xaf   :  { %419 = vmatmul.mubr.f32.gmra.mrb[26].mxu1 %v2301_v30  ;;  %1817 = vmatpush1.bf16.msra.mxu0 %v1816_v18  ;;  %v1832_v18 = vpack.c.bf16 %v968_v12, %v966_v7  ;;  %v980_v7 = vld [vmem:[#allocation7 + $0x1f0] sm:$0xff]  ;;  %v2355_v12 = vld [vmem:[#allocation2 + $0x160] sm:$0xff] }
  0xb0   :  { %424 = vmatprep.mubr.f32.mxu1 %v2303_v33  ;;  %1773 = vmatpush1.bf16.msra.mxu1 %v1772_v34  ;;  %v2321_v34 = vld [vmem:[#allocation2 + $0x118] sm:$0xff] }
  0xb1   :  { %1775 = vmatprep.subr.bf16.mxu1 %v1774_v36  ;;  %1819 = vmatprep.subr.bf16.mxu0 %v1818_v23  ;;  %v961_v36 = vld [vmem:[#allocation7 + $0x158] sm:$0xff] }
  0xb2   :  { %v1822_v37 = vpack.c.bf16 %v961_v36, %v959_v35  ;;  %v973_v23 = vld [vmem:[#allocation7 + $0x1b8] sm:$0xff]  ;;  %v2343_v35 = vld [vmem:[#allocation2 + $0x140] sm:$0xff] }
  0xb3   :  { %425 = vmatmul.mubr.f32.gmra.mrb[28].mxu1 %v2307_v55  ;;  %1821 = vmatpush1.bf16.msra.mxu0 %v1820_v29  ;;  %v1834_v24 = vpack.c.bf16 %v973_v23, %v971_v22  ;;  %v972_v29 = vld [vmem:[#allocation7 + $0x1b0] sm:$0xff]  ;;  %v2357_v22 = vld [vmem:[#allocation2 + $0x178] sm:$0xff] }
  0xb4   :  { %430 = vmatprep.mubr.f32.mxu1 %v2309_v62  ;;  %1777 = vmatpush1.bf16.msra.mxu1 %v1776_v56  ;;  %v962_v56 = vld [vmem:[#allocation7 + $0x160] sm:$0xff]  ;;  %v1836_v36 = vpack.c.bf16 %v972_v29, %v970_v27  ;;  %v2361_v23 = vld [vmem:[#allocation2 + $0x170] sm:$0xff]  ;;  %v983_v27 = vld [vmem:[#allocation7 + $0x208] sm:$0xff] }
  0xb5   :  { %1779 = vmatprep.subr.bf16.mxu1 %v1778_v63  ;;  %1823 = vmatprep.subr.bf16.mxu0 %v1822_v37  ;;  %v2331_v63 = vld [vmem:[#allocation2 + $0x120] sm:$0xff]  ;;  %v1828_v0 = vpack.c.bf16 %v964_v61, %v962_v56  ;;  %v2345_v37 = vld [vmem:[#allocation2 + $0x158] sm:$0xff]  ;;  %v1840_v56 = vpack.c.bf16 %v976_v50, %v974_v48  ;;  %v2351_v61 = vld [vmem:[#allocation2 + $0x168] sm:$0xff] }
  0xb6   :  { %v985_v29 = vld [vmem:[#allocation7 + $0x218] sm:$0xff]  ;;  %v2375_v48 = vld [vmem:[#allocation2 + $0x1a8] sm:$0xff]  ;;  %v2379_v50 = vld [vmem:[#allocation2 + $0x1a0] sm:$0xff] }
  0xb7   :  { %431 = vmatmul.mubr.f32.gmra.mrb[30].mxu1 %v2313_v15  ;;  %1825 = vmatpush1.bf16.msra.mxu0 %v1824_v46  ;;  %v1838_v46 = vpack.c.bf16 %v977_v44, %v975_v42  ;;  %v2367_v42 = vld [vmem:[#allocation2 + $0x180] sm:$0xff]  ;;  %v2369_v44 = vld [vmem:[#allocation2 + $0x198] sm:$0xff] }
  0xb8   :  { %436 = vmatprep.mubr.f32.mxu1 %v2315_v20  ;;  %1781 = vmatpush1.bf16.msra.mxu1 %v1780_v16  ;;  %v2337_v16 = vld [vmem:[#allocation2 + $0x130] sm:$0xff] }
  0xb9   :  { %1827 = vmatprep.subr.bf16.mxu0 %v1826_v54  ;;  %v2349_v54 = vld [vmem:[#allocation2 + $0x150] sm:$0xff] }
  0xbb   :  { %437 = vmatmul.mubr.f32.gmra.mrb[32].mxu1 %v2319_v28  ;;  %1829 = vmatpush1.bf16.msra.mxu0 %v1828_v0  ;;  %v979_v0 = vld [vmem:[#allocation7 + $0x1e8] sm:$0xff] }
  0xbc   :  { %442 = vmatprep.mubr.f32.mxu1 %v2321_v34  ;;  %1831 = vmatprep.subr.bf16.mxu0 %v1830_v6  ;;  %v1842_v5 = vpack.c.bf16 %v981_v4, %v979_v0  ;;  %v978_v6 = vld [vmem:[#allocation7 + $0x1e0] sm:$0xff]  ;;  %v2385_v0 = vld [vmem:[#allocation2 + $0x1b0] sm:$0xff]  ;;  %v2387_v4 = vld [vmem:[#allocation2 + $0x1c8] sm:$0xff] }
  0xbf   :  { %443 = vmatmul.mubr.f32.gmra.mrb[34].mxu1 %v2325_v45  ;;  %1833 = vmatpush1.bf16.msra.mxu0 %v1832_v18  ;;  %v1844_v18 = vpack.c.bf16 %v980_v7, %v978_v6  ;;  %v2393_v6 = vld [vmem:[#allocation2 + $0x1d8] sm:$0xff]  ;;  %v2397_v7 = vld [vmem:[#allocation2 + $0x1d0] sm:$0xff] }
  0xc0   :  { %448 = vmatprep.mubr.f32.mxu1 %v2327_v47  ;;  %1835 = vmatprep.subr.bf16.mxu0 %v1834_v24  ;;  %v2363_v24 = vld [vmem:[#allocation2 + $0x188] sm:$0xff] }
  0xc3   :  { %449 = vmatmul.mubr.f32.gmra.mrb[36].mxu1 %v2331_v63  ;;  %1837 = vmatpush1.bf16.msra.mxu0 %v1836_v36  ;;  %v1846_v36 = vpack.c.bf16 %v985_v29, %v983_v27  ;;  %v2403_v27 = vld [vmem:[#allocation2 + $0x1e0] sm:$0xff]  ;;  %v2405_v29 = vld [vmem:[#allocation2 + $0x1f8] sm:$0xff] }
  0xc4   :  { %454 = vmatprep.mubr.f32.mxu1 %v2333_v2  ;;  %1839 = vmatprep.subr.bf16.mxu0 %v1838_v46  ;;  %v2373_v46 = vld [vmem:[#allocation2 + $0x190] sm:$0xff] }
  0xc7   :  { %455 = vmatmul.mubr.f32.gmra.mrb[38].mxu1 %v2337_v16  ;;  %1841 = vmatpush1.bf16.msra.mxu0 %v1840_v56  ;;  %v2381_v56 = vld [vmem:[#allocation2 + $0x1b8] sm:$0xff] }
  0xc8   :  { %460 = vmatprep.mubr.f32.mxu1 %v2339_v21  ;;  %1843 = vmatprep.subr.bf16.mxu0 %v1842_v5  ;;  %v2391_v5 = vld [vmem:[#allocation2 + $0x1c0] sm:$0xff] }
  0xcb   :  { %461 = vmatmul.mubr.f32.gmra.mrb[40].mxu1 %v2343_v35  ;;  %1845 = vmatpush1.bf16.msra.mxu0 %v1844_v18  ;;  %v2399_v18 = vld [vmem:[#allocation2 + $0x1e8] sm:$0xff] }
  0xcc   :  { %466 = vmatprep.mubr.f32.mxu1 %v2345_v37  ;;  %1847 = vmatprep.subr.bf16.mxu0 %v1846_v36  ;;  %v2409_v36 = vld [vmem:[#allocation2 + $0x1f0] sm:$0xff] }
  0xcf   :  { %467 = vmatmul.mubr.f32.gmra.mrb[42].mxu1 %v2349_v54 }
  0xd0   :  { %472 = vmatprep.mubr.f32.mxu1 %v2351_v61 }
  0xd3   :  { %473 = vmatmul.mubr.f32.gmra.mrb[44].mxu1 %v2355_v12 }
  0xd4   :  { %478 = vmatprep.mubr.f32.mxu1 %v2357_v22 }
  0xd7   :  { %479 = vmatmul.mubr.f32.gmra.mrb[46].mxu1 %v2361_v23 }
  0xd8   :  { %484 = vmatprep.mubr.f32.mxu1 %v2363_v24 }
  0xdb   :  { %485 = vmatmul.mubr.f32.gmra.mrb[48].mxu1 %v2367_v42 }
  0xdc   :  { %490 = vmatprep.mubr.f32.mxu1 %v2369_v44 }
  0xdf   :  { %491 = vmatmul.mubr.f32.gmra.mrb[50].mxu1 %v2373_v46 }
  0xe0   :  { %496 = vmatprep.mubr.f32.mxu1 %v2375_v48 }
  0xe3   :  { %497 = vmatmul.mubr.f32.gmra.mrb[52].mxu1 %v2379_v50 }
  0xe4   :  { %502 = vmatprep.mubr.f32.mxu1 %v2381_v56 }
  0xe7   :  { %503 = vmatmul.mubr.f32.gmra.mrb[54].mxu1 %v2385_v0 }
  0xe8   :  { %508 = vmatprep.mubr.f32.mxu1 %v2387_v4 }
  0xeb   :  { %509 = vmatmul.mubr.f32.gmra.mrb[56].mxu1 %v2391_v5 }
  0xec   :  { %514 = vmatprep.mubr.f32.mxu1 %v2393_v6 }
  0xef   :  { %515 = vmatmul.mubr.f32.gmra.mrb[58].mxu1 %v2397_v7 }
  0xf0   :  { %520 = vmatprep.mubr.f32.mxu1 %v2399_v18 }
  0xf3   :  { %521 = vmatmul.mubr.f32.gmra.mrb[60].mxu1 %v2403_v27 }
  0xf4   :  { %526 = vmatprep.mubr.f32.mxu1 %v2405_v29 }
  0xf7   :  { %527 = vmatmul.mubr.f32.gmra.mrb[62].mxu1 %v2409_v36 }
  0xf8   :  { %597 = vmatprep.mubr.f32.mxu1 %v2220_v41  ;;  %v256_v41 = vlaneseq }
  0xfb   :  { %598 = vmatmul.mubr.f32.vlgmr.msra.gmra.mrb[64].mxu1 %v2223_v40  ;;  %v2450_v40 = vshrl.u32 %v256_v41, 7 }
  0xfc   :  { %603 = vmatprep.mubr.f32.mxu1 %v2225_v43 }
  0xfd   :  { %v258_v43 = vsub.s32 0, %v2450_v40 }
  0xff   :  { %604 = vmatmul.mubr.f32.gmra.mrb[66].mxu1 %v2229_v49  ;;  %v2459_v49 = vld [vmem:[%s2723_s2] sm:$0xf] }
 0x100   :  { %609 = vmatprep.mubr.f32.mxu1 %v2231_v51  ;;  %v262_v51 = vsub.s32 1, %v2450_v40 }
 0x103   :  { %610 = vmatmul.mubr.f32.gmra.mrb[68].mxu1 %v2235_v57  ;;  %v2466_v57 = vrot.slane %v2459_v49, %v258_v43 }
 0x104   :  { %615 = vmatprep.mubr.f32.mxu1 %v2237_v59  ;;  %v2472_v59 = vrot.slane %v2459_v49, %v262_v51 }
 0x107   :  { %616 = vmatmul.mubr.f32.gmra.mrb[70].mxu1 %v2241_v1 }
 0x108   :  { %621 = vmatprep.mubr.f32.mxu1 %v2243_v3 }
 0x10b   :  { %622 = vmatmul.mubr.f32.gmra.mrb[72].mxu1 %v2247_v9 }
 0x10c   :  { %627 = vmatprep.mubr.f32.mxu1 %v2249_v11  ;;  %v982_v11 = vld [vmem:[#allocation7 + $0x200] sm:$0xff] }
 0x10f   :  { %628 = vmatmul.mubr.f32.gmra.mrb[74].mxu1 %v2253_v17  ;;  %v984_v17 = vld [vmem:[#allocation7 + $0x210] sm:$0xff] }
 0x110   :  { %633 = vmatprep.mubr.f32.mxu1 %v2255_v19 }
 0x113   :  { %634 = vmatmul.mubr.f32.gmra.mrb[76].mxu1 %v2259_v25  ;;  %v987_v25 = vld [vmem:[#allocation7 + $0x228] sm:$0xff] }
 0x114   :  { %639 = vmatprep.mubr.f32.mxu1 %v2261_v26  ;;  %v989_v26 = vld [vmem:[#allocation7 + $0x238] sm:$0xff] }
 0x117   :  { %640 = vmatmul.mubr.f32.gmra.mrb[78].mxu1 %v2265_v38 }
 0x118   :  { %645 = vmatprep.mubr.f32.mxu1 %v2267_v39 }
 0x11b   :  { %646 = vmatmul.mubr.f32.gmra.mrb[80].mxu1 %v2271_v58  ;;  %v1848_v58 = vpack.c.bf16 %v984_v17, %v982_v11 }
 0x11c   :  { %651 = vmatprep.mubr.f32.mxu1 %v2273_v60 }
 0x11f   :  { %652 = vmatmul.mubr.f32.gmra.mrb[82].mxu1 %v2277_v13 }
 0x120   :  { %657 = vmatprep.mubr.f32.mxu1 %v2279_v14 }
 0x123   :  { %658 = vmatmul.mubr.f32.gmra.mrb[84].mxu1 %v2283_v31  ;;  %v1850_v31 = vpack.c.bf16 %v989_v26, %v987_v25  ;;  %v998_v26 = vld [vmem:[#allocation7 + $0x280] sm:$0xff] }
 0x124   :  { %663 = vmatprep.mubr.f32.mxu1 %v2285_v32  ;;  %v986_v32 = vld [vmem:[#allocation7 + $0x220] sm:$0xff] }
 0x127   :  { %664 = vmatmul.mubr.f32.gmra.mrb[86].mxu1 %v2289_v52  ;;  %v988_v52 = vld [vmem:[#allocation7 + $0x230] sm:$0xff] }
 0x128   :  { %669 = vmatprep.mubr.f32.mxu1 %v2291_v53 }
 0x12b   :  { %670 = vmatmul.mubr.f32.gmra.mrb[88].mxu1 %v2295_v8  ;;  %v991_v8 = vld [vmem:[#allocation7 + $0x248] sm:$0xff] }
 0x12c   :  { %675 = vmatprep.mubr.f32.mxu1 %v2297_v10  ;;  %v993_v10 = vld [vmem:[#allocation7 + $0x258] sm:$0xff] }
 0x12f   :  { %676 = vmatmul.mubr.f32.gmra.mrb[90].mxu1 %v2301_v30 }
 0x130   :  { %681 = vmatprep.mubr.f32.mxu1 %v2303_v33 }
 0x133   :  { %682 = vmatmul.mubr.f32.gmra.mrb[92].mxu1 %v2307_v55  ;;  %v1852_v55 = vpack.c.bf16 %v988_v52, %v986_v32 }
 0x134   :  { %687 = vmatprep.mubr.f32.mxu1 %v2309_v62 }
 0x137   :  { %688 = vmatmul.mubr.f32.gmra.mrb[94].mxu1 %v2313_v15 }
 0x138   :  { %693 = vmatprep.mubr.f32.mxu1 %v2315_v20 }
 0x13b   :  { %694 = vmatmul.mubr.f32.gmra.mrb[96].mxu1 %v2319_v28  ;;  %v1854_v28 = vpack.c.bf16 %v993_v10, %v991_v8  ;;  %v1004_v8 = vld [vmem:[#allocation7 + $0x2b0] sm:$0xff] }
 0x13c   :  { %699 = vmatprep.mubr.f32.mxu1 %v2321_v34  ;;  %v990_v34 = vld [vmem:[#allocation7 + $0x240] sm:$0xff] }
 0x13f   :  { %700 = vmatmul.mubr.f32.gmra.mrb[98].mxu1 %v2325_v45  ;;  %v992_v45 = vld [vmem:[#allocation7 + $0x250] sm:$0xff] }
 0x140   :  { %705 = vmatprep.mubr.f32.mxu1 %v2327_v47 }
 0x143   :  { %706 = vmatmul.mubr.f32.gmra.mrb[100].mxu1 %v2331_v63  ;;  %v995_v63 = vld [vmem:[#allocation7 + $0x268] sm:$0xff] }
 0x144   :  { %711 = vmatprep.mubr.f32.mxu1 %v2333_v2  ;;  %v997_v2 = vld [vmem:[#allocation7 + $0x278] sm:$0xff] }
 0x147   :  { %712 = vmatmul.mubr.f32.gmra.mrb[102].mxu1 %v2337_v16 }
 0x148   :  { %717 = vmatprep.mubr.f32.mxu1 %v2339_v21 }
 0x14b   :  { %718 = vmatmul.mubr.f32.gmra.mrb[104].mxu1 %v2343_v35  ;;  %v1856_v35 = vpack.c.bf16 %v992_v45, %v990_v34  ;;  %v1006_v34 = vld [vmem:[#allocation7 + $0x2c0] sm:$0xff]  ;;  %v1008_v45 = vld [vmem:[#allocation7 + $0x2d0] sm:$0xff] }
 0x14c   :  { %723 = vmatprep.mubr.f32.mxu1 %v2345_v37 }
 0x14e   :  { %v342_v1 = vpop.f32.mrb[0].mxu1 }
 0x14f   :  { %v343_v3 = vadd.f32 %v342_v1, %v2466_v57  ;;  %v344_v9 = vpop.f32.mrb[1].mxu1  ;;  %724 = vmatmul.mubr.f32.gmra.mrb[106].mxu1 %v2349_v54  ;;  %v1001_v1 = vld [vmem:[#allocation7 + $0x298] sm:$0xff] }
 0x150   :  { %729 = vmatprep.mubr.f32.mxu1 %v2351_v61  ;;  %v345_v19 = vadd.f32 %v344_v9, %v2472_v59 }
 0x151   :  { %v790_v60 = vmax.f32 %v343_v3, 0.0 }
 0x152   :  { %v348_v38 = vpop.f32.mrb[2].mxu1  ;;  %v791_v39 = vmax.f32 %v345_v19, 0.0 }
 0x153   :  { %v349_v13 = vadd.f32 %v348_v38, %v2466_v57  ;;  %v350_v14 = vpop.f32.mrb[3].mxu1  ;;  %730 = vmatmul.mubr.f32.gmra.mrb[108].mxu1 %v2355_v12  ;;  %v1858_v12 = vpack.c.bf16 %v997_v2, %v995_v63  ;;  %v1000_v38 = vld [vmem:[#allocation7 + $0x290] sm:$0xff]  ;;  %v1013_v63 = vld [vmem:[#allocation7 + $0x2f8] sm:$0xff] }
 0x154   :  { %v351_v53 = vadd.f32 %v350_v14, %v2472_v59  ;;  %1122 = vmatprep.mubr.f32.mxu0 %v791_v39  ;;  %735 = vmatprep.mubr.f32.mxu1 %v2357_v22  ;;  %v994_v22 = vld [vmem:[#allocation7 + $0x260] sm:$0xff]  ;;  %v1864_v14 = vpack.c.bf16 %v1000_v38, %v998_v26 }
 0x155   :  { %1123 = vmatmul.mubr.f32.vlgmr.msra.gmra.mrb[0].mxu0 %v790_v60  ;;  %v794_v62 = vmax.f32 %v349_v13, 0.0 }
 0x156   :  { %v795_v30 = vmax.f32 %v351_v53, 0.0  ;;  %v354_v33 = vpop.f32.mrb[4].mxu1  ;;  %1849 = vmatpush1.bf16.msra.mxu0 %v1848_v58  ;;  %v1005_v58 = vld [vmem:[#allocation7 + $0x2b8] sm:$0xff]  ;;  %v1002_v53 = vld [vmem:[#allocation7 + $0x2a0] sm:$0xff] }
 0x157   :  { %v355_v15 = vadd.f32 %v354_v33, %v2466_v57  ;;  %v356_v20 = vpop.f32.mrb[5].mxu1  ;;  %736 = vmatmul.mubr.f32.gmra.mrb[110].mxu1 %v2361_v23  ;;  %1851 = vmatprep.subr.bf16.mxu0 %v1850_v31  ;;  %v996_v23 = vld [vmem:[#allocation7 + $0x270] sm:$0xff] }
 0x158   :  { %v357_v47 = vadd.f32 %v356_v20, %v2472_v59  ;;  %1128 = vmatprep.mubr.f32.mxu0 %v795_v30  ;;  %741 = vmatprep.mubr.f32.mxu1 %v2363_v24  ;;  %v999_v24 = vld [vmem:[#allocation7 + $0x288] sm:$0xff]  ;;  %v1860_v11 = vpack.c.bf16 %v996_v23, %v994_v22  ;;  %v1009_v30 = vld [vmem:[#allocation7 + $0x2d8] sm:$0xff] }
 0x159   :  { %1129 = vmatmul.mubr.f32.gmra.mrb[2].mxu0 %v794_v62  ;;  %v798_v37 = vmax.f32 %v355_v15, 0.0  ;;  %v1862_v25 = vpack.c.bf16 %v1001_v1, %v999_v24  ;;  %v1868_v62 = vpack.c.bf16 %v1004_v8, %v1002_v53  ;;  %v1017_v23 = vld [vmem:[#allocation7 + $0x318] sm:$0xff] }
 0x15a   :  { %v799_v16 = vmax.f32 %v357_v47, 0.0  ;;  %v360_v21 = vpop.f32.mrb[6].mxu1  ;;  %1853 = vmatpush1.bf16.msra.mxu0 %v1852_v55 }
 0x15b   :  { %v361_v54 = vadd.f32 %v360_v21, %v2466_v57  ;;  %v362_v61 = vpop.f32.mrb[7].mxu1  ;;  %742 = vmatmul.mubr.f32.gmra.mrb[112].mxu1 %v2367_v42  ;;  %1855 = vmatprep.subr.bf16.mxu0 %v1854_v28  ;;  %v1872_v21 = vpack.c.bf16 %v1008_v45, %v1006_v34 }
 0x15c   :  { %v363_v41 = vadd.f32 %v362_v61, %v2472_v59  ;;  %1134 = vmatprep.mubr.f32.mxu0 %v799_v16  ;;  %747 = vmatprep.mubr.f32.mxu1 %v2369_v44  ;;  %v1003_v44 = vld [vmem:[#allocation7 + $0x2a8] sm:$0xff]  ;;  %v1010_v61 = vld [vmem:[#allocation7 + $0x2e0] sm:$0xff] }
 0x15d   :  { %1135 = vmatmul.mubr.f32.gmra.mrb[4].mxu0 %v798_v37  ;;  %v802_v17 = vmax.f32 %v361_v54, 0.0  ;;  %v1866_v52 = vpack.c.bf16 %v1005_v58, %v1003_v44 }
 0x15e   :  { %v803_v3 = vmax.f32 %v363_v41, 0.0  ;;  %v366_v9 = vpop.f32.mrb[8].mxu1  ;;  %1857 = vmatpush1.bf16.msra.mxu0 %v1856_v35 }
 0x15f   :  { %v367_v19 = vadd.f32 %v366_v9, %v2466_v57  ;;  %v368_v42 = vpop.f32.mrb[9].mxu1  ;;  %748 = vmatmul.mubr.f32.gmra.mrb[114].mxu1 %v2373_v46  ;;  %1859 = vmatprep.subr.bf16.mxu0 %v1858_v12  ;;  %v1012_v12 = vld [vmem:[#allocation7 + $0x2f0] sm:$0xff] }
 0x160   :  { %v369_v39 = vadd.f32 %v368_v42, %v2472_v59  ;;  %1140 = vmatprep.mubr.f32.mxu0 %v803_v3  ;;  %753 = vmatprep.mubr.f32.mxu1 %v2375_v48  ;;  %v1007_v48 = vld [vmem:[#allocation7 + $0x2c8] sm:$0xff]  ;;  %v1876_v1 = vpack.c.bf16 %v1012_v12, %v1010_v61 }
 0x161   :  { %1141 = vmatmul.mubr.f32.gmra.mrb[6].mxu0 %v802_v17  ;;  %v806_v31 = vmax.f32 %v367_v19, 0.0  ;;  %v1870_v28 = vpack.c.bf16 %v1009_v30, %v1007_v48  ;;  %v1014_v17 = vld [vmem:[#allocation7 + $0x300] sm:$0xff]  ;;  %v1016_v19 = vld [vmem:[#allocation7 + $0x310] sm:$0xff] }
 0x162   :  { %v807_v60 = vmax.f32 %v369_v39, 0.0  ;;  %v372_v13 = vpop.f32.mrb[10].mxu1  ;;  %1861 = vmatpush1.bf16.msra.mxu0 %v1860_v11  ;;  %v1880_v39 = vpack.c.bf16 %v1016_v19, %v1014_v17  ;;  %v1022_v30 = vld [vmem:[#allocation7 + $0x340] sm:$0xff] }
 0x163   :  { %v373_v32 = vadd.f32 %v372_v13, %v2466_v57  ;;  %v374_v46 = vpop.f32.mrb[11].mxu1  ;;  %754 = vmatmul.mubr.f32.gmra.mrb[116].mxu1 %v2379_v50  ;;  %1863 = vmatprep.subr.bf16.mxu0 %v1862_v25  ;;  %v1021_v25 = vld [vmem:[#allocation7 + $0x338] sm:$0xff]  ;;  %v1018_v13 = vld [vmem:[#allocation7 + $0x320] sm:$0xff] }
 0x164   :  { %v375_v10 = vadd.f32 %v374_v46, %v2472_v59  ;;  %1146 = vmatprep.mubr.f32.mxu0 %v807_v60  ;;  %759 = vmatprep.mubr.f32.mxu1 %v2381_v56  ;;  %v1011_v56 = vld [vmem:[#allocation7 + $0x2e8] sm:$0xff] }
 0x165   :  { %1147 = vmatmul.mubr.f32.gmra.mrb[8].mxu0 %v806_v31  ;;  %v810_v15 = vmax.f32 %v373_v32, 0.0  ;;  %v1874_v54 = vpack.c.bf16 %v1013_v63, %v1011_v56  ;;  %v1025_v32 = vld [vmem:[#allocation7 + $0x358] sm:$0xff]  ;;  %v1028_v56 = vld [vmem:[#allocation7 + $0x370] sm:$0xff] }
 0x166   :  { %v811_v33 = vmax.f32 %v375_v10, 0.0  ;;  %v378_v55 = vpop.f32.mrb[12].mxu1  ;;  %1865 = vmatpush1.bf16.msra.mxu0 %v1864_v14  ;;  %v1020_v14 = vld [vmem:[#allocation7 + $0x330] sm:$0xff] }
 0x167   :  { %v379_v20 = vadd.f32 %v378_v55, %v2466_v57  ;;  %v380_v50 = vpop.f32.mrb[13].mxu1  ;;  %760 = vmatmul.mubr.f32.gmra.mrb[118].mxu1 %v2385_v0  ;;  %1867 = vmatprep.subr.bf16.mxu0 %v1866_v52  ;;  %v1884_v53 = vpack.c.bf16 %v1020_v14, %v1018_v13 }
 0x168   :  { %v381_v47 = vadd.f32 %v380_v50, %v2472_v59  ;;  %1152 = vmatprep.mubr.f32.mxu0 %v811_v33  ;;  %765 = vmatprep.mubr.f32.mxu1 %v2387_v4  ;;  %v1015_v4 = vld [vmem:[#allocation7 + $0x308] sm:$0xff]  ;;  %v1024_v33 = vld [vmem:[#allocation7 + $0x350] sm:$0xff] }
 0x169   :  { %1153 = vmatmul.mubr.f32.gmra.mrb[10].mxu0 %v810_v15  ;;  %v814_v35 = vmax.f32 %v379_v20, 0.0  ;;  %v1878_v11 = vpack.c.bf16 %v1017_v23, %v1015_v4  ;;  %v1888_v50 = vpack.c.bf16 %v1024_v33, %v1022_v30  ;;  %v1032_v4 = vld [vmem:[#allocation7 + $0x390] sm:$0xff] }
 0x16a   :  { %v815_v2 = vmax.f32 %v381_v47, 0.0  ;;  %v384_v16 = vpop.f32.mrb[14].mxu1  ;;  %1869 = vmatpush1.bf16.msra.mxu0 %v1868_v62  ;;  %v1029_v62 = vld [vmem:[#allocation7 + $0x378] sm:$0xff]  ;;  %v1026_v47 = vld [vmem:[#allocation7 + $0x360] sm:$0xff] }
 0x16b   :  { %v385_v37 = vadd.f32 %v384_v16, %v2466_v57  ;;  %v386_v0 = vpop.f32.mrb[15].mxu1  ;;  %766 = vmatmul.mubr.f32.gmra.mrb[120].mxu1 %v2391_v5  ;;  %1871 = vmatprep.subr.bf16.mxu0 %v1870_v28  ;;  %v1033_v16 = vld [vmem:[#allocation7 + $0x398] sm:$0xff] }
 0x16c   :  { %v387_v22 = vadd.f32 %v386_v0, %v2472_v59  ;;  %1158 = vmatprep.mubr.f32.mxu0 %v815_v2  ;;  %771 = vmatprep.mubr.f32.mxu1 %v2393_v6  ;;  %v1019_v6 = vld [vmem:[#allocation7 + $0x328] sm:$0xff] }
 0x16d   :  { %1159 = vmatmul.mubr.f32.gmra.mrb[12].mxu0 %v814_v35  ;;  %v818_v3 = vmax.f32 %v385_v37, 0.0  ;;  %v1882_v60 = vpack.c.bf16 %v1021_v25, %v1019_v6  ;;  %v1031_v2 = vld [vmem:[#allocation7 + $0x388] sm:$0xff]  ;;  %v1892_v37 = vpack.c.bf16 %v1028_v56, %v1026_v47  ;;  %v1036_v6 = vld [vmem:[#allocation7 + $0x3b0] sm:$0xff] }
 0x16e   :  { %v819_v41 = vmax.f32 %v387_v22, 0.0  ;;  %v390_v24 = vpop.f32.mrb[16].mxu1  ;;  %1873 = vmatpush1.bf16.msra.mxu0 %v1872_v21  ;;  %v1894_v12 = vpack.c.bf16 %v1033_v16, %v1031_v2  ;;  %v1030_v22 = vld [vmem:[#allocation7 + $0x380] sm:$0xff] }
 0x16f   :  { %v391_v9 = vadd.f32 %v390_v24, %v2466_v57  ;;  %v392_v5 = vpop.f32.mrb[17].mxu1  ;;  %772 = vmatmul.mubr.f32.gmra.mrb[122].mxu1 %v2397_v7  ;;  %1875 = vmatprep.subr.bf16.mxu0 %v1874_v54  ;;  %v1037_v24 = vld [vmem:[#allocation7 + $0x3b8] sm:$0xff] }
 0x170   :  { %v393_v42 = vadd.f32 %v392_v5, %v2472_v59  ;;  %1164 = vmatprep.mubr.f32.mxu0 %v819_v41  ;;  %777 = vmatprep.mubr.f32.mxu1 %v2399_v18  ;;  %v1023_v18 = vld [vmem:[#allocation7 + $0x348] sm:$0xff] }
 0x171   :  { %1165 = vmatmul.mubr.f32.gmra.mrb[14].mxu0 %v818_v3  ;;  %v822_v44 = vmax.f32 %v391_v9, 0.0  ;;  %v1886_v48 = vpack.c.bf16 %v1025_v32, %v1023_v18  ;;  %v1035_v41 = vld [vmem:[#allocation7 + $0x3a8] sm:$0xff]  ;;  %v1896_v9 = vpack.c.bf16 %v1032_v4, %v1030_v22  ;;  %v1040_v18 = vld [vmem:[#allocation7 + $0x3d0] sm:$0xff] }
 0x172   :  { %v823_v26 = vmax.f32 %v393_v42, 0.0  ;;  %v396_v38 = vpop.f32.mrb[18].mxu1  ;;  %1877 = vmatpush1.bf16.msra.mxu0 %v1876_v1  ;;  %v1898_v19 = vpack.c.bf16 %v1037_v24, %v1035_v41  ;;  %v1034_v42 = vld [vmem:[#allocation7 + $0x3a0] sm:$0xff] }
 0x173   :  { %v397_v58 = vadd.f32 %v396_v38, %v2466_v57  ;;  %v398_v7 = vpop.f32.mrb[19].mxu1  ;;  %778 = vmatmul.mubr.f32.gmra.mrb[124].mxu1 %v2403_v27  ;;  %1879 = vmatprep.subr.bf16.mxu0 %v1878_v11  ;;  %v1041_v38 = vld [vmem:[#allocation7 + $0x3d8] sm:$0xff] }
 0x174   :  { %v399_v31 = vadd.f32 %v398_v7, %v2472_v59  ;;  %1170 = vmatprep.mubr.f32.mxu0 %v823_v26  ;;  %783 = vmatprep.mubr.f32.mxu1 %v2405_v29  ;;  %v1027_v29 = vld [vmem:[#allocation7 + $0x368] sm:$0xff] }
 0x175   :  { %1171 = vmatmul.mubr.f32.gmra.mrb[16].mxu0 %v822_v44  ;;  %v826_v8 = vmax.f32 %v397_v58, 0.0  ;;  %v1039_v26 = vld [vmem:[#allocation7 + $0x3c8] sm:$0xff]  ;;  %v1900_v58 = vpack.c.bf16 %v1036_v6, %v1034_v42 }
 0x176   :  { %v827_v46 = vmax.f32 %v399_v31, 0.0  ;;  %v402_v52 = vpop.f32.mrb[20].mxu1  ;;  %1881 = vmatpush1.bf16.msra.mxu0 %v1880_v39  ;;  %v1902_v14 = vpack.c.bf16 %v1041_v38, %v1039_v26  ;;  %v1038_v31 = vld [vmem:[#allocation7 + $0x3c0] sm:$0xff] }
 0x177   :  { %v403_v10 = vadd.f32 %v402_v52, %v2466_v57  ;;  %v404_v27 = vpop.f32.mrb[21].mxu1  ;;  %784 = vmatmul.mubr.f32.gmra.mrb[126].mxu1 %v2409_v36  ;;  %1883 = vmatprep.subr.bf16.mxu0 %v1882_v60  ;;  %v1890_v36 = vpack.c.bf16 %v1029_v62, %v1027_v29  ;;  %v1045_v52 = vld [vmem:[#allocation7 + $0x3f8] sm:$0xff]  ;;  %v1044_v29 = vld [vmem:[#allocation7 + $0x3f0] sm:$0xff] }
 0x178   :  { %v405_v55 = vadd.f32 %v404_v27, %v2472_v59  ;;  %1176 = vmatprep.mubr.f32.mxu0 %v827_v46  ;;  %v1043_v46 = vld [vmem:[#allocation7 + $0x3e8] sm:$0xff] }
 0x179   :  { %1177 = vmatmul.mubr.f32.gmra.mrb[18].mxu0 %v826_v8  ;;  %v830_v28 = vmax.f32 %v403_v10, 0.0  ;;  %v1904_v10 = vpack.c.bf16 %v1040_v18, %v1038_v31  ;;  %v1906_v33 = vpack.c.bf16 %v1045_v52, %v1043_v46 }
 0x17a   :  { %v831_v15 = vmax.f32 %v405_v55, 0.0  ;;  %v408_v20 = vpop.f32.mrb[22].mxu1  ;;  %1885 = vmatpush1.bf16.msra.mxu0 %v1884_v53  ;;  %v1042_v55 = vld [vmem:[#allocation7 + $0x3e0] sm:$0xff] }
 0x17b   :  { %v409_v34 = vadd.f32 %v408_v20, %v2466_v57  ;;  %v410_v45 = vpop.f32.mrb[23].mxu1  ;;  %1887 = vmatprep.subr.bf16.mxu0 %v1886_v48 }
 0x17c   :  { %v411_v63 = vadd.f32 %v410_v45, %v2472_v59  ;;  %1182 = vmatprep.mubr.f32.mxu0 %v831_v15 }
 0x17d   :  { %1183 = vmatmul.mubr.f32.gmra.mrb[20].mxu0 %v830_v28  ;;  %v834_v0 = vmax.f32 %v409_v34, 0.0 }
 0x17e   :  { %v835_v21 = vmax.f32 %v411_v63, 0.0  ;;  %v414_v35 = vpop.f32.mrb[24].mxu1  ;;  %1889 = vmatpush1.bf16.msra.mxu0 %v1888_v50  ;;  %v1908_v50 = vpack.c.bf16 %v1044_v29, %v1042_v55 }
 0x17f   :  { %v415_v54 = vadd.f32 %v414_v35, %v2466_v57  ;;  %v416_v61 = vpop.f32.mrb[25].mxu1  ;;  %1891 = vmatprep.subr.bf16.mxu0 %v1890_v36 }
 0x180   :  { %v417_v23 = vadd.f32 %v416_v61, %v2472_v59  ;;  %1188 = vmatprep.mubr.f32.mxu0 %v835_v21 }
 0x181   :  { %1189 = vmatmul.mubr.f32.gmra.mrb[22].mxu0 %v834_v0  ;;  %v838_v5 = vmax.f32 %v415_v54, 0.0 }
 0x182   :  { %v839_v1 = vmax.f32 %v417_v23, 0.0  ;;  %v420_v3 = vpop.f32.mrb[26].mxu1  ;;  %1893 = vmatpush1.bf16.msra.mxu0 %v1892_v37 }
 0x183   :  { %v421_v11 = vadd.f32 %v420_v3, %v2466_v57  ;;  %v422_v17 = vpop.f32.mrb[27].mxu1  ;;  %1895 = vmatprep.subr.bf16.mxu0 %v1894_v12 }
 0x184   :  { %v423_v25 = vadd.f32 %v422_v17, %v2472_v59  ;;  %1194 = vmatprep.mubr.f32.mxu0 %v839_v1 }
 0x185   :  { %1195 = vmatmul.mubr.f32.gmra.mrb[24].mxu0 %v838_v5  ;;  %v842_v7 = vmax.f32 %v421_v11, 0.0 }
 0x186   :  { %v843_v39 = vmax.f32 %v423_v25, 0.0  ;;  %v426_v44 = vpop.f32.mrb[28].mxu1  ;;  %1897 = vmatpush1.bf16.msra.mxu0 %v1896_v9 }
 0x187   :  { %v427_v60 = vadd.f32 %v426_v44, %v2466_v57  ;;  %v428_v13 = vpop.f32.mrb[29].mxu1  ;;  %1899 = vmatprep.subr.bf16.mxu0 %v1898_v19 }
 0x188   :  { %v429_v32 = vadd.f32 %v428_v13, %v2472_v59  ;;  %1200 = vmatprep.mubr.f32.mxu0 %v843_v39 }
 0x189   :  { %1201 = vmatmul.mubr.f32.gmra.mrb[26].mxu0 %v842_v7  ;;  %v846_v27 = vmax.f32 %v427_v60, 0.0 }
 0x18a   :  { %v847_v53 = vmax.f32 %v429_v32, 0.0  ;;  %v432_v8 = vpop.f32.mrb[30].mxu1  ;;  %1901 = vmatpush1.bf16.msra.mxu0 %v1900_v58 }
 0x18b   :  { %v433_v48 = vadd.f32 %v432_v8, %v2466_v57  ;;  %v434_v30 = vpop.f32.mrb[31].mxu1  ;;  %1903 = vmatprep.subr.bf16.mxu0 %v1902_v14 }
 0x18c   :  { %v435_v62 = vadd.f32 %v434_v30, %v2472_v59  ;;  %1206 = vmatprep.mubr.f32.mxu0 %v847_v53 }
 0x18d   :  { %1207 = vmatmul.mubr.f32.gmra.mrb[28].mxu0 %v846_v27  ;;  %v850_v28 = vmax.f32 %v433_v48, 0.0 }
 0x18e   :  { %v851_v15 = vmax.f32 %v435_v62, 0.0  ;;  %v438_v20 = vpop.f32.mrb[32].mxu1  ;;  %1905 = vmatpush1.bf16.msra.mxu0 %v1904_v10 }
 0x18f   :  { %v439_v34 = vadd.f32 %v438_v20, %v2466_v57  ;;  %v440_v45 = vpop.f32.mrb[33].mxu1  ;;  %1907 = vmatprep.subr.bf16.mxu0 %v1906_v33 }
 0x190   :  { %v441_v36 = vadd.f32 %v440_v45, %v2472_v59  ;;  %1212 = vmatprep.mubr.f32.mxu0 %v851_v15 }
 0x191   :  { %1213 = vmatmul.mubr.f32.gmra.mrb[30].mxu0 %v850_v28  ;;  %v854_v63 = vmax.f32 %v439_v34, 0.0 }
 0x192   :  { %v855_v47 = vmax.f32 %v441_v36, 0.0  ;;  %v444_v56 = vpop.f32.mrb[34].mxu1  ;;  %1909 = vmatpush1.bf16.msra.mxu0 %v1908_v50 }
 0x193   :  { %v445_v2 = vadd.f32 %v444_v56, %v2466_v57  ;;  %v446_v16 = vpop.f32.mrb[35].mxu1 }
 0x194   :  { %v447_v21 = vadd.f32 %v446_v16, %v2472_v59  ;;  %1218 = vmatprep.mubr.f32.mxu0 %v855_v47 }
 0x195   :  { %1219 = vmatmul.mubr.f32.gmra.mrb[32].mxu0 %v854_v63  ;;  %v858_v0 = vmax.f32 %v445_v2, 0.0 }
 0x196   :  { %v859_v35 = vmax.f32 %v447_v21, 0.0  ;;  %v450_v37 = vpop.f32.mrb[36].mxu1 }
 0x197   :  { %v451_v54 = vadd.f32 %v450_v37, %v2466_v57  ;;  %v452_v61 = vpop.f32.mrb[37].mxu1 }
 0x198   :  { %v453_v12 = vadd.f32 %v452_v61, %v2472_v59  ;;  %1224 = vmatprep.mubr.f32.mxu0 %v859_v35 }
 0x199   :  { %1225 = vmatmul.mubr.f32.gmra.mrb[34].mxu0 %v858_v0  ;;  %v862_v23 = vmax.f32 %v451_v54, 0.0 }
 0x19a   :  { %v863_v22 = vmax.f32 %v453_v12, 0.0  ;;  %v456_v4 = vpop.f32.mrb[38].mxu1 }
 0x19b   :  { %v457_v41 = vadd.f32 %v456_v4, %v2466_v57  ;;  %v458_v24 = vpop.f32.mrb[39].mxu1 }
 0x19c   :  { %v459_v1 = vadd.f32 %v458_v24, %v2472_v59  ;;  %1230 = vmatprep.mubr.f32.mxu0 %v863_v22 }
 0x19d   :  { %1231 = vmatmul.mubr.f32.gmra.mrb[36].mxu0 %v862_v23  ;;  %v866_v5 = vmax.f32 %v457_v41, 0.0 }
 0x19e   :  { %v867_v3 = vmax.f32 %v459_v1, 0.0  ;;  %v462_v9 = vpop.f32.mrb[40].mxu1 }
 0x19f   :  { %v463_v11 = vadd.f32 %v462_v9, %v2466_v57  ;;  %v464_v17 = vpop.f32.mrb[41].mxu1 }
 0x1a0   :  { %v465_v19 = vadd.f32 %v464_v17, %v2472_v59  ;;  %1236 = vmatprep.mubr.f32.mxu0 %v867_v3 }
 0x1a1   :  { %1237 = vmatmul.mubr.f32.gmra.mrb[38].mxu0 %v866_v5  ;;  %v870_v25 = vmax.f32 %v463_v11, 0.0 }
 0x1a2   :  { %v871_v42 = vmax.f32 %v465_v19, 0.0  ;;  %v468_v6 = vpop.f32.mrb[42].mxu1 }
 0x1a3   :  { %v469_v26 = vadd.f32 %v468_v6, %v2466_v57  ;;  %v470_v38 = vpop.f32.mrb[43].mxu1  ;;  %v266_v6 = vsub.s32 2, %v2450_v40 }
 0x1a4   :  { %v471_v39 = vadd.f32 %v470_v38, %v2472_v59  ;;  %1242 = vmatprep.mubr.f32.mxu0 %v871_v42 }
 0x1a5   :  { %1243 = vmatmul.mubr.f32.gmra.mrb[40].mxu0 %v870_v25  ;;  %v874_v7 = vmax.f32 %v469_v26, 0.0  ;;  %v270_v26 = vsub.s32 3, %v2450_v40 }
 0x1a6   :  { %v875_v44 = vmax.f32 %v471_v39, 0.0  ;;  %v474_v58 = vpop.f32.mrb[44].mxu1 }
 0x1a7   :  { %v475_v60 = vadd.f32 %v474_v58, %v2466_v57  ;;  %v476_v13 = vpop.f32.mrb[45].mxu1 }
 0x1a8   :  { %v477_v14 = vadd.f32 %v476_v13, %v2472_v59  ;;  %1248 = vmatprep.mubr.f32.mxu0 %v875_v44 }
 0x1a9   :  { %1249 = vmatmul.mubr.f32.gmra.mrb[42].mxu0 %v874_v7  ;;  %v878_v32 = vmax.f32 %v475_v60, 0.0  ;;  %v2561_v60 = vrot.slane %v2459_v49, %v266_v6 }
 0x1aa   :  { %v879_v31 = vmax.f32 %v477_v14, 0.0  ;;  %v480_v18 = vpop.f32.mrb[46].mxu1  ;;  %v2565_v14 = vrot.slane %v2459_v49, %v270_v26 }
 0x1ab   :  { %v481_v46 = vadd.f32 %v480_v18, %v2466_v57  ;;  %v482_v52 = vpop.f32.mrb[47].mxu1 }
 0x1ac   :  { %v483_v53 = vadd.f32 %v482_v52, %v2472_v59  ;;  %1254 = vmatprep.mubr.f32.mxu0 %v879_v31 }
 0x1ad   :  { %1255 = vmatmul.mubr.f32.gmra.mrb[44].mxu0 %v878_v32  ;;  %v882_v27 = vmax.f32 %v481_v46, 0.0 }
 0x1ae   :  { %v883_v8 = vmax.f32 %v483_v53, 0.0  ;;  %v486_v10 = vpop.f32.mrb[48].mxu1 }
 0x1af   :  { %v487_v48 = vadd.f32 %v486_v10, %v2466_v57  ;;  %v488_v30 = vpop.f32.mrb[49].mxu1 }
 0x1b0   :  { %v489_v33 = vadd.f32 %v488_v30, %v2472_v59  ;;  %1260 = vmatprep.mubr.f32.mxu0 %v883_v8 }
 0x1b1   :  { %1261 = vmatmul.mubr.f32.gmra.mrb[46].mxu0 %v882_v27  ;;  %v886_v62 = vmax.f32 %v487_v48, 0.0 }
 0x1b2   :  { %v887_v55 = vmax.f32 %v489_v33, 0.0  ;;  %v492_v29 = vpop.f32.mrb[50].mxu1 }
 0x1b3   :  { %v493_v15 = vadd.f32 %v492_v29, %v2466_v57  ;;  %v494_v20 = vpop.f32.mrb[51].mxu1 }
 0x1b4   :  { %v495_v50 = vadd.f32 %v494_v20, %v2472_v59  ;;  %1266 = vmatprep.mubr.f32.mxu0 %v887_v55 }
 0x1b5   :  { %1267 = vmatmul.mubr.f32.gmra.mrb[48].mxu0 %v886_v62  ;;  %v890_v45 = vmax.f32 %v493_v15, 0.0 }
 0x1b6   :  { %v891_v28 = vmax.f32 %v495_v50, 0.0  ;;  %v498_v34 = vpop.f32.mrb[52].mxu1 }
 0x1b7   :  { %v499_v36 = vadd.f32 %v498_v34, %v2466_v57  ;;  %v500_v47 = vpop.f32.mrb[53].mxu1 }
 0x1b8   :  { %v501_v56 = vadd.f32 %v500_v47, %v2472_v59  ;;  %1272 = vmatprep.mubr.f32.mxu0 %v891_v28 }
 0x1b9   :  { %1273 = vmatmul.mubr.f32.gmra.mrb[50].mxu0 %v890_v45  ;;  %v894_v16 = vmax.f32 %v499_v36, 0.0 }
 0x1ba   :  { %v895_v63 = vmax.f32 %v501_v56, 0.0  ;;  %v504_v2 = vpop.f32.mrb[54].mxu1 }
 0x1bb   :  { %v505_v21 = vadd.f32 %v504_v2, %v2466_v57  ;;  %v506_v35 = vpop.f32.mrb[55].mxu1 }
 0x1bc   :  { %v507_v37 = vadd.f32 %v506_v35, %v2472_v59  ;;  %1278 = vmatprep.mubr.f32.mxu0 %v895_v63 }
 0x1bd   :  { %1279 = vmatmul.mubr.f32.gmra.mrb[52].mxu0 %v894_v16  ;;  %v898_v61 = vmax.f32 %v505_v21, 0.0 }
 0x1be   :  { %v899_v0 = vmax.f32 %v507_v37, 0.0  ;;  %v510_v54 = vpop.f32.mrb[56].mxu1 }
 0x1bf   :  { %v511_v12 = vadd.f32 %v510_v54, %v2466_v57  ;;  %v512_v22 = vpop.f32.mrb[57].mxu1 }
 0x1c0   :  { %v513_v4 = vadd.f32 %v512_v22, %v2472_v59  ;;  %1284 = vmatprep.mubr.f32.mxu0 %v899_v0 }
 0x1c1   :  { %1285 = vmatmul.mubr.f32.gmra.mrb[54].mxu0 %v898_v61  ;;  %v902_v24 = vmax.f32 %v511_v12, 0.0 }
 0x1c2   :  { %v903_v23 = vmax.f32 %v513_v4, 0.0  ;;  %v516_v41 = vpop.f32.mrb[58].mxu1 }
 0x1c3   :  { %v517_v1 = vadd.f32 %v516_v41, %v2466_v57  ;;  %v518_v3 = vpop.f32.mrb[59].mxu1 }
 0x1c4   :  { %v519_v9 = vadd.f32 %v518_v3, %v2472_v59  ;;  %1290 = vmatprep.mubr.f32.mxu0 %v903_v23 }
 0x1c5   :  { %1291 = vmatmul.mubr.f32.gmra.mrb[56].mxu0 %v902_v24  ;;  %v906_v17 = vmax.f32 %v517_v1, 0.0 }
 0x1c6   :  { %v907_v5 = vmax.f32 %v519_v9, 0.0  ;;  %v522_v11 = vpop.f32.mrb[60].mxu1 }
 0x1c7   :  { %v523_v19 = vadd.f32 %v522_v11, %v2466_v57  ;;  %v524_v42 = vpop.f32.mrb[61].mxu1 }
 0x1c8   :  { %v525_v25 = vadd.f32 %v524_v42, %v2472_v59  ;;  %1296 = vmatprep.mubr.f32.mxu0 %v907_v5 }
 0x1c9   :  { %1297 = vmatmul.mubr.f32.gmra.mrb[58].mxu0 %v906_v17  ;;  %v910_v44 = vmax.f32 %v523_v19, 0.0 }
 0x1ca   :  { %v911_v38 = vmax.f32 %v525_v25, 0.0  ;;  %v528_v39 = vpop.f32.mrb[62].mxu1 }
 0x1cb   :  { %v529_v58 = vadd.f32 %v528_v39, %v2466_v57  ;;  %v530_v7 = vpop.f32.mrb[63].mxu1 }
 0x1cc   :  { %v531_v13 = vadd.f32 %v530_v7, %v2472_v59  ;;  %1302 = vmatprep.mubr.f32.mxu0 %v911_v38 }
 0x1cd   :  { %1303 = vmatmul.mubr.f32.gmra.mrb[60].mxu0 %v910_v44  ;;  %v914_v32 = vmax.f32 %v529_v58, 0.0 }
 0x1ce   :  { %v915_v31 = vmax.f32 %v531_v13, 0.0  ;;  %v599_v18 = vpop.f32.mrb[64].mxu1 }
 0x1cf   :  { %v600_v46 = vadd.f32 %v599_v18, %v2561_v60  ;;  %v601_v52 = vpop.f32.mrb[65].mxu1 }
 0x1d0   :  { %v602_v53 = vadd.f32 %v601_v52, %v2565_v14  ;;  %1308 = vmatprep.mubr.f32.mxu0 %v915_v31 }
 0x1d1   :  { %1309 = vmatmul.mubr.f32.gmra.mrb[62].mxu0 %v914_v32  ;;  %v792_v10 = vmax.f32 %v600_v46, 0.0 }
 0x1d2   :  { %v793_v57 = vmax.f32 %v602_v53, 0.0  ;;  %v605_v8 = vpop.f32.mrb[66].mxu1 }
 0x1d3   :  { %v606_v59 = vadd.f32 %v605_v8, %v2561_v60  ;;  %v607_v27 = vpop.f32.mrb[67].mxu1 }
 0x1d4   :  { %v608_v49 = vadd.f32 %v607_v27, %v2565_v14  ;;  %1379 = vmatprep.mubr.f32.mxu0 %v793_v57 }
 0x1d5   :  { %1380 = vmatmul.mubr.f32.vlgmr.msra.gmra.mrb[0].mxu0 %v792_v10  ;;  %v796_v33 = vmax.f32 %v606_v59, 0.0 }
 0x1d6   :  { %v797_v48 = vmax.f32 %v608_v49, 0.0  ;;  %v611_v30 = vpop.f32.mrb[68].mxu1 }
 0x1d7   :  { %v612_v55 = vadd.f32 %v611_v30, %v2561_v60  ;;  %v613_v29 = vpop.f32.mrb[69].mxu1 }
 0x1d8   :  { %v614_v62 = vadd.f32 %v613_v29, %v2565_v14  ;;  %1385 = vmatprep.mubr.f32.mxu0 %v797_v48 }
 0x1d9   :  { %1386 = vmatmul.mubr.f32.gmra.mrb[2].mxu0 %v796_v33  ;;  %v800_v50 = vmax.f32 %v612_v55, 0.0 }
 0x1da   :  { %v801_v15 = vmax.f32 %v614_v62, 0.0  ;;  %v617_v20 = vpop.f32.mrb[70].mxu1 }
 0x1db   :  { %v618_v28 = vadd.f32 %v617_v20, %v2561_v60  ;;  %v619_v34 = vpop.f32.mrb[71].mxu1 }
 0x1dc   :  { %v620_v45 = vadd.f32 %v619_v34, %v2565_v14  ;;  %1391 = vmatprep.mubr.f32.mxu0 %v801_v15 }
 0x1dd   :  { %1392 = vmatmul.mubr.f32.gmra.mrb[4].mxu0 %v800_v50  ;;  %v804_v56 = vmax.f32 %v618_v28, 0.0 }
 0x1de   :  { %v805_v36 = vmax.f32 %v620_v45, 0.0  ;;  %v623_v47 = vpop.f32.mrb[72].mxu1 }
 0x1df   :  { %v624_v63 = vadd.f32 %v623_v47, %v2561_v60  ;;  %v625_v2 = vpop.f32.mrb[73].mxu1 }
 0x1e0   :  { %v626_v16 = vadd.f32 %v625_v2, %v2565_v14  ;;  %1397 = vmatprep.mubr.f32.mxu0 %v805_v36 }
 0x1e1   :  { %1398 = vmatmul.mubr.f32.gmra.mrb[6].mxu0 %v804_v56  ;;  %v808_v37 = vmax.f32 %v624_v63, 0.0 }
 0x1e2   :  { %v809_v21 = vmax.f32 %v626_v16, 0.0  ;;  %v629_v35 = vpop.f32.mrb[74].mxu1 }
 0x1e3   :  { %v630_v0 = vadd.f32 %v629_v35, %v2561_v60  ;;  %v631_v54 = vpop.f32.mrb[75].mxu1 }
 0x1e4   :  { %v632_v61 = vadd.f32 %v631_v54, %v2565_v14  ;;  %1403 = vmatprep.mubr.f32.mxu0 %v809_v21 }
 0x1e5   :  { %1404 = vmatmul.mubr.f32.gmra.mrb[8].mxu0 %v808_v37  ;;  %v812_v4 = vmax.f32 %v630_v0, 0.0 }
 0x1e6   :  { %v813_v12 = vmax.f32 %v632_v61, 0.0  ;;  %v635_v22 = vpop.f32.mrb[76].mxu1 }
 0x1e7   :  { %v636_v23 = vadd.f32 %v635_v22, %v2561_v60  ;;  %v637_v41 = vpop.f32.mrb[77].mxu1 }
 0x1e8   :  { %v638_v24 = vadd.f32 %v637_v41, %v2565_v14  ;;  %1409 = vmatprep.mubr.f32.mxu0 %v813_v12 }
 0x1e9   :  { %1410 = vmatmul.mubr.f32.gmra.mrb[10].mxu0 %v812_v4  ;;  %v816_v9 = vmax.f32 %v636_v23, 0.0 }
 0x1ea   :  { %v817_v1 = vmax.f32 %v638_v24, 0.0  ;;  %v641_v3 = vpop.f32.mrb[78].mxu1 }
 0x1eb   :  { %v642_v5 = vadd.f32 %v641_v3, %v2561_v60  ;;  %v643_v11 = vpop.f32.mrb[79].mxu1 }
 0x1ec   :  { %v644_v17 = vadd.f32 %v643_v11, %v2565_v14  ;;  %1415 = vmatprep.mubr.f32.mxu0 %v817_v1 }
 0x1ed   :  { %1416 = vmatmul.mubr.f32.gmra.mrb[12].mxu0 %v816_v9  ;;  %v820_v6 = vmax.f32 %v642_v5, 0.0 }
 0x1ee   :  { %v821_v19 = vmax.f32 %v644_v17, 0.0  ;;  %v647_v42 = vpop.f32.mrb[80].mxu1 }
 0x1ef   :  { %v648_v25 = vadd.f32 %v647_v42, %v2561_v60  ;;  %v649_v26 = vpop.f32.mrb[81].mxu1 }
 0x1f0   :  { %v650_v38 = vadd.f32 %v649_v26, %v2565_v14  ;;  %1421 = vmatprep.mubr.f32.mxu0 %v821_v19 }
 0x1f1   :  { %1422 = vmatmul.mubr.f32.gmra.mrb[14].mxu0 %v820_v6  ;;  %v824_v58 = vmax.f32 %v648_v25, 0.0 }
 0x1f2   :  { %v825_v39 = vmax.f32 %v650_v38, 0.0  ;;  %v653_v44 = vpop.f32.mrb[82].mxu1 }
 0x1f3   :  { %v654_v7 = vadd.f32 %v653_v44, %v2561_v60  ;;  %v655_v13 = vpop.f32.mrb[83].mxu1 }
 0x1f4   :  { %v656_v31 = vadd.f32 %v655_v13, %v2565_v14  ;;  %1427 = vmatprep.mubr.f32.mxu0 %v825_v39 }
 0x1f5   :  { %1428 = vmatmul.mubr.f32.gmra.mrb[16].mxu0 %v824_v58  ;;  %v828_v46 = vmax.f32 %v654_v7, 0.0 }
 0x1f6   :  { %v829_v18 = vmax.f32 %v656_v31, 0.0  ;;  %v659_v32 = vpop.f32.mrb[84].mxu1 }
 0x1f7   :  { %v660_v52 = vadd.f32 %v659_v32, %v2561_v60  ;;  %v661_v53 = vpop.f32.mrb[85].mxu1 }
 0x1f8   :  { %v662_v57 = vadd.f32 %v661_v53, %v2565_v14  ;;  %1433 = vmatprep.mubr.f32.mxu0 %v829_v18 }
 0x1f9   :  { %1434 = vmatmul.mubr.f32.gmra.mrb[18].mxu0 %v828_v46  ;;  %v832_v59 = vmax.f32 %v660_v52, 0.0 }
 0x1fa   :  { %v833_v8 = vmax.f32 %v662_v57, 0.0  ;;  %v665_v10 = vpop.f32.mrb[86].mxu1 }
 0x1fb   :  { %v666_v27 = vadd.f32 %v665_v10, %v2561_v60  ;;  %v667_v49 = vpop.f32.mrb[87].mxu1 }
 0x1fc   :  { %v668_v48 = vadd.f32 %v667_v49, %v2565_v14  ;;  %1439 = vmatprep.mubr.f32.mxu0 %v833_v8 }
 0x1fd   :  { %1440 = vmatmul.mubr.f32.gmra.mrb[20].mxu0 %v832_v59  ;;  %v836_v55 = vmax.f32 %v666_v27, 0.0 }
 0x1fe   :  { %v837_v30 = vmax.f32 %v668_v48, 0.0  ;;  %v671_v33 = vpop.f32.mrb[88].mxu1 }
 0x1ff   :  { %v672_v29 = vadd.f32 %v671_v33, %v2561_v60  ;;  %v673_v62 = vpop.f32.mrb[89].mxu1 }
 0x200   :  { %v674_v15 = vadd.f32 %v673_v62, %v2565_v14  ;;  %1445 = vmatprep.mubr.f32.mxu0 %v837_v30 }
 0x201   :  { %1446 = vmatmul.mubr.f32.gmra.mrb[22].mxu0 %v836_v55  ;;  %v840_v28 = vmax.f32 %v672_v29, 0.0 }
 0x202   :  { %v841_v20 = vmax.f32 %v674_v15, 0.0  ;;  %v677_v50 = vpop.f32.mrb[90].mxu1 }
 0x203   :  { %v678_v34 = vadd.f32 %v677_v50, %v2561_v60  ;;  %v679_v45 = vpop.f32.mrb[91].mxu1 }
 0x204   :  { %v680_v36 = vadd.f32 %v679_v45, %v2565_v14  ;;  %1451 = vmatprep.mubr.f32.mxu0 %v841_v20 }
 0x205   :  { %1452 = vmatmul.mubr.f32.gmra.mrb[24].mxu0 %v840_v28  ;;  %v844_v63 = vmax.f32 %v678_v34, 0.0 }
 0x206   :  { %v845_v47 = vmax.f32 %v680_v36, 0.0  ;;  %v683_v56 = vpop.f32.mrb[92].mxu1 }
 0x207   :  { %v684_v2 = vadd.f32 %v683_v56, %v2561_v60  ;;  %v685_v16 = vpop.f32.mrb[93].mxu1 }
 0x208   :  { %v686_v21 = vadd.f32 %v685_v16, %v2565_v14  ;;  %1457 = vmatprep.mubr.f32.mxu0 %v845_v47 }
 0x209   :  { %1458 = vmatmul.mubr.f32.gmra.mrb[26].mxu0 %v844_v63  ;;  %v848_v0 = vmax.f32 %v684_v2, 0.0 }
 0x20a   :  { %v849_v35 = vmax.f32 %v686_v21, 0.0  ;;  %v689_v37 = vpop.f32.mrb[94].mxu1 }
 0x20b   :  { %v690_v54 = vadd.f32 %v689_v37, %v2561_v60  ;;  %v691_v61 = vpop.f32.mrb[95].mxu1 }
 0x20c   :  { %v692_v12 = vadd.f32 %v691_v61, %v2565_v14  ;;  %1463 = vmatprep.mubr.f32.mxu0 %v849_v35 }
 0x20d   :  { %1464 = vmatmul.mubr.f32.gmra.mrb[28].mxu0 %v848_v0  ;;  %v852_v23 = vmax.f32 %v690_v54, 0.0 }
 0x20e   :  { %v853_v22 = vmax.f32 %v692_v12, 0.0  ;;  %v695_v4 = vpop.f32.mrb[96].mxu1 }
 0x20f   :  { %v696_v41 = vadd.f32 %v695_v4, %v2561_v60  ;;  %v697_v24 = vpop.f32.mrb[97].mxu1 }
 0x210   :  { %v698_v1 = vadd.f32 %v697_v24, %v2565_v14  ;;  %1469 = vmatprep.mubr.f32.mxu0 %v853_v22 }
 0x211   :  { %1470 = vmatmul.mubr.f32.gmra.mrb[30].mxu0 %v852_v23  ;;  %v856_v5 = vmax.f32 %v696_v41, 0.0 }
 0x212   :  { %v857_v3 = vmax.f32 %v698_v1, 0.0  ;;  %v701_v9 = vpop.f32.mrb[98].mxu1 }
 0x213   :  { %v702_v11 = vadd.f32 %v701_v9, %v2561_v60  ;;  %v703_v17 = vpop.f32.mrb[99].mxu1 }
 0x214   :  { %v704_v19 = vadd.f32 %v703_v17, %v2565_v14  ;;  %1475 = vmatprep.mubr.f32.mxu0 %v857_v3 }
 0x215   :  { %1476 = vmatmul.mubr.f32.gmra.mrb[32].mxu0 %v856_v5  ;;  %v860_v25 = vmax.f32 %v702_v11, 0.0 }
 0x216   :  { %v861_v42 = vmax.f32 %v704_v19, 0.0  ;;  %v707_v6 = vpop.f32.mrb[100].mxu1 }
 0x217   :  { %v708_v26 = vadd.f32 %v707_v6, %v2561_v60  ;;  %v709_v38 = vpop.f32.mrb[101].mxu1 }
 0x218   :  { %v710_v39 = vadd.f32 %v709_v38, %v2565_v14  ;;  %1481 = vmatprep.mubr.f32.mxu0 %v861_v42 }
 0x219   :  { %1482 = vmatmul.mubr.f32.gmra.mrb[34].mxu0 %v860_v25  ;;  %v864_v7 = vmax.f32 %v708_v26, 0.0 }
 0x21a   :  { %v865_v44 = vmax.f32 %v710_v39, 0.0  ;;  %v713_v58 = vpop.f32.mrb[102].mxu1 }
 0x21b   :  { %v714_v13 = vadd.f32 %v713_v58, %v2561_v60  ;;  %v715_v31 = vpop.f32.mrb[103].mxu1 }
 0x21c   :  { %v716_v18 = vadd.f32 %v715_v31, %v2565_v14  ;;  %1487 = vmatprep.mubr.f32.mxu0 %v865_v44 }
 0x21d   :  { %1488 = vmatmul.mubr.f32.gmra.mrb[36].mxu0 %v864_v7  ;;  %v868_v52 = vmax.f32 %v714_v13, 0.0 }
 0x21e   :  { %v869_v32 = vmax.f32 %v716_v18, 0.0  ;;  %v719_v46 = vpop.f32.mrb[104].mxu1 }
 0x21f   :  { %v720_v53 = vadd.f32 %v719_v46, %v2561_v60  ;;  %v721_v57 = vpop.f32.mrb[105].mxu1 }
 0x220   :  { %v722_v8 = vadd.f32 %v721_v57, %v2565_v14  ;;  %1493 = vmatprep.mubr.f32.mxu0 %v869_v32 }
 0x221   :  { %1494 = vmatmul.mubr.f32.gmra.mrb[38].mxu0 %v868_v52  ;;  %v872_v27 = vmax.f32 %v720_v53, 0.0 }
 0x222   :  { %v873_v10 = vmax.f32 %v722_v8, 0.0  ;;  %v725_v59 = vpop.f32.mrb[106].mxu1 }
 0x223   :  { %v726_v49 = vadd.f32 %v725_v59, %v2561_v60  ;;  %v727_v48 = vpop.f32.mrb[107].mxu1 }
 0x224   :  { %v728_v30 = vadd.f32 %v727_v48, %v2565_v14  ;;  %1499 = vmatprep.mubr.f32.mxu0 %v873_v10 }
 0x225   :  { %1500 = vmatmul.mubr.f32.gmra.mrb[40].mxu0 %v872_v27  ;;  %v876_v29 = vmax.f32 %v726_v49, 0.0 }
 0x226   :  { %v877_v33 = vmax.f32 %v728_v30, 0.0  ;;  %v731_v55 = vpop.f32.mrb[108].mxu1 }
 0x227   :  { %v732_v62 = vadd.f32 %v731_v55, %v2561_v60  ;;  %v733_v15 = vpop.f32.mrb[109].mxu1 }
 0x228   :  { %v734_v20 = vadd.f32 %v733_v15, %v2565_v14  ;;  %1505 = vmatprep.mubr.f32.mxu0 %v877_v33 }
 0x229   :  { %1506 = vmatmul.mubr.f32.gmra.mrb[42].mxu0 %v876_v29  ;;  %v880_v34 = vmax.f32 %v732_v62, 0.0  ;;  %v1046_v62 = vld [vmem:[%s2725_s4] sm:$0x3]  ;;  %s2147_s4 = smov [#allocation8]  }
 0x22a   :  { %v881_v50 = vmax.f32 %v734_v20, 0.0  ;;  %v737_v28 = vpop.f32.mrb[110].mxu1  ;;  %v2636_v15 = vrot.slane %v1046_v62, %v258_v43  ;;  %s1641_s8 = sshll.u32 %s2147_s4, 4  ;;  %s1642_s8 = int_to_ptr.vmem [resolvable:$true] %s1641_s8 }
 0x22b   :  { %v738_v45 = vadd.f32 %v737_v28, %v2561_v60  ;;  %v739_v36 = vpop.f32.mrb[111].mxu1  ;;  %s2112_s9 = scalar_lea.vmem %s1642_s8, 8192  ;;  %p2117_p11 = scmp.lt.s32.totalorder %s1642_s8, %s1642_s8 }
 0x22c   :  { %v740_v47 = vadd.f32 %v739_v36, %v2565_v14  ;;  %1511 = vmatprep.mubr.f32.mxu0 %v881_v50  ;;  %p2113_p10 = scmp.ne.s32.totalorder %s1642_s8, %s2112_s9  ;;  %p2118_p12 = scmp.lt.s32.totalorder %s2112_s9, %s2112_s9 }
 0x22d   :  { %1512 = vmatmul.mubr.f32.gmra.mrb[44].mxu0 %v880_v34  ;;  %v884_v2 = vmax.f32 %v738_v45, 0.0 }
 0x22e   :  { %v885_v56 = vmax.f32 %v740_v47, 0.0  ;;  %v743_v63 = vpop.f32.mrb[112].mxu1  ;;  %p2119_p13 = por %p2118_p12, %p2117_p11 }
 0x22f   :  { %v744_v16 = vadd.f32 %v743_v63, %v2561_v60  ;;  %v745_v21 = vpop.f32.mrb[113].mxu1 }
 0x230   :  { %v746_v35 = vadd.f32 %v745_v21, %v2565_v14  ;;  %1517 = vmatprep.mubr.f32.mxu0 %v885_v56  ;;  %p2120_p0 = pnand %p2119_p13, %p2113_p10 }
 0x231   :  { %1518 = vmatmul.mubr.f32.gmra.mrb[46].mxu0 %v884_v2  ;;  %v888_v54 = vmax.f32 %v744_v16, 0.0 }
 0x232   :  { %v889_v37 = vmax.f32 %v746_v35, 0.0  ;;  %v749_v0 = vpop.f32.mrb[114].mxu1 }
 0x233   :  { %v750_v61 = vadd.f32 %v749_v0, %v2561_v60  ;;  %v751_v12 = vpop.f32.mrb[115].mxu1 }
 0x234   :  { %v752_v22 = vadd.f32 %v751_v12, %v2565_v14  ;;  %1523 = vmatprep.mubr.f32.mxu0 %v889_v37 }
 0x235   :  { %1524 = vmatmul.mubr.f32.gmra.mrb[48].mxu0 %v888_v54  ;;  %v892_v41 = vmax.f32 %v750_v61, 0.0 }
 0x236   :  { %v893_v4 = vmax.f32 %v752_v22, 0.0  ;;  %v755_v23 = vpop.f32.mrb[116].mxu1 }
 0x237   :  { %v756_v24 = vadd.f32 %v755_v23, %v2561_v60  ;;  %v757_v1 = vpop.f32.mrb[117].mxu1 }
 0x238   :  { %v758_v3 = vadd.f32 %v757_v1, %v2565_v14  ;;  %1529 = vmatprep.mubr.f32.mxu0 %v893_v4 }
 0x239   :  { %1530 = vmatmul.mubr.f32.gmra.mrb[50].mxu0 %v892_v41  ;;  %v896_v11 = vmax.f32 %v756_v24, 0.0 }
 0x23a   :  { %v897_v9 = vmax.f32 %v758_v3, 0.0  ;;  %v761_v5 = vpop.f32.mrb[118].mxu1 }
 0x23b   :  { %v762_v17 = vadd.f32 %v761_v5, %v2561_v60  ;;  %v763_v19 = vpop.f32.mrb[119].mxu1 }
 0x23c   :  { %v764_v42 = vadd.f32 %v763_v19, %v2565_v14  ;;  %1535 = vmatprep.mubr.f32.mxu0 %v897_v9 }
 0x23d   :  { %1536 = vmatmul.mubr.f32.gmra.mrb[52].mxu0 %v896_v11  ;;  %v900_v26 = vmax.f32 %v762_v17, 0.0 }
 0x23e   :  { %v901_v6 = vmax.f32 %v764_v42, 0.0  ;;  %v767_v25 = vpop.f32.mrb[120].mxu1 }
 0x23f   :  { %v768_v38 = vadd.f32 %v767_v25, %v2561_v60  ;;  %v769_v39 = vpop.f32.mrb[121].mxu1 }
 0x240   :  { %v770_v44 = vadd.f32 %v769_v39, %v2565_v14  ;;  %1541 = vmatprep.mubr.f32.mxu0 %v901_v6 }
 0x241   :  { %1542 = vmatmul.mubr.f32.gmra.mrb[54].mxu0 %v900_v26  ;;  %v904_v13 = vmax.f32 %v768_v38, 0.0 }
 0x242   :  { %v905_v58 = vmax.f32 %v770_v44, 0.0  ;;  %v773_v7 = vpop.f32.mrb[122].mxu1 }
 0x243   :  { %v774_v31 = vadd.f32 %v773_v7, %v2561_v60  ;;  %v775_v18 = vpop.f32.mrb[123].mxu1 }
 0x244   :  { %v776_v32 = vadd.f32 %v775_v18, %v2565_v14  ;;  %1547 = vmatprep.mubr.f32.mxu0 %v905_v58 }
 0x245   :  { %1548 = vmatmul.mubr.f32.gmra.mrb[56].mxu0 %v904_v13  ;;  %v908_v53 = vmax.f32 %v774_v31, 0.0 }
 0x246   :  { %v909_v46 = vmax.f32 %v776_v32, 0.0  ;;  %v779_v52 = vpop.f32.mrb[124].mxu1 }
 0x247   :  { %v780_v57 = vadd.f32 %v779_v52, %v2561_v60  ;;  %v781_v8 = vpop.f32.mrb[125].mxu1 }
 0x248   :  { %v782_v10 = vadd.f32 %v781_v8, %v2565_v14  ;;  %1553 = vmatprep.mubr.f32.mxu0 %v909_v46 }
 0x249   :  { %1554 = vmatmul.mubr.f32.gmra.mrb[58].mxu0 %v908_v53  ;;  %v912_v49 = vmax.f32 %v780_v57, 0.0 }
 0x24a   :  { %v913_v59 = vmax.f32 %v782_v10, 0.0  ;;  %v785_v27 = vpop.f32.mrb[126].mxu1 }
 0x24b   :  { %v786_v48 = vadd.f32 %v785_v27, %v2561_v60  ;;  %v787_v30 = vpop.f32.mrb[127].mxu1  ;;  %v2640_v60 = vrot.slane %v1046_v62, %v262_v51 }
 0x24c   :  { %v788_v33 = vadd.f32 %v787_v30, %v2565_v14  ;;  %1559 = vmatprep.mubr.f32.mxu0 %v913_v59 }
 0x24d   :  { %1560 = vmatmul.mubr.f32.gmra.mrb[60].mxu0 %v912_v49  ;;  %v916_v29 = vmax.f32 %v786_v48, 0.0 }
 0x24e   :  { %v917_v55 = vmax.f32 %v788_v33, 0.0 }
 0x250   :  { %1565 = vmatprep.mubr.f32.mxu0 %v917_v55 }
 0x251   :  { %1566 = vmatmul.mubr.f32.gmra.mrb[62].mxu0 %v916_v29 }
 0x2a8   :  { %v1381_v20 = vpop.f32.mrb[0].mxu0 }
 0x2a9   :  { %v1910_v14 = vadd.f32 %v1381_v20, %v2636_v15  ;;  %v1383_v50 = vpop.f32.mrb[1].mxu0 }
 0x2aa   :  { %v1911_v28 = vadd.f32 %v1383_v50, %v2640_v60 }
 0x2ab   :  { %1572 = vst [vmem:[#allocation8] sm:$0xff] %v1910_v14 }
 0x2ac   :  { %1573 = vst [vmem:[#allocation8 + $0x8] sm:$0xff] %v1911_v28  ;;  %v1387_v34 = vpop.f32.mrb[2].mxu0 }
 0x2ad   :  { %v1912_v45 = vadd.f32 %v1387_v34, %v2636_v15  ;;  %v1389_v36 = vpop.f32.mrb[3].mxu0 }
 0x2ae   :  { %v1913_v47 = vadd.f32 %v1389_v36, %v2640_v60 }
 0x2af   :  { %1574 = vst [vmem:[#allocation8 + $0x10] sm:$0xff] %v1912_v45 }
 0x2b0   :  { %1575 = vst [vmem:[#allocation8 + $0x18] sm:$0xff] %v1913_v47  ;;  %v1393_v43 = vpop.f32.mrb[4].mxu0 }
 0x2b1   :  { %v1914_v40 = vadd.f32 %v1393_v43, %v2636_v15  ;;  %v1395_v51 = vpop.f32.mrb[5].mxu0 }
 0x2b2   :  { %v1915_v56 = vadd.f32 %v1395_v51, %v2640_v60 }
 0x2b3   :  { %1576 = vst [vmem:[#allocation8 + $0x20] sm:$0xff] %v1914_v40 }
 0x2b4   :  { %1577 = vst [vmem:[#allocation8 + $0x28] sm:$0xff] %v1915_v56  ;;  %v1399_v63 = vpop.f32.mrb[6].mxu0 }
 0x2b5   :  { %v1916_v2 = vadd.f32 %v1399_v63, %v2636_v15  ;;  %v1401_v16 = vpop.f32.mrb[7].mxu0 }
 0x2b6   :  { %v1917_v21 = vadd.f32 %v1401_v16, %v2640_v60 }
 0x2b7   :  { %1578 = vst [vmem:[#allocation8 + $0x30] sm:$0xff] %v1916_v2 }
 0x2b8   :  { %1579 = vst [vmem:[#allocation8 + $0x38] sm:$0xff] %v1917_v21  ;;  %v1405_v35 = vpop.f32.mrb[8].mxu0 }
 0x2b9   :  { %v1918_v37 = vadd.f32 %v1405_v35, %v2636_v15  ;;  %v1407_v0 = vpop.f32.mrb[9].mxu0 }
 0x2ba   :  { %v1919_v54 = vadd.f32 %v1407_v0, %v2640_v60 }
 0x2bb   :  { %1580 = vst [vmem:[#allocation8 + $0x40] sm:$0xff] %v1918_v37 }
 0x2bc   :  { %1581 = vst [vmem:[#allocation8 + $0x48] sm:$0xff] %v1919_v54  ;;  %v1411_v61 = vpop.f32.mrb[10].mxu0 }
 0x2bd   :  { %v1920_v12 = vadd.f32 %v1411_v61, %v2636_v15  ;;  %v1413_v22 = vpop.f32.mrb[11].mxu0 }
 0x2be   :  { %v1921_v4 = vadd.f32 %v1413_v22, %v2640_v60 }
 0x2bf   :  { %1582 = vst [vmem:[#allocation8 + $0x50] sm:$0xff] %v1920_v12 }
 0x2c0   :  { %1583 = vst [vmem:[#allocation8 + $0x58] sm:$0xff] %v1921_v4  ;;  %v1417_v23 = vpop.f32.mrb[12].mxu0 }
 0x2c1   :  { %v1922_v41 = vadd.f32 %v1417_v23, %v2636_v15  ;;  %v1419_v24 = vpop.f32.mrb[13].mxu0 }
 0x2c2   :  { %v1923_v1 = vadd.f32 %v1419_v24, %v2640_v60 }
 0x2c3   :  { %1584 = vst [vmem:[#allocation8 + $0x60] sm:$0xff] %v1922_v41 }
 0x2c4   :  { %1585 = vst [vmem:[#allocation8 + $0x68] sm:$0xff] %v1923_v1  ;;  %v1423_v3 = vpop.f32.mrb[14].mxu0 }
 0x2c5   :  { %v1924_v9 = vadd.f32 %v1423_v3, %v2636_v15  ;;  %v1425_v5 = vpop.f32.mrb[15].mxu0 }
 0x2c6   :  { %v1925_v11 = vadd.f32 %v1425_v5, %v2640_v60 }
 0x2c7   :  { %1586 = vst [vmem:[#allocation8 + $0x70] sm:$0xff] %v1924_v9 }
 0x2c8   :  { %1587 = vst [vmem:[#allocation8 + $0x78] sm:$0xff] %v1925_v11  ;;  %v1429_v17 = vpop.f32.mrb[16].mxu0 }
 0x2c9   :  { %v1926_v19 = vadd.f32 %v1429_v17, %v2636_v15  ;;  %v1431_v42 = vpop.f32.mrb[17].mxu0 }
 0x2ca   :  { %v1927_v6 = vadd.f32 %v1431_v42, %v2640_v60 }
 0x2cb   :  { %1588 = vst [vmem:[#allocation8 + $0x80] sm:$0xff] %v1926_v19 }
 0x2cc   :  { %1589 = vst [vmem:[#allocation8 + $0x88] sm:$0xff] %v1927_v6  ;;  %v1435_v25 = vpop.f32.mrb[18].mxu0 }
 0x2cd   :  { %v1928_v26 = vadd.f32 %v1435_v25, %v2636_v15  ;;  %v1437_v38 = vpop.f32.mrb[19].mxu0 }
 0x2ce   :  { %v1929_v39 = vadd.f32 %v1437_v38, %v2640_v60 }
 0x2cf   :  { %1590 = vst [vmem:[#allocation8 + $0x90] sm:$0xff] %v1928_v26 }
 0x2d0   :  { %1591 = vst [vmem:[#allocation8 + $0x98] sm:$0xff] %v1929_v39  ;;  %v1441_v44 = vpop.f32.mrb[20].mxu0 }
 0x2d1   :  { %v1930_v58 = vadd.f32 %v1441_v44, %v2636_v15  ;;  %v1443_v7 = vpop.f32.mrb[21].mxu0 }
 0x2d2   :  { %v1931_v13 = vadd.f32 %v1443_v7, %v2640_v60 }
 0x2d3   :  { %1592 = vst [vmem:[#allocation8 + $0xa0] sm:$0xff] %v1930_v58 }
 0x2d4   :  { %1593 = vst [vmem:[#allocation8 + $0xa8] sm:$0xff] %v1931_v13  ;;  %v1447_v31 = vpop.f32.mrb[22].mxu0 }
 0x2d5   :  { %v1932_v18 = vadd.f32 %v1447_v31, %v2636_v15  ;;  %v1449_v32 = vpop.f32.mrb[23].mxu0 }
 0x2d6   :  { %v1933_v46 = vadd.f32 %v1449_v32, %v2640_v60 }
 0x2d7   :  { %1594 = vst [vmem:[#allocation8 + $0xb0] sm:$0xff] %v1932_v18 }
 0x2d8   :  { %1595 = vst [vmem:[#allocation8 + $0xb8] sm:$0xff] %v1933_v46  ;;  %v1453_v52 = vpop.f32.mrb[24].mxu0 }
 0x2d9   :  { %v1934_v53 = vadd.f32 %v1453_v52, %v2636_v15  ;;  %v1455_v57 = vpop.f32.mrb[25].mxu0 }
 0x2da   :  { %v1935_v8 = vadd.f32 %v1455_v57, %v2640_v60 }
 0x2db   :  { %1596 = vst [vmem:[#allocation8 + $0xc0] sm:$0xff] %v1934_v53 }
 0x2dc   :  { %1597 = vst [vmem:[#allocation8 + $0xc8] sm:$0xff] %v1935_v8  ;;  %v1459_v10 = vpop.f32.mrb[26].mxu0 }
 0x2dd   :  { %v1936_v59 = vadd.f32 %v1459_v10, %v2636_v15  ;;  %v1461_v27 = vpop.f32.mrb[27].mxu0 }
 0x2de   :  { %v1937_v49 = vadd.f32 %v1461_v27, %v2640_v60 }
 0x2df   :  { %1598 = vst [vmem:[#allocation8 + $0xd0] sm:$0xff] %v1936_v59 }
 0x2e0   :  { %1599 = vst [vmem:[#allocation8 + $0xd8] sm:$0xff] %v1937_v49  ;;  %v1465_v48 = vpop.f32.mrb[28].mxu0 }
 0x2e1   :  { %v1938_v30 = vadd.f32 %v1465_v48, %v2636_v15  ;;  %v1467_v33 = vpop.f32.mrb[29].mxu0 }
 0x2e2   :  { %v1939_v55 = vadd.f32 %v1467_v33, %v2640_v60 }
 0x2e3   :  { %1600 = vst [vmem:[#allocation8 + $0xe0] sm:$0xff] %v1938_v30 }
 0x2e4   :  { %1601 = vst [vmem:[#allocation8 + $0xe8] sm:$0xff] %v1939_v55  ;;  %v1471_v29 = vpop.f32.mrb[30].mxu0 }
 0x2e5   :  { %v1940_v62 = vadd.f32 %v1471_v29, %v2636_v15  ;;  %v1473_v20 = vpop.f32.mrb[31].mxu0 }
 0x2e6   :  { %v1941_v14 = vadd.f32 %v1473_v20, %v2640_v60 }
 0x2e7   :  { %1602 = vst [vmem:[#allocation8 + $0xf0] sm:$0xff] %v1940_v62 }
 0x2e8   :  { %1603 = vst [vmem:[#allocation8 + $0xf8] sm:$0xff] %v1941_v14  ;;  %v1477_v50 = vpop.f32.mrb[32].mxu0 }
 0x2e9   :  { %v1942_v28 = vadd.f32 %v1477_v50, %v2636_v15  ;;  %v1479_v34 = vpop.f32.mrb[33].mxu0 }
 0x2ea   :  { %v1943_v45 = vadd.f32 %v1479_v34, %v2640_v60 }
 0x2eb   :  { %1604 = vst [vmem:[#allocation8 + $0x100] sm:$0xff] %v1942_v28 }
 0x2ec   :  { %1605 = vst [vmem:[#allocation8 + $0x108] sm:$0xff] %v1943_v45  ;;  %v1483_v36 = vpop.f32.mrb[34].mxu0 }
 0x2ed   :  { %v1944_v47 = vadd.f32 %v1483_v36, %v2636_v15  ;;  %v1485_v43 = vpop.f32.mrb[35].mxu0 }
 0x2ee   :  { %v1945_v40 = vadd.f32 %v1485_v43, %v2640_v60 }
 0x2ef   :  { %1606 = vst [vmem:[#allocation8 + $0x110] sm:$0xff] %v1944_v47 }
 0x2f0   :  { %1607 = vst [vmem:[#allocation8 + $0x118] sm:$0xff] %v1945_v40  ;;  %v1489_v51 = vpop.f32.mrb[36].mxu0 }
 0x2f1   :  { %v1946_v56 = vadd.f32 %v1489_v51, %v2636_v15  ;;  %v1491_v63 = vpop.f32.mrb[37].mxu0 }
 0x2f2   :  { %v1947_v2 = vadd.f32 %v1491_v63, %v2640_v60 }
 0x2f3   :  { %1608 = vst [vmem:[#allocation8 + $0x120] sm:$0xff] %v1946_v56 }
 0x2f4   :  { %1609 = vst [vmem:[#allocation8 + $0x128] sm:$0xff] %v1947_v2  ;;  %v1495_v16 = vpop.f32.mrb[38].mxu0 }
 0x2f5   :  { %v1948_v21 = vadd.f32 %v1495_v16, %v2636_v15  ;;  %v1497_v35 = vpop.f32.mrb[39].mxu0 }
 0x2f6   :  { %v1949_v37 = vadd.f32 %v1497_v35, %v2640_v60 }
 0x2f7   :  { %1610 = vst [vmem:[#allocation8 + $0x130] sm:$0xff] %v1948_v21 }
 0x2f8   :  { %1611 = vst [vmem:[#allocation8 + $0x138] sm:$0xff] %v1949_v37  ;;  %v1501_v0 = vpop.f32.mrb[40].mxu0 }
 0x2f9   :  { %v1950_v54 = vadd.f32 %v1501_v0, %v2636_v15  ;;  %v1503_v61 = vpop.f32.mrb[41].mxu0 }
 0x2fa   :  { %v1951_v12 = vadd.f32 %v1503_v61, %v2640_v60 }
 0x2fb   :  { %1612 = vst [vmem:[#allocation8 + $0x140] sm:$0xff] %v1950_v54 }
 0x2fc   :  { %1613 = vst [vmem:[#allocation8 + $0x148] sm:$0xff] %v1951_v12  ;;  %v1507_v22 = vpop.f32.mrb[42].mxu0 }
 0x2fd   :  { %v1952_v4 = vadd.f32 %v1507_v22, %v2636_v15  ;;  %v1509_v23 = vpop.f32.mrb[43].mxu0 }
 0x2fe   :  { %v1953_v41 = vadd.f32 %v1509_v23, %v2640_v60 }
 0x2ff   :  { %1614 = vst [vmem:[#allocation8 + $0x150] sm:$0xff] %v1952_v4 }
 0x300   :  { %1615 = vst [vmem:[#allocation8 + $0x158] sm:$0xff] %v1953_v41  ;;  %v1513_v24 = vpop.f32.mrb[44].mxu0 }
 0x301   :  { %v1954_v1 = vadd.f32 %v1513_v24, %v2636_v15  ;;  %v1515_v3 = vpop.f32.mrb[45].mxu0 }
 0x302   :  { %v1955_v9 = vadd.f32 %v1515_v3, %v2640_v60 }
 0x303   :  { %1616 = vst [vmem:[#allocation8 + $0x160] sm:$0xff] %v1954_v1 }
 0x304   :  { %1617 = vst [vmem:[#allocation8 + $0x168] sm:$0xff] %v1955_v9  ;;  %v1519_v5 = vpop.f32.mrb[46].mxu0 }
 0x305   :  { %v1956_v11 = vadd.f32 %v1519_v5, %v2636_v15  ;;  %v1521_v17 = vpop.f32.mrb[47].mxu0 }
 0x306   :  { %v1957_v19 = vadd.f32 %v1521_v17, %v2640_v60 }
 0x307   :  { %1618 = vst [vmem:[#allocation8 + $0x170] sm:$0xff] %v1956_v11 }
 0x308   :  { %1619 = vst [vmem:[#allocation8 + $0x178] sm:$0xff] %v1957_v19  ;;  %v1525_v42 = vpop.f32.mrb[48].mxu0 }
 0x309   :  { %v1958_v6 = vadd.f32 %v1525_v42, %v2636_v15  ;;  %v1527_v25 = vpop.f32.mrb[49].mxu0 }
 0x30a   :  { %v1959_v26 = vadd.f32 %v1527_v25, %v2640_v60 }
 0x30b   :  { %1620 = vst [vmem:[#allocation8 + $0x180] sm:$0xff] %v1958_v6 }
 0x30c   :  { %1621 = vst [vmem:[#allocation8 + $0x188] sm:$0xff] %v1959_v26  ;;  %v1531_v38 = vpop.f32.mrb[50].mxu0 }
 0x30d   :  { %v1960_v39 = vadd.f32 %v1531_v38, %v2636_v15  ;;  %v1533_v44 = vpop.f32.mrb[51].mxu0 }
 0x30e   :  { %v1961_v58 = vadd.f32 %v1533_v44, %v2640_v60 }
 0x30f   :  { %1622 = vst [vmem:[#allocation8 + $0x190] sm:$0xff] %v1960_v39 }
 0x310   :  { %1623 = vst [vmem:[#allocation8 + $0x198] sm:$0xff] %v1961_v58  ;;  %v1537_v7 = vpop.f32.mrb[52].mxu0 }
 0x311   :  { %v1962_v13 = vadd.f32 %v1537_v7, %v2636_v15  ;;  %v1539_v31 = vpop.f32.mrb[53].mxu0 }
 0x312   :  { %v1963_v18 = vadd.f32 %v1539_v31, %v2640_v60 }
 0x313   :  { %1624 = vst [vmem:[#allocation8 + $0x1a0] sm:$0xff] %v1962_v13 }
 0x314   :  { %1625 = vst [vmem:[#allocation8 + $0x1a8] sm:$0xff] %v1963_v18  ;;  %v1543_v32 = vpop.f32.mrb[54].mxu0 }
 0x315   :  { %v1964_v46 = vadd.f32 %v1543_v32, %v2636_v15  ;;  %v1545_v52 = vpop.f32.mrb[55].mxu0 }
 0x316   :  { %v1965_v53 = vadd.f32 %v1545_v52, %v2640_v60 }
 0x317   :  { %1626 = vst [vmem:[#allocation8 + $0x1b0] sm:$0xff] %v1964_v46 }
 0x318   :  { %1627 = vst [vmem:[#allocation8 + $0x1b8] sm:$0xff] %v1965_v53  ;;  %v1549_v57 = vpop.f32.mrb[56].mxu0 }
 0x319   :  { %v1966_v8 = vadd.f32 %v1549_v57, %v2636_v15  ;;  %v1551_v10 = vpop.f32.mrb[57].mxu0 }
 0x31a   :  { %v1967_v59 = vadd.f32 %v1551_v10, %v2640_v60 }
 0x31b   :  { %1628 = vst [vmem:[#allocation8 + $0x1c0] sm:$0xff] %v1966_v8 }
 0x31c   :  { %1629 = vst [vmem:[#allocation8 + $0x1c8] sm:$0xff] %v1967_v59  ;;  %v1555_v27 = vpop.f32.mrb[58].mxu0 }
 0x31d   :  { %v1968_v49 = vadd.f32 %v1555_v27, %v2636_v15  ;;  %v1557_v48 = vpop.f32.mrb[59].mxu0 }
 0x31e   :  { %v1969_v30 = vadd.f32 %v1557_v48, %v2640_v60 }
 0x31f   :  { %1630 = vst [vmem:[#allocation8 + $0x1d0] sm:$0xff] %v1968_v49 }
 0x320   :  { %1631 = vst [vmem:[#allocation8 + $0x1d8] sm:$0xff] %v1969_v30  ;;  %v1561_v33 = vpop.f32.mrb[60].mxu0 }
 0x321   :  { %v1970_v55 = vadd.f32 %v1561_v33, %v2636_v15  ;;  %v1563_v29 = vpop.f32.mrb[61].mxu0 }
 0x322   :  { %v1971_v62 = vadd.f32 %v1563_v29, %v2640_v60 }
 0x323   :  { %1632 = vst [vmem:[#allocation8 + $0x1e0] sm:$0xff] %v1970_v55 }
 0x324   :  { %1633 = vst [vmem:[#allocation8 + $0x1e8] sm:$0xff] %v1971_v62  ;;  %v1567_v20 = vpop.f32.mrb[62].mxu0 }
 0x325   :  { %v1972_v14 = vadd.f32 %v1567_v20, %v2636_v15  ;;  %v1569_v50 = vpop.f32.mrb[63].mxu0 }
 0x326   :  { %v1973_v28 = vadd.f32 %v1569_v50, %v2640_v60 }
 0x327   :  { %1634 = vst [vmem:[#allocation8 + $0x1f0] sm:$0xff] %v1972_v14 }
 0x328   :  { %1635 = vst [vmem:[#allocation8 + $0x1f8] sm:$0xff] %v1973_v28 }
 0x329   :  { %2123 = shalt.err (!%p2120_p0)
}
 0x32a   :  { %s2124_s12 = scalar_lea.hbm %s2726_s5, 8192 }
 0x32b   :  { %p2125_p1 = scmp.ne.s32.totalorder %s2726_s5, %s2124_s12  ;;  %p2128_p2 = scmp.lt.u32.totalorder %s2124_s12, %s2726_s5 }
 0x32d   :  { %p2130_p3 = pnand %p2128_p2, %p2125_p1 }
 0x32f   :  { %2133 = shalt.err (!%p2130_p3)
}
 0x330   :  { %1647 = dma.vmem_to_hbm [thread:$0]  %s1642_s8, 8192, %s2726_s5, [#allocation4], %s2144_s1, %s2144_s1, %s2145_s17  }
 0x331   :  { %2138 = dma.done.wait [#allocation4], 8192  }
 0x332   :  { %2139 = vsyncadd [#allocation4], 4294959104 }
 0x333   :  { %1651 = vsyncpa [#allocation3], 1 }
 0x334   :  { %1652 = vsyncpa [#allocation6], 1 }
 0x335   :  { %1653 = vsyncpa [#allocation4], 1 }

</bundles_post_ra>
